<compile_context>
chip_gen: v7x
topology: tpu7x:2x2x1
jax: 0.10.0
libtpu: 0.0.40
codegen_flags: <defaults>
</compile_context>

<pallas_src>
import functools
import math

import jax
import jax.numpy as jnp
from jax.experimental import pallas as pl
from jax.experimental.pallas import tpu as pltpu

# --------------------------------------------------------------------------
# Model hyper-parameters (small but consistent with ConditionalDiscreteVae)
# --------------------------------------------------------------------------
HIDDEN_SIZE = 256
NUM_LAYERS = 3
LATENT_DIM = 8        # N
LATENT_SIZE = 32      # M  (power of two; used for in-kernel one-hot gather)
EMBEDDING_DIM = 32    # D
OUTPUT_SHAPE = (1, 16, 16)            # prod = 256 (stand-in for (1, 28, 28))
NUM_LABELS = 10
D_OUT = int(math.prod(OUTPUT_SHAPE))
D_LATENT = LATENT_DIM * EMBEDDING_DIM     # 256
LOGIT_WIDTH = LATENT_DIM * LATENT_SIZE    # 256
LN_EPS = 1e-5
_SQRT2 = math.sqrt(2.0)
GELU_TANH_APPROX = False   # set True on v5e if the erf VPU chain dominates

N_LIN = NUM_LAYERS + 1     # linear layers per MLP
N_LN = NUM_LAYERS - 1      # layernorm layers per MLP

assert LATENT_SIZE & (LATENT_SIZE - 1) == 0, "LATENT_SIZE must be a power of 2"


def _gelu(y):
    if GELU_TANH_APPROX:
        return jax.nn.gelu(y, approximate=True)
    # exact (erf) GELU, matching torch.nn.GELU default
    return 0.5 * y * (1.0 + jax.lax.erf(y / _SQRT2))


def _dot_bf16(a, w_bf16):
    # bf16 operands, f32 accumulation (MXU-native on v5e/v6e/v7x).
    return jnp.dot(a.astype(jnp.bfloat16), w_bf16,
                   preferred_element_type=jnp.float32)


# --------------------------------------------------------------------------
# Shared in-kernel building blocks
# --------------------------------------------------------------------------
def _unpack_mlp_refs(refs):
    w = refs[0:N_LIN]
    b = refs[N_LIN:2 * N_LIN]
    g = refs[2 * N_LIN:2 * N_LIN + N_LN]
    bt = refs[2 * N_LIN + N_LN:2 * N_LIN + 2 * N_LN]
    rest = refs[2 * N_LIN + 2 * N_LN:]
    return w, b, g, bt, rest


def _mlp_from_refs(h, w_refs, b_refs, g_refs, bt_refs):
    # Linear + GELU
    h = _gelu(_dot_bf16(h, w_refs[0][...]) + b_refs[0][...])
    # (num_layers - 1) x [LayerNorm, Linear, GELU]   (LN math in f32)
    for i in range(len(g_refs)):
        mu = jnp.mean(h, axis=-1, keepdims=True)
        var = jnp.mean(jnp.square(h - mu), axis=-1, keepdims=True)
        hn = (h - mu) * jax.lax.rsqrt(var + LN_EPS)
        hn = hn * g_refs[i][...] + bt_refs[i][...]
        h = _gelu(_dot_bf16(hn, w_refs[i + 1][...]) + b_refs[i + 1][...])
    # final Linear (no activation)
    return _dot_bf16(h, w_refs[-1][...]) + b_refs[-1][...]


def _group_log_softmax(logits):
    # logits: (R, N*M), lane-dense.  Per-group (size M) log-softmax.  The
    # per-group LSEs are merged into one full-width tensor via iota masks so
    # the caller can do a SINGLE lane-dense 256-wide store (no masked
    # 32-lane partial stores).
    r, width = logits.shape
    lane = jax.lax.broadcasted_iota(jnp.int32, (r, width), 1)
    lse_full = jnp.zeros_like(logits)
    for n in range(LATENT_DIM):                       # static unroll (N small)
        lo = n * LATENT_SIZE
        lg = logits[:, lo:lo + LATENT_SIZE]           # (R, M) static lane slice
        mx = jnp.max(lg, axis=-1, keepdims=True)
        lse = mx + jnp.log(jnp.sum(jnp.exp(lg - mx), axis=-1, keepdims=True))
        mask = ((lane >= lo) & (lane < lo + LATENT_SIZE)).astype(logits.dtype)
        lse_full = lse_full + lse * mask              # disjoint masks -> select
    return logits - lse_full


# --------------------------------------------------------------------------
# Pallas kernels
# --------------------------------------------------------------------------
def _prior_posterior_kernel(scales_ref, hy_ref, x_ref, *refs):
    # Fused in ONE launch: encoder MLP, prior + posterior embedding matmuls
    # against a shared unscaled bf16 block-diagonal embedding operand, f32
    # post-matmul scaling, and both per-group log-softmaxes.
    w, b, g, bt, rest = _unpack_mlp_refs(refs)
    eblk_ref, prior_ref, post_ref = rest
    eblk = eblk_ref[...]                              # (N*D, N*M) bf16, unscaled

    prior_logits = _dot_bf16(hy_ref[...], eblk) * scales_ref[0]       # (B, N*M)
    h_x = _mlp_from_refs(x_ref[...], w, b, g, bt)                     # (B, N*D)
    post_logits = _dot_bf16(h_x, eblk) * scales_ref[1]                # (B, N*M)

    prior_ref[...] = _group_log_softmax(prior_logits)   # one 256-wide store
    post_ref[...] = _group_log_softmax(post_logits)     # one 256-wide store


def _decoder_kernel(idx_ref, x_ref, gblk_ref, *refs):
    # Fused: in-kernel z-embedding gather (one-hot matmul against the
    # block-diagonal embedding matrix), decoder MLP, Bernoulli log-prob
    # reduction.  Weights / gblk are VMEM-resident (constant index_map).
    w, b, g, bt, rest = _unpack_mlp_refs(refs)
    xl_ref, lp_ref = rest

    idx = idx_ref[0]                          # (rpb, N) f32, values in [0, M)
    x = x_ref[0]                              # (bpb, D_OUT) f32
    rpb = idx.shape[0]
    bpb = x.shape[0]
    spb = rpb // bpb                          # samples per batch element
    width = LOGIT_WIDTH

    # Expand idx to a per-lane target via a tiny (rpb,N)x(N,N*M) matmul (exact:
    # single nonzero per product), then one-hot against lane%M.
    lane_r = jax.lax.broadcasted_iota(jnp.int32, (LATENT_DIM, width), 1)
    grp_r = jax.lax.broadcasted_iota(jnp.int32, (LATENT_DIM, width), 0)
    rep = ((lane_r >= grp_r * LATENT_SIZE)
           & (lane_r < (grp_r + 1) * LATENT_SIZE)).astype(jnp.bfloat16)
    target = jnp.dot(idx.astype(jnp.bfloat16), rep,
                     preferred_element_type=jnp.float32)               # (rpb, N*M)
    lane = jax.lax.broadcasted_iota(jnp.int32, (rpb, width), 1)
    onehot = (target.astype(jnp.int32) == (lane & (LATENT_SIZE - 1))
              ).astype(jnp.bfloat16)                                   # (rpb, N*M)
    z = jnp.dot(onehot, gblk_ref[...],
                preferred_element_type=jnp.float32)                    # (rpb, N*D)

    logits = _mlp_from_refs(z, w, b, g, bt)                            # (rpb, D_OUT)
    xl_ref[0] = logits

    # Bernoulli log-prob: sum(x*l - softplus(l)) over pixels (log1p for precision).
    sp = jnp.maximum(logits, 0.0) + jnp.log1p(jnp.exp(-jnp.abs(logits)))
    if bpb == 1:
        x_rows = x                                                     # (1, D_OUT) broadcast
    else:
        row = jax.lax.broadcasted_iota(jnp.int32, (rpb, D_OUT), 0)
        x_rows = jnp.zeros((rpb, D_OUT), jnp.float32)
        for bb in range(bpb):                                          # static, bpb small
            m = ((row >= bb * spb) & (row < (bb + 1) * spb)).astype(jnp.float32)
            x_rows = x_rows + m * x[bb:bb + 1, :]
    lp_ref[0] = jnp.sum(x_rows * logits - sp, axis=-1, keepdims=True)  # (rpb, 1)


# --------------------------------------------------------------------------
# pallas_call wrappers
# --------------------------------------------------------------------------
def _vmem_spec():
    return pl.BlockSpec(memory_space=pltpu.MemorySpace.VMEM)


def _smem_spec():
    return pl.BlockSpec(memory_space=pltpu.MemorySpace.SMEM)


def _mlp_operands(p):
    # weight matrices in bf16 for the MXU; biases / LN params stay f32.
    ws = [w.astype(jnp.bfloat16) for w in p["w"]]
    return ws + list(p["b"]) + list(p["ln_g"]) + list(p["ln_b"])


def _block_diag_embeddings(embeddings):
    # embeddings: (N, M, D) -> block-diagonal (N*D, N*M) with block n = emb[n].T,
    # so that h_flat @ E == einsum('...nd,nmd->...nm', h, emb) flattened over (n,m).
    n, m, d = embeddings.shape
    et = jnp.transpose(embeddings, (0, 2, 1))              # (N, D, M)
    eye = jnp.eye(n, dtype=embeddings.dtype)
    blk = jnp.einsum("ndm,nk->ndkm", et, eye)              # (N, D, N, M)
    return blk.reshape(n * d, n * m)


def _decoder_num_blocks(batch, n_samples):
    # v7x has 2 TensorCores per chip -> split the flattened rows into 2
    # "parallel" blocks; v5e/v6e (1 TC) -> a single step (less launch/step
    # overhead, per the perf review).
    rows = batch * n_samples
    try:
        kind = jax.devices()[0].device_kind.lower()
    except Exception:
        kind = ""
    two_tc = ("v7" in kind) or ("7x" in kind)
    if two_tc and batch % 2 == 0 and (rows // 2) % 8 == 0:
        return 2
    return 1


def pallas_prior_posterior(scales, h_y, x_flat, enc_params, eblk):
    bsz = x_flat.shape[0]
    ops = _mlp_operands(enc_params)
    n_in = 3 + len(ops) + 1
    prior, post = pl.pallas_call(
        _prior_posterior_kernel,
        out_shape=(
            jax.ShapeDtypeStruct((bsz, LOGIT_WIDTH), jnp.float32),
            jax.ShapeDtypeStruct((bsz, LOGIT_WIDTH), jnp.float32),
        ),
        in_specs=[_smem_spec()] + [_vmem_spec()] * (n_in - 1),
        out_specs=(_vmem_spec(), _vmem_spec()),
    )(scales, h_y, x_flat, *ops, eblk)
    return (prior.reshape(bsz, LATENT_DIM, LATENT_SIZE),
            post.reshape(bsz, LATENT_DIM, LATENT_SIZE))


def pallas_decode_and_logprob(idx_rows, x_flat, dec_params, gblk, num_blocks):
    rows, n_dim = idx_rows.shape
    bsz = x_flat.shape[0]
    n_samples = rows // bsz
    rpb = rows // num_blocks
    bpb = bsz // num_blocks
    ops = _mlp_operands(dec_params)

    idx_b = idx_rows.reshape(num_blocks, rpb, n_dim)
    x_b = x_flat.reshape(num_blocks, bpb, D_OUT)

    # All weight operands are 2D -> constant (0, 0) block index (VMEM-resident).
    weight_specs = [pl.BlockSpec(op.shape, lambda i: (0, 0)) for op in ops]

    xl, lp = pl.pallas_call(
        _decoder_kernel,
        out_shape=(
            jax.ShapeDtypeStruct((num_blocks, rpb, D_OUT), jnp.float32),
            jax.ShapeDtypeStruct((num_blocks, rpb, 1), jnp.float32),
        ),
        grid=(num_blocks,),
        in_specs=[
            pl.BlockSpec((1, rpb, n_dim), lambda i: (i, 0, 0)),
            pl.BlockSpec((1, bpb, D_OUT), lambda i: (i, 0, 0)),
            pl.BlockSpec(gblk.shape, lambda i: (0, 0)),
            *weight_specs,
        ],
        out_specs=(
            pl.BlockSpec((1, rpb, D_OUT), lambda i: (i, 0, 0)),
            pl.BlockSpec((1, rpb, 1), lambda i: (i, 0, 0)),
        ),
        compiler_params=pltpu.CompilerParams(
            dimension_semantics=("parallel",)),
    )(idx_b, x_b, gblk, *ops)
    return (xl.reshape(bsz, n_samples, D_OUT),
            lp.reshape(bsz, n_samples))


# --------------------------------------------------------------------------
# Model pieces (glue in plain JAX, compute in Pallas)
# --------------------------------------------------------------------------
def init_mlp(key, d_in, hidden, d_out, num_layers):
    sizes = [d_in] + [hidden] * num_layers + [d_out]
    ws, bs = [], []
    for i in range(len(sizes) - 1):
        key, k1, k2 = jax.random.split(key, 3)
        bound = 1.0 / math.sqrt(sizes[i])
        ws.append(jax.random.uniform(k1, (sizes[i], sizes[i + 1]),
                                     jnp.float32, -bound, bound))
        bs.append(jax.random.uniform(k2, (1, sizes[i + 1]),
                                     jnp.float32, -bound, bound))
    ln_g = [jnp.ones((1, hidden), jnp.float32) for _ in range(num_layers - 1)]
    ln_b = [jnp.zeros((1, hidden), jnp.float32) for _ in range(num_layers - 1)]
    return {"w": ws, "b": bs, "ln_g": ln_g, "ln_b": ln_b}


def forward(params, x, y, key, n_samples=8, alpha=0.0, beta=1.0):
    bsz = x.shape[0]
    x_flat = x.reshape(bsz, -1).astype(jnp.float32)

    # Unscaled block-diagonal embedding operands; the scalar scales are applied
    # post-matmul in f32 inside the kernel (no bf16 quantization of scale*E).
    blk = _block_diag_embeddings(params["embeddings"])       # (N*D, N*M) f32
    eblk = blk.astype(jnp.bfloat16)                          # prior/posterior matmul
    gblk = blk.T.astype(jnp.bfloat16)                        # (N*M, N*D) decoder gather
    scales = jnp.stack([params["scale_prior"],
                        params["scale_posterior"]]).astype(jnp.float32)

    h_y = jnp.take(params["label_emb"], y, axis=0)           # (B, N*D)
    prior, posterior = pallas_prior_posterior(
        scales, h_y, x_flat, params["encoder"], eblk)        # each (B, N, M)

    sampling_dist = beta * posterior

    # TODO(synk): vod.priority_sample is an external dep; categorical sampling stand-in.
    samples = jax.random.categorical(
        key, sampling_dist, axis=-1,
        shape=(n_samples,) + sampling_dist.shape[:-1])       # (S, B, N)
    idx = jnp.transpose(samples, (1, 2, 0)).astype(jnp.int32)  # (B, N, S)

    log_p_z = jnp.take_along_axis(prior, idx, axis=-1)       # (B, N, S)
    log_q_z = jnp.take_along_axis(posterior, idx, axis=-1)
    log_s_z = jnp.take_along_axis(sampling_dist, idx, axis=-1)

    # (B*S, N) index rows (batch-major) for the fused in-kernel gather.
    idx_rows = jnp.transpose(idx, (0, 2, 1)).reshape(
        bsz * n_samples, LATENT_DIM).astype(jnp.float32)

    num_blocks = _decoder_num_blocks(bsz, n_samples)
    x_logits, log_p_x__z = pallas_decode_and_logprob(
        idx_rows, x_flat, params["decoder"], gblk, num_blocks)   # (B,S,256),(B,S)

    f_theta = jnp.sum(log_p_z, axis=1)                       # (B, S)
    f_phi = jnp.sum(log_q_z, axis=1)
    f_psi = jnp.sum(log_s_z, axis=1)

    # TODO(synk): vod.vod_ovis objective is an external dep; IWAE-style bound stand-in.
    # Use a normalized sampling distribution for the importance weights so the
    # stand-in bound is unbiased (beta*log q is unnormalized in general).
    log_s_norm = sampling_dist - jax.nn.logsumexp(sampling_dist, axis=-1, keepdims=True)
    f_psi_norm = jnp.sum(jnp.take_along_axis(log_s_norm, idx, axis=-1), axis=1)
    log_w = log_p_x__z + f_theta - f_psi_norm
    elbo = jax.nn.logsumexp(log_w, axis=-1) - jnp.log(float(n_samples))
    loss = -jnp.mean(elbo)

    return {"x_logits": x_logits, "loss": loss,
            "log_p_x__z": log_p_x__z, "f_theta": f_theta,
            "f_phi": f_phi, "f_psi": f_psi}


# --------------------------------------------------------------------------
# Main
# --------------------------------------------------------------------------
if __name__ == "__main__":
    key = jax.random.PRNGKey(0)
    k_param, k_x, k_y, k_sample = jax.random.split(key, 4)
    k_emb, k_lab, k_enc, k_dec = jax.random.split(k_param, 4)

    params = {
        "embeddings": jax.random.normal(
            k_emb, (LATENT_DIM, LATENT_SIZE, EMBEDDING_DIM), jnp.float32),
        "label_emb": jax.random.normal(
            k_lab, (NUM_LABELS, LATENT_DIM * EMBEDDING_DIM), jnp.float32),
        "scale_prior": jnp.float32(1e-5),
        "scale_posterior": jnp.float32(1e-5),
        "encoder": init_mlp(k_enc, D_OUT, HIDDEN_SIZE, D_LATENT, NUM_LAYERS),
        "decoder": init_mlp(k_dec, D_LATENT, HIDDEN_SIZE, D_OUT, NUM_LAYERS),
    }

    batch = 2
    n_samples = 8
    x = (jax.random.uniform(k_x, (batch,) + OUTPUT_SHAPE) > 0.5).astype(jnp.float32)
    y = jax.random.randint(k_y, (batch,), 0, NUM_LABELS, dtype=jnp.int32)

    fwd = jax.jit(functools.partial(forward, n_samples=n_samples))
    out = fwd(params, x, y, k_sample)
    jax.block_until_ready(out["x_logits"])
    jax.block_until_ready(out["loss"])
    print("KERNEL_OK")
</pallas_src>

<mosaic_0001>
module attributes {stable_mosaic.version = 11 : i64} {
  func.func @_prior_posterior_kernel(%arg0: memref<2xf32, #tpu.memory_space<smem>>, %arg1: memref<2x256xf32, #tpu.memory_space<vmem>>, %arg2: memref<2x256xf32, #tpu.memory_space<vmem>>, %arg3: memref<256x256xbf16, #tpu.memory_space<vmem>>, %arg4: memref<256x256xbf16, #tpu.memory_space<vmem>>, %arg5: memref<256x256xbf16, #tpu.memory_space<vmem>>, %arg6: memref<256x256xbf16, #tpu.memory_space<vmem>>, %arg7: memref<1x256xf32, #tpu.memory_space<vmem>>, %arg8: memref<1x256xf32, #tpu.memory_space<vmem>>, %arg9: memref<1x256xf32, #tpu.memory_space<vmem>>, %arg10: memref<1x256xf32, #tpu.memory_space<vmem>>, %arg11: memref<1x256xf32, #tpu.memory_space<vmem>>, %arg12: memref<1x256xf32, #tpu.memory_space<vmem>>, %arg13: memref<1x256xf32, #tpu.memory_space<vmem>>, %arg14: memref<1x256xf32, #tpu.memory_space<vmem>>, %arg15: memref<256x256xbf16, #tpu.memory_space<vmem>>, %arg16: memref<2x256xf32, #tpu.memory_space<vmem>>, %arg17: memref<2x256xf32, #tpu.memory_space<vmem>>) attributes {dimension_semantics = [], scalar_prefetch = 0 : i64, scratch_operands = 0 : i64, tpu.core_type = #tpu.core_type<tc>} {
    %c0 = arith.constant 0 : index
    %c0_0 = arith.constant 0 : index
    %0 = vector.load %arg15[%c0, %c0_0] : memref<256x256xbf16, #tpu.memory_space<vmem>>, vector<256x256xbf16>
    %c0_1 = arith.constant 0 : index
    %c0_2 = arith.constant 0 : index
    %1 = vector.load %arg1[%c0_1, %c0_2] : memref<2x256xf32, #tpu.memory_space<vmem>>, vector<2x256xf32>
    %2 = arith.truncf %1 : vector<2x256xf32> to vector<2x256xbf16>
    %cst = arith.constant dense<0.000000e+00> : vector<2x256xf32>
    %3 = tpu.matmul %2, %0, %cst {dimension_numbers = #tpu.dot_dimension_numbers<[1], [0], [0], [1], [0, 0, 1, 1], [], []>} : vector<2x256xbf16>, vector<256x256xbf16>, vector<2x256xf32> -> vector<2x256xf32>
    %c0_3 = arith.constant 0 : index
    %4 = memref.load %arg0[%c0_3] : memref<2xf32, #tpu.memory_space<smem>>
    %5 = vector.broadcast %4 : f32 to vector<2x256xf32>
    %6 = arith.mulf %3, %5 : vector<2x256xf32>
    %c0_4 = arith.constant 0 : index
    %c0_5 = arith.constant 0 : index
    %7 = vector.load %arg2[%c0_4, %c0_5] : memref<2x256xf32, #tpu.memory_space<vmem>>, vector<2x256xf32>
    %c0_6 = arith.constant 0 : index
    %c0_7 = arith.constant 0 : index
    %8 = vector.load %arg3[%c0_6, %c0_7] : memref<256x256xbf16, #tpu.memory_space<vmem>>, vector<256x256xbf16>
    %9 = arith.truncf %7 : vector<2x256xf32> to vector<2x256xbf16>
    %cst_8 = arith.constant dense<0.000000e+00> : vector<2x256xf32>
    %10 = tpu.matmul %9, %8, %cst_8 {dimension_numbers = #tpu.dot_dimension_numbers<[1], [0], [0], [1], [0, 0, 1, 1], [], []>} : vector<2x256xbf16>, vector<256x256xbf16>, vector<2x256xf32> -> vector<2x256xf32>
    %c0_9 = arith.constant 0 : index
    %c0_10 = arith.constant 0 : index
    %11 = vector.load %arg7[%c0_9, %c0_10] : memref<1x256xf32, #tpu.memory_space<vmem>>, vector<1x256xf32>
    %12 = vector.broadcast %11 : vector<1x256xf32> to vector<2x256xf32>
    %13 = arith.addf %10, %12 : vector<2x256xf32>
    %cst_11 = arith.constant 5.000000e-01 : f32
    %14 = vector.broadcast %cst_11 : f32 to vector<2x256xf32>
    %15 = arith.mulf %14, %13 : vector<2x256xf32>
    %cst_12 = arith.constant 1.41421354 : f32
    %16 = vector.broadcast %cst_12 : f32 to vector<2x256xf32>
    %17 = arith.divf %13, %16 : vector<2x256xf32>
    %18 = math.erf %17 : vector<2x256xf32>
    %cst_13 = arith.constant 1.000000e+00 : f32
    %19 = vector.broadcast %cst_13 : f32 to vector<2x256xf32>
    %20 = arith.addf %19, %18 : vector<2x256xf32>
    %21 = arith.mulf %15, %20 : vector<2x256xf32>
    %cst_14 = arith.constant dense<0.000000e+00> : vector<2xf32>
    %22 = vector.multi_reduction <add>, %21, %cst_14 [1] : vector<2x256xf32> to vector<2xf32>
    %23 = vector.shape_cast %22 : vector<2xf32> to vector<2x1xf32>
    %cst_15 = arith.constant 2.560000e+02 : f32
    %24 = vector.broadcast %cst_15 : f32 to vector<2x1xf32>
    %25 = arith.divf %23, %24 : vector<2x1xf32>
    %26 = vector.broadcast %25 : vector<2x1xf32> to vector<2x256xf32>
    %27 = arith.subf %21, %26 : vector<2x256xf32>
    %28 = arith.mulf %27, %27 : vector<2x256xf32>
    %cst_16 = arith.constant dense<0.000000e+00> : vector<2xf32>
    %29 = vector.multi_reduction <add>, %28, %cst_16 [1] : vector<2x256xf32> to vector<2xf32>
    %30 = vector.shape_cast %29 : vector<2xf32> to vector<2x1xf32>
    %cst_17 = arith.constant 2.560000e+02 : f32
    %31 = vector.broadcast %cst_17 : f32 to vector<2x1xf32>
    %32 = arith.divf %30, %31 : vector<2x1xf32>
    %33 = vector.broadcast %25 : vector<2x1xf32> to vector<2x256xf32>
    %34 = arith.subf %21, %33 : vector<2x256xf32>
    %cst_18 = arith.constant 9.99999974E-6 : f32
    %35 = vector.broadcast %cst_18 : f32 to vector<2x1xf32>
    %36 = arith.addf %32, %35 : vector<2x1xf32>
    %37 = math.rsqrt %36 : vector<2x1xf32>
    %38 = vector.broadcast %37 : vector<2x1xf32> to vector<2x256xf32>
    %39 = arith.mulf %34, %38 : vector<2x256xf32>
    %c0_19 = arith.constant 0 : index
    %c0_20 = arith.constant 0 : index
    %40 = vector.load %arg11[%c0_19, %c0_20] : memref<1x256xf32, #tpu.memory_space<vmem>>, vector<1x256xf32>
    %41 = vector.broadcast %40 : vector<1x256xf32> to vector<2x256xf32>
    %42 = arith.mulf %39, %41 : vector<2x256xf32>
    %c0_21 = arith.constant 0 : index
    %c0_22 = arith.constant 0 : index
    %43 = vector.load %arg13[%c0_21, %c0_22] : memref<1x256xf32, #tpu.memory_space<vmem>>, vector<1x256xf32>
    %44 = vector.broadcast %43 : vector<1x256xf32> to vector<2x256xf32>
    %45 = arith.addf %42, %44 : vector<2x256xf32>
    %c0_23 = arith.constant 0 : index
    %c0_24 = arith.constant 0 : index
    %46 = vector.load %arg4[%c0_23, %c0_24] : memref<256x256xbf16, #tpu.memory_space<vmem>>, vector<256x256xbf16>
    %47 = arith.truncf %45 : vector<2x256xf32> to vector<2x256xbf16>
    %cst_25 = arith.constant dense<0.000000e+00> : vector<2x256xf32>
    %48 = tpu.matmul %47, %46, %cst_25 {dimension_numbers = #tpu.dot_dimension_numbers<[1], [0], [0], [1], [0, 0, 1, 1], [], []>} : vector<2x256xbf16>, vector<256x256xbf16>, vector<2x256xf32> -> vector<2x256xf32>
    %c0_26 = arith.constant 0 : index
    %c0_27 = arith.constant 0 : index
    %49 = vector.load %arg8[%c0_26, %c0_27] : memref<1x256xf32, #tpu.memory_space<vmem>>, vector<1x256xf32>
    %50 = vector.broadcast %49 : vector<1x256xf32> to vector<2x256xf32>
    %51 = arith.addf %48, %50 : vector<2x256xf32>
    %cst_28 = arith.constant 5.000000e-01 : f32
    %52 = vector.broadcast %cst_28 : f32 to vector<2x256xf32>
    %53 = arith.mulf %52, %51 : vector<2x256xf32>
    %cst_29 = arith.constant 1.41421354 : f32
    %54 = vector.broadcast %cst_29 : f32 to vector<2x256xf32>
    %55 = arith.divf %51, %54 : vector<2x256xf32>
    %56 = math.erf %55 : vector<2x256xf32>
    %cst_30 = arith.constant 1.000000e+00 : f32
    %57 = vector.broadcast %cst_30 : f32 to vector<2x256xf32>
    %58 = arith.addf %57, %56 : vector<2x256xf32>
    %59 = arith.mulf %53, %58 : vector<2x256xf32>
    %cst_31 = arith.constant dense<0.000000e+00> : vector<2xf32>
    %60 = vector.multi_reduction <add>, %59, %cst_31 [1] : vector<2x256xf32> to vector<2xf32>
    %61 = vector.shape_cast %60 : vector<2xf32> to vector<2x1xf32>
    %cst_32 = arith.constant 2.560000e+02 : f32
    %62 = vector.broadcast %cst_32 : f32 to vector<2x1xf32>
    %63 = arith.divf %61, %62 : vector<2x1xf32>
    %64 = vector.broadcast %63 : vector<2x1xf32> to vector<2x256xf32>
    %65 = arith.subf %59, %64 : vector<2x256xf32>
    %66 = arith.mulf %65, %65 : vector<2x256xf32>
    %cst_33 = arith.constant dense<0.000000e+00> : vector<2xf32>
    %67 = vector.multi_reduction <add>, %66, %cst_33 [1] : vector<2x256xf32> to vector<2xf32>
    %68 = vector.shape_cast %67 : vector<2xf32> to vector<2x1xf32>
    %cst_34 = arith.constant 2.560000e+02 : f32
    %69 = vector.broadcast %cst_34 : f32 to vector<2x1xf32>
    %70 = arith.divf %68, %69 : vector<2x1xf32>
    %71 = vector.broadcast %63 : vector<2x1xf32> to vector<2x256xf32>
    %72 = arith.subf %59, %71 : vector<2x256xf32>
    %cst_35 = arith.constant 9.99999974E-6 : f32
    %73 = vector.broadcast %cst_35 : f32 to vector<2x1xf32>
    %74 = arith.addf %70, %73 : vector<2x1xf32>
    %75 = math.rsqrt %74 : vector<2x1xf32>
    %76 = vector.broadcast %75 : vector<2x1xf32> to vector<2x256xf32>
    %77 = arith.mulf %72, %76 : vector<2x256xf32>
    %c0_36 = arith.constant 0 : index
    %c0_37 = arith.constant 0 : index
    %78 = vector.load %arg12[%c0_36, %c0_37] : memref<1x256xf32, #tpu.memory_space<vmem>>, vector<1x256xf32>
    %79 = vector.broadcast %78 : vector<1x256xf32> to vector<2x256xf32>
    %80 = arith.mulf %77, %79 : vector<2x256xf32>
    %c0_38 = arith.constant 0 : index
    %c0_39 = arith.constant 0 : index
    %81 = vector.load %arg14[%c0_38, %c0_39] : memref<1x256xf32, #tpu.memory_space<vmem>>, vector<1x256xf32>
    %82 = vector.broadcast %81 : vector<1x256xf32> to vector<2x256xf32>
    %83 = arith.addf %80, %82 : vector<2x256xf32>
    %c0_40 = arith.constant 0 : index
    %c0_41 = arith.constant 0 : index
    %84 = vector.load %arg5[%c0_40, %c0_41] : memref<256x256xbf16, #tpu.memory_space<vmem>>, vector<256x256xbf16>
    %85 = arith.truncf %83 : vector<2x256xf32> to vector<2x256xbf16>
    %cst_42 = arith.constant dense<0.000000e+00> : vector<2x256xf32>
    %86 = tpu.matmul %85, %84, %cst_42 {dimension_numbers = #tpu.dot_dimension_numbers<[1], [0], [0], [1], [0, 0, 1, 1], [], []>} : vector<2x256xbf16>, vector<256x256xbf16>, vector<2x256xf32> -> vector<2x256xf32>
    %c0_43 = arith.constant 0 : index
    %c0_44 = arith.constant 0 : index
    %87 = vector.load %arg9[%c0_43, %c0_44] : memref<1x256xf32, #tpu.memory_space<vmem>>, vector<1x256xf32>
    %88 = vector.broadcast %87 : vector<1x256xf32> to vector<2x256xf32>
    %89 = arith.addf %86, %88 : vector<2x256xf32>
    %cst_45 = arith.constant 5.000000e-01 : f32
    %90 = vector.broadcast %cst_45 : f32 to vector<2x256xf32>
    %91 = arith.mulf %90, %89 : vector<2x256xf32>
    %cst_46 = arith.constant 1.41421354 : f32
    %92 = vector.broadcast %cst_46 : f32 to vector<2x256xf32>
    %93 = arith.divf %89, %92 : vector<2x256xf32>
    %94 = math.erf %93 : vector<2x256xf32>
    %cst_47 = arith.constant 1.000000e+00 : f32
    %95 = vector.broadcast %cst_47 : f32 to vector<2x256xf32>
    %96 = arith.addf %95, %94 : vector<2x256xf32>
    %97 = arith.mulf %91, %96 : vector<2x256xf32>
    %c0_48 = arith.constant 0 : index
    %c0_49 = arith.constant 0 : index
    %98 = vector.load %arg6[%c0_48, %c0_49] : memref<256x256xbf16, #tpu.memory_space<vmem>>, vector<256x256xbf16>
    %99 = arith.truncf %97 : vector<2x256xf32> to vector<2x256xbf16>
    %cst_50 = arith.constant dense<0.000000e+00> : vector<2x256xf32>
    %100 = tpu.matmul %99, %98, %cst_50 {dimension_numbers = #tpu.dot_dimension_numbers<[1], [0], [0], [1], [0, 0, 1, 1], [], []>} : vector<2x256xbf16>, vector<256x256xbf16>, vector<2x256xf32> -> vector<2x256xf32>
    %c0_51 = arith.constant 0 : index
    %c0_52 = arith.constant 0 : index
    %101 = vector.load %arg10[%c0_51, %c0_52] : memref<1x256xf32, #tpu.memory_space<vmem>>, vector<1x256xf32>
    %102 = vector.broadcast %101 : vector<1x256xf32> to vector<2x256xf32>
    %103 = arith.addf %100, %102 : vector<2x256xf32>
    %104 = arith.truncf %103 : vector<2x256xf32> to vector<2x256xbf16>
    %cst_53 = arith.constant dense<0.000000e+00> : vector<2x256xf32>
    %105 = tpu.matmul %104, %0, %cst_53 {dimension_numbers = #tpu.dot_dimension_numbers<[1], [0], [0], [1], [0, 0, 1, 1], [], []>} : vector<2x256xbf16>, vector<256x256xbf16>, vector<2x256xf32> -> vector<2x256xf32>
    %c1 = arith.constant 1 : index
    %106 = memref.load %arg0[%c1] : memref<2xf32, #tpu.memory_space<smem>>
    %107 = vector.broadcast %106 : f32 to vector<2x256xf32>
    %108 = arith.mulf %105, %107 : vector<2x256xf32>
    %109 = tpu.iota {dimensions = array<i32: 1>} : vector<2x256xi32>
    %cst_54 = arith.constant 0.000000e+00 : f32
    %110 = vector.broadcast %cst_54 : f32 to vector<2x256xf32>
    %111 = vector.extract_strided_slice %6 {offsets = [0, 0], sizes = [2, 32], strides = [1, 1]} : vector<2x256xf32> to vector<2x32xf32>
    %cst_55 = arith.constant dense<0xFF800000> : vector<2xf32>
    %112 = vector.multi_reduction <maximumf>, %111, %cst_55 [1] : vector<2x32xf32> to vector<2xf32>
    %113 = vector.shape_cast %112 : vector<2xf32> to vector<2x1xf32>
    %114 = vector.broadcast %113 : vector<2x1xf32> to vector<2x32xf32>
    %115 = arith.subf %111, %114 : vector<2x32xf32>
    %116 = math.exp %115 : vector<2x32xf32>
    %cst_56 = arith.constant dense<0.000000e+00> : vector<2xf32>
    %117 = vector.multi_reduction <add>, %116, %cst_56 [1] : vector<2x32xf32> to vector<2xf32>
    %118 = vector.shape_cast %117 : vector<2xf32> to vector<2x1xf32>
    %119 = math.log %118 : vector<2x1xf32>
    %120 = arith.addf %113, %119 : vector<2x1xf32>
    %c0_i32 = arith.constant 0 : i32
    %121 = vector.broadcast %c0_i32 : i32 to vector<2x256xi32>
    %122 = arith.cmpi sge, %109, %121 : vector<2x256xi32>
    %c32_i32 = arith.constant 32 : i32
    %123 = vector.broadcast %c32_i32 : i32 to vector<2x256xi32>
    %124 = arith.cmpi slt, %109, %123 : vector<2x256xi32>
    %125 = arith.andi %122, %124 : vector<2x256xi1>
    %126 = arith.extui %125 : vector<2x256xi1> to vector<2x256xi32>
    %127 = arith.sitofp %126 : vector<2x256xi32> to vector<2x256xf32>
    %128 = vector.broadcast %120 : vector<2x1xf32> to vector<2x256xf32>
    %129 = arith.mulf %128, %127 : vector<2x256xf32>
    %130 = arith.addf %110, %129 : vector<2x256xf32>
    %131 = vector.extract_strided_slice %6 {offsets = [0, 32], sizes = [2, 32], strides = [1, 1]} : vector<2x256xf32> to vector<2x32xf32>
    %cst_57 = arith.constant dense<0xFF800000> : vector<2xf32>
    %132 = vector.multi_reduction <maximumf>, %131, %cst_57 [1] : vector<2x32xf32> to vector<2xf32>
    %133 = vector.shape_cast %132 : vector<2xf32> to vector<2x1xf32>
    %134 = vector.broadcast %133 : vector<2x1xf32> to vector<2x32xf32>
    %135 = arith.subf %131, %134 : vector<2x32xf32>
    %136 = math.exp %135 : vector<2x32xf32>
    %cst_58 = arith.constant dense<0.000000e+00> : vector<2xf32>
    %137 = vector.multi_reduction <add>, %136, %cst_58 [1] : vector<2x32xf32> to vector<2xf32>
    %138 = vector.shape_cast %137 : vector<2xf32> to vector<2x1xf32>
    %139 = math.log %138 : vector<2x1xf32>
    %140 = arith.addf %133, %139 : vector<2x1xf32>
    %c32_i32_59 = arith.constant 32 : i32
    %141 = vector.broadcast %c32_i32_59 : i32 to vector<2x256xi32>
    %142 = arith.cmpi sge, %109, %141 : vector<2x256xi32>
    %c64_i32 = arith.constant 64 : i32
    %143 = vector.broadcast %c64_i32 : i32 to vector<2x256xi32>
    %144 = arith.cmpi slt, %109, %143 : vector<2x256xi32>
    %145 = arith.andi %142, %144 : vector<2x256xi1>
    %146 = arith.extui %145 : vector<2x256xi1> to vector<2x256xi32>
    %147 = arith.sitofp %146 : vector<2x256xi32> to vector<2x256xf32>
    %148 = vector.broadcast %140 : vector<2x1xf32> to vector<2x256xf32>
    %149 = arith.mulf %148, %147 : vector<2x256xf32>
    %150 = arith.addf %130, %149 : vector<2x256xf32>
    %151 = vector.extract_strided_slice %6 {offsets = [0, 64], sizes = [2, 32], strides = [1, 1]} : vector<2x256xf32> to vector<2x32xf32>
    %cst_60 = arith.constant dense<0xFF800000> : vector<2xf32>
    %152 = vector.multi_reduction <maximumf>, %151, %cst_60 [1] : vector<2x32xf32> to vector<2xf32>
    %153 = vector.shape_cast %152 : vector<2xf32> to vector<2x1xf32>
    %154 = vector.broadcast %153 : vector<2x1xf32> to vector<2x32xf32>
    %155 = arith.subf %151, %154 : vector<2x32xf32>
    %156 = math.exp %155 : vector<2x32xf32>
    %cst_61 = arith.constant dense<0.000000e+00> : vector<2xf32>
    %157 = vector.multi_reduction <add>, %156, %cst_61 [1] : vector<2x32xf32> to vector<2xf32>
    %158 = vector.shape_cast %157 : vector<2xf32> to vector<2x1xf32>
    %159 = math.log %158 : vector<2x1xf32>
    %160 = arith.addf %153, %159 : vector<2x1xf32>
    %c64_i32_62 = arith.constant 64 : i32
    %161 = vector.broadcast %c64_i32_62 : i32 to vector<2x256xi32>
    %162 = arith.cmpi sge, %109, %161 : vector<2x256xi32>
    %c96_i32 = arith.constant 96 : i32
    %163 = vector.broadcast %c96_i32 : i32 to vector<2x256xi32>
    %164 = arith.cmpi slt, %109, %163 : vector<2x256xi32>
    %165 = arith.andi %162, %164 : vector<2x256xi1>
    %166 = arith.extui %165 : vector<2x256xi1> to vector<2x256xi32>
    %167 = arith.sitofp %166 : vector<2x256xi32> to vector<2x256xf32>
    %168 = vector.broadcast %160 : vector<2x1xf32> to vector<2x256xf32>
    %169 = arith.mulf %168, %167 : vector<2x256xf32>
    %170 = arith.addf %150, %169 : vector<2x256xf32>
    %171 = vector.extract_strided_slice %6 {offsets = [0, 96], sizes = [2, 32], strides = [1, 1]} : vector<2x256xf32> to vector<2x32xf32>
    %cst_63 = arith.constant dense<0xFF800000> : vector<2xf32>
    %172 = vector.multi_reduction <maximumf>, %171, %cst_63 [1] : vector<2x32xf32> to vector<2xf32>
    %173 = vector.shape_cast %172 : vector<2xf32> to vector<2x1xf32>
    %174 = vector.broadcast %173 : vector<2x1xf32> to vector<2x32xf32>
    %175 = arith.subf %171, %174 : vector<2x32xf32>
    %176 = math.exp %175 : vector<2x32xf32>
    %cst_64 = arith.constant dense<0.000000e+00> : vector<2xf32>
    %177 = vector.multi_reduction <add>, %176, %cst_64 [1] : vector<2x32xf32> to vector<2xf32>
    %178 = vector.shape_cast %177 : vector<2xf32> to vector<2x1xf32>
    %179 = math.log %178 : vector<2x1xf32>
    %180 = arith.addf %173, %179 : vector<2x1xf32>
    %c96_i32_65 = arith.constant 96 : i32
    %181 = vector.broadcast %c96_i32_65 : i32 to vector<2x256xi32>
    %182 = arith.cmpi sge, %109, %181 : vector<2x256xi32>
    %c128_i32 = arith.constant 128 : i32
    %183 = vector.broadcast %c128_i32 : i32 to vector<2x256xi32>
    %184 = arith.cmpi slt, %109, %183 : vector<2x256xi32>
    %185 = arith.andi %182, %184 : vector<2x256xi1>
    %186 = arith.extui %185 : vector<2x256xi1> to vector<2x256xi32>
    %187 = arith.sitofp %186 : vector<2x256xi32> to vector<2x256xf32>
    %188 = vector.broadcast %180 : vector<2x1xf32> to vector<2x256xf32>
    %189 = arith.mulf %188, %187 : vector<2x256xf32>
    %190 = arith.addf %170, %189 : vector<2x256xf32>
    %191 = vector.extract_strided_slice %6 {offsets = [0, 128], sizes = [2, 32], strides = [1, 1]} : vector<2x256xf32> to vector<2x32xf32>
    %cst_66 = arith.constant dense<0xFF800000> : vector<2xf32>
    %192 = vector.multi_reduction <maximumf>, %191, %cst_66 [1] : vector<2x32xf32> to vector<2xf32>
    %193 = vector.shape_cast %192 : vector<2xf32> to vector<2x1xf32>
    %194 = vector.broadcast %193 : vector<2x1xf32> to vector<2x32xf32>
    %195 = arith.subf %191, %194 : vector<2x32xf32>
    %196 = math.exp %195 : vector<2x32xf32>
    %cst_67 = arith.constant dense<0.000000e+00> : vector<2xf32>
    %197 = vector.multi_reduction <add>, %196, %cst_67 [1] : vector<2x32xf32> to vector<2xf32>
    %198 = vector.shape_cast %197 : vector<2xf32> to vector<2x1xf32>
    %199 = math.log %198 : vector<2x1xf32>
    %200 = arith.addf %193, %199 : vector<2x1xf32>
    %c128_i32_68 = arith.constant 128 : i32
    %201 = vector.broadcast %c128_i32_68 : i32 to vector<2x256xi32>
    %202 = arith.cmpi sge, %109, %201 : vector<2x256xi32>
    %c160_i32 = arith.constant 160 : i32
    %203 = vector.broadcast %c160_i32 : i32 to vector<2x256xi32>
    %204 = arith.cmpi slt, %109, %203 : vector<2x256xi32>
    %205 = arith.andi %202, %204 : vector<2x256xi1>
    %206 = arith.extui %205 : vector<2x256xi1> to vector<2x256xi32>
    %207 = arith.sitofp %206 : vector<2x256xi32> to vector<2x256xf32>
    %208 = vector.broadcast %200 : vector<2x1xf32> to vector<2x256xf32>
    %209 = arith.mulf %208, %207 : vector<2x256xf32>
    %210 = arith.addf %190, %209 : vector<2x256xf32>
    %211 = vector.extract_strided_slice %6 {offsets = [0, 160], sizes = [2, 32], strides = [1, 1]} : vector<2x256xf32> to vector<2x32xf32>
    %cst_69 = arith.constant dense<0xFF800000> : vector<2xf32>
    %212 = vector.multi_reduction <maximumf>, %211, %cst_69 [1] : vector<2x32xf32> to vector<2xf32>
    %213 = vector.shape_cast %212 : vector<2xf32> to vector<2x1xf32>
    %214 = vector.broadcast %213 : vector<2x1xf32> to vector<2x32xf32>
    %215 = arith.subf %211, %214 : vector<2x32xf32>
    %216 = math.exp %215 : vector<2x32xf32>
    %cst_70 = arith.constant dense<0.000000e+00> : vector<2xf32>
    %217 = vector.multi_reduction <add>, %216, %cst_70 [1] : vector<2x32xf32> to vector<2xf32>
    %218 = vector.shape_cast %217 : vector<2xf32> to vector<2x1xf32>
    %219 = math.log %218 : vector<2x1xf32>
    %220 = arith.addf %213, %219 : vector<2x1xf32>
    %c160_i32_71 = arith.constant 160 : i32
    %221 = vector.broadcast %c160_i32_71 : i32 to vector<2x256xi32>
    %222 = arith.cmpi sge, %109, %221 : vector<2x256xi32>
    %c192_i32 = arith.constant 192 : i32
    %223 = vector.broadcast %c192_i32 : i32 to vector<2x256xi32>
    %224 = arith.cmpi slt, %109, %223 : vector<2x256xi32>
    %225 = arith.andi %222, %224 : vector<2x256xi1>
    %226 = arith.extui %225 : vector<2x256xi1> to vector<2x256xi32>
    %227 = arith.sitofp %226 : vector<2x256xi32> to vector<2x256xf32>
    %228 = vector.broadcast %220 : vector<2x1xf32> to vector<2x256xf32>
    %229 = arith.mulf %228, %227 : vector<2x256xf32>
    %230 = arith.addf %210, %229 : vector<2x256xf32>
    %231 = vector.extract_strided_slice %6 {offsets = [0, 192], sizes = [2, 32], strides = [1, 1]} : vector<2x256xf32> to vector<2x32xf32>
    %cst_72 = arith.constant dense<0xFF800000> : vector<2xf32>
    %232 = vector.multi_reduction <maximumf>, %231, %cst_72 [1] : vector<2x32xf32> to vector<2xf32>
    %233 = vector.shape_cast %232 : vector<2xf32> to vector<2x1xf32>
    %234 = vector.broadcast %233 : vector<2x1xf32> to vector<2x32xf32>
    %235 = arith.subf %231, %234 : vector<2x32xf32>
    %236 = math.exp %235 : vector<2x32xf32>
    %cst_73 = arith.constant dense<0.000000e+00> : vector<2xf32>
    %237 = vector.multi_reduction <add>, %236, %cst_73 [1] : vector<2x32xf32> to vector<2xf32>
    %238 = vector.shape_cast %237 : vector<2xf32> to vector<2x1xf32>
    %239 = math.log %238 : vector<2x1xf32>
    %240 = arith.addf %233, %239 : vector<2x1xf32>
    %c192_i32_74 = arith.constant 192 : i32
    %241 = vector.broadcast %c192_i32_74 : i32 to vector<2x256xi32>
    %242 = arith.cmpi sge, %109, %241 : vector<2x256xi32>
    %c224_i32 = arith.constant 224 : i32
    %243 = vector.broadcast %c224_i32 : i32 to vector<2x256xi32>
    %244 = arith.cmpi slt, %109, %243 : vector<2x256xi32>
    %245 = arith.andi %242, %244 : vector<2x256xi1>
    %246 = arith.extui %245 : vector<2x256xi1> to vector<2x256xi32>
    %247 = arith.sitofp %246 : vector<2x256xi32> to vector<2x256xf32>
    %248 = vector.broadcast %240 : vector<2x1xf32> to vector<2x256xf32>
    %249 = arith.mulf %248, %247 : vector<2x256xf32>
    %250 = arith.addf %230, %249 : vector<2x256xf32>
    %251 = vector.extract_strided_slice %6 {offsets = [0, 224], sizes = [2, 32], strides = [1, 1]} : vector<2x256xf32> to vector<2x32xf32>
    %cst_75 = arith.constant dense<0xFF800000> : vector<2xf32>
    %252 = vector.multi_reduction <maximumf>, %251, %cst_75 [1] : vector<2x32xf32> to vector<2xf32>
    %253 = vector.shape_cast %252 : vector<2xf32> to vector<2x1xf32>
    %254 = vector.broadcast %253 : vector<2x1xf32> to vector<2x32xf32>
    %255 = arith.subf %251, %254 : vector<2x32xf32>
    %256 = math.exp %255 : vector<2x32xf32>
    %cst_76 = arith.constant dense<0.000000e+00> : vector<2xf32>
    %257 = vector.multi_reduction <add>, %256, %cst_76 [1] : vector<2x32xf32> to vector<2xf32>
    %258 = vector.shape_cast %257 : vector<2xf32> to vector<2x1xf32>
    %259 = math.log %258 : vector<2x1xf32>
    %260 = arith.addf %253, %259 : vector<2x1xf32>
    %c224_i32_77 = arith.constant 224 : i32
    %261 = vector.broadcast %c224_i32_77 : i32 to vector<2x256xi32>
    %262 = arith.cmpi sge, %109, %261 : vector<2x256xi32>
    %c256_i32 = arith.constant 256 : i32
    %263 = vector.broadcast %c256_i32 : i32 to vector<2x256xi32>
    %264 = arith.cmpi slt, %109, %263 : vector<2x256xi32>
    %265 = arith.andi %262, %264 : vector<2x256xi1>
    %266 = arith.extui %265 : vector<2x256xi1> to vector<2x256xi32>
    %267 = arith.sitofp %266 : vector<2x256xi32> to vector<2x256xf32>
    %268 = vector.broadcast %260 : vector<2x1xf32> to vector<2x256xf32>
    %269 = arith.mulf %268, %267 : vector<2x256xf32>
    %270 = arith.addf %250, %269 : vector<2x256xf32>
    %271 = arith.subf %6, %270 : vector<2x256xf32>
    %c0_78 = arith.constant 0 : index
    %c0_79 = arith.constant 0 : index
    %272 = vector.load %arg16[%c0_78, %c0_79] : memref<2x256xf32, #tpu.memory_space<vmem>>, vector<2x256xf32>
    tpu.vector_store %arg16[%c0_78, %c0_79], %271 {strides = array<i32>} : memref<2x256xf32, #tpu.memory_space<vmem>>, vector<2x256xf32>,
    %273 = tpu.iota {dimensions = array<i32: 1>} : vector<2x256xi32>
    %cst_80 = arith.constant 0.000000e+00 : f32
    %274 = vector.broadcast %cst_80 : f32 to vector<2x256xf32>
    %275 = vector.extract_strided_slice %108 {offsets = [0, 0], sizes = [2, 32], strides = [1, 1]} : vector<2x256xf32> to vector<2x32xf32>
    %cst_81 = arith.constant dense<0xFF800000> : vector<2xf32>
    %276 = vector.multi_reduction <maximumf>, %275, %cst_81 [1] : vector<2x32xf32> to vector<2xf32>
    %277 = vector.shape_cast %276 : vector<2xf32> to vector<2x1xf32>
    %278 = vector.broadcast %277 : vector<2x1xf32> to vector<2x32xf32>
    %279 = arith.subf %275, %278 : vector<2x32xf32>
    %280 = math.exp %279 : vector<2x32xf32>
    %cst_82 = arith.constant dense<0.000000e+00> : vector<2xf32>
    %281 = vector.multi_reduction <add>, %280, %cst_82 [1] : vector<2x32xf32> to vector<2xf32>
    %282 = vector.shape_cast %281 : vector<2xf32> to vector<2x1xf32>
    %283 = math.log %282 : vector<2x1xf32>
    %284 = arith.addf %277, %283 : vector<2x1xf32>
    %c0_i32_83 = arith.constant 0 : i32
    %285 = vector.broadcast %c0_i32_83 : i32 to vector<2x256xi32>
    %286 = arith.cmpi sge, %273, %285 : vector<2x256xi32>
    %c32_i32_84 = arith.constant 32 : i32
    %287 = vector.broadcast %c32_i32_84 : i32 to vector<2x256xi32>
    %288 = arith.cmpi slt, %273, %287 : vector<2x256xi32>
    %289 = arith.andi %286, %288 : vector<2x256xi1>
    %290 = arith.extui %289 : vector<2x256xi1> to vector<2x256xi32>
    %291 = arith.sitofp %290 : vector<2x256xi32> to vector<2x256xf32>
    %292 = vector.broadcast %284 : vector<2x1xf32> to vector<2x256xf32>
    %293 = arith.mulf %292, %291 : vector<2x256xf32>
    %294 = arith.addf %274, %293 : vector<2x256xf32>
    %295 = vector.extract_strided_slice %108 {offsets = [0, 32], sizes = [2, 32], strides = [1, 1]} : vector<2x256xf32> to vector<2x32xf32>
    %cst_85 = arith.constant dense<0xFF800000> : vector<2xf32>
    %296 = vector.multi_reduction <maximumf>, %295, %cst_85 [1] : vector<2x32xf32> to vector<2xf32>
    %297 = vector.shape_cast %296 : vector<2xf32> to vector<2x1xf32>
    %298 = vector.broadcast %297 : vector<2x1xf32> to vector<2x32xf32>
    %299 = arith.subf %295, %298 : vector<2x32xf32>
    %300 = math.exp %299 : vector<2x32xf32>
    %cst_86 = arith.constant dense<0.000000e+00> : vector<2xf32>
    %301 = vector.multi_reduction <add>, %300, %cst_86 [1] : vector<2x32xf32> to vector<2xf32>
    %302 = vector.shape_cast %301 : vector<2xf32> to vector<2x1xf32>
    %303 = math.log %302 : vector<2x1xf32>
    %304 = arith.addf %297, %303 : vector<2x1xf32>
    %c32_i32_87 = arith.constant 32 : i32
    %305 = vector.broadcast %c32_i32_87 : i32 to vector<2x256xi32>
    %306 = arith.cmpi sge, %273, %305 : vector<2x256xi32>
    %c64_i32_88 = arith.constant 64 : i32
    %307 = vector.broadcast %c64_i32_88 : i32 to vector<2x256xi32>
    %308 = arith.cmpi slt, %273, %307 : vector<2x256xi32>
    %309 = arith.andi %306, %308 : vector<2x256xi1>
    %310 = arith.extui %309 : vector<2x256xi1> to vector<2x256xi32>
    %311 = arith.sitofp %310 : vector<2x256xi32> to vector<2x256xf32>
    %312 = vector.broadcast %304 : vector<2x1xf32> to vector<2x256xf32>
    %313 = arith.mulf %312, %311 : vector<2x256xf32>
    %314 = arith.addf %294, %313 : vector<2x256xf32>
    %315 = vector.extract_strided_slice %108 {offsets = [0, 64], sizes = [2, 32], strides = [1, 1]} : vector<2x256xf32> to vector<2x32xf32>
    %cst_89 = arith.constant dense<0xFF800000> : vector<2xf32>
    %316 = vector.multi_reduction <maximumf>, %315, %cst_89 [1] : vector<2x32xf32> to vector<2xf32>
    %317 = vector.shape_cast %316 : vector<2xf32> to vector<2x1xf32>
    %318 = vector.broadcast %317 : vector<2x1xf32> to vector<2x32xf32>
    %319 = arith.subf %315, %318 : vector<2x32xf32>
    %320 = math.exp %319 : vector<2x32xf32>
    %cst_90 = arith.constant dense<0.000000e+00> : vector<2xf32>
    %321 = vector.multi_reduction <add>, %320, %cst_90 [1] : vector<2x32xf32> to vector<2xf32>
    %322 = vector.shape_cast %321 : vector<2xf32> to vector<2x1xf32>
    %323 = math.log %322 : vector<2x1xf32>
    %324 = arith.addf %317, %323 : vector<2x1xf32>
    %c64_i32_91 = arith.constant 64 : i32
    %325 = vector.broadcast %c64_i32_91 : i32 to vector<2x256xi32>
    %326 = arith.cmpi sge, %273, %325 : vector<2x256xi32>
    %c96_i32_92 = arith.constant 96 : i32
    %327 = vector.broadcast %c96_i32_92 : i32 to vector<2x256xi32>
    %328 = arith.cmpi slt, %273, %327 : vector<2x256xi32>
    %329 = arith.andi %326, %328 : vector<2x256xi1>
    %330 = arith.extui %329 : vector<2x256xi1> to vector<2x256xi32>
    %331 = arith.sitofp %330 : vector<2x256xi32> to vector<2x256xf32>
    %332 = vector.broadcast %324 : vector<2x1xf32> to vector<2x256xf32>
    %333 = arith.mulf %332, %331 : vector<2x256xf32>
    %334 = arith.addf %314, %333 : vector<2x256xf32>
    %335 = vector.extract_strided_slice %108 {offsets = [0, 96], sizes = [2, 32], strides = [1, 1]} : vector<2x256xf32> to vector<2x32xf32>
    %cst_93 = arith.constant dense<0xFF800000> : vector<2xf32>
    %336 = vector.multi_reduction <maximumf>, %335, %cst_93 [1] : vector<2x32xf32> to vector<2xf32>
    %337 = vector.shape_cast %336 : vector<2xf32> to vector<2x1xf32>
    %338 = vector.broadcast %337 : vector<2x1xf32> to vector<2x32xf32>
    %339 = arith.subf %335, %338 : vector<2x32xf32>
    %340 = math.exp %339 : vector<2x32xf32>
    %cst_94 = arith.constant dense<0.000000e+00> : vector<2xf32>
    %341 = vector.multi_reduction <add>, %340, %cst_94 [1] : vector<2x32xf32> to vector<2xf32>
    %342 = vector.shape_cast %341 : vector<2xf32> to vector<2x1xf32>
    %343 = math.log %342 : vector<2x1xf32>
    %344 = arith.addf %337, %343 : vector<2x1xf32>
    %c96_i32_95 = arith.constant 96 : i32
    %345 = vector.broadcast %c96_i32_95 : i32 to vector<2x256xi32>
    %346 = arith.cmpi sge, %273, %345 : vector<2x256xi32>
    %c128_i32_96 = arith.constant 128 : i32
    %347 = vector.broadcast %c128_i32_96 : i32 to vector<2x256xi32>
    %348 = arith.cmpi slt, %273, %347 : vector<2x256xi32>
    %349 = arith.andi %346, %348 : vector<2x256xi1>
    %350 = arith.extui %349 : vector<2x256xi1> to vector<2x256xi32>
    %351 = arith.sitofp %350 : vector<2x256xi32> to vector<2x256xf32>
    %352 = vector.broadcast %344 : vector<2x1xf32> to vector<2x256xf32>
    %353 = arith.mulf %352, %351 : vector<2x256xf32>
    %354 = arith.addf %334, %353 : vector<2x256xf32>
    %355 = vector.extract_strided_slice %108 {offsets = [0, 128], sizes = [2, 32], strides = [1, 1]} : vector<2x256xf32> to vector<2x32xf32>
    %cst_97 = arith.constant dense<0xFF800000> : vector<2xf32>
    %356 = vector.multi_reduction <maximumf>, %355, %cst_97 [1] : vector<2x32xf32> to vector<2xf32>
    %357 = vector.shape_cast %356 : vector<2xf32> to vector<2x1xf32>
    %358 = vector.broadcast %357 : vector<2x1xf32> to vector<2x32xf32>
    %359 = arith.subf %355, %358 : vector<2x32xf32>
    %360 = math.exp %359 : vector<2x32xf32>
    %cst_98 = arith.constant dense<0.000000e+00> : vector<2xf32>
    %361 = vector.multi_reduction <add>, %360, %cst_98 [1] : vector<2x32xf32> to vector<2xf32>
    %362 = vector.shape_cast %361 : vector<2xf32> to vector<2x1xf32>
    %363 = math.log %362 : vector<2x1xf32>
    %364 = arith.addf %357, %363 : vector<2x1xf32>
    %c128_i32_99 = arith.constant 128 : i32
    %365 = vector.broadcast %c128_i32_99 : i32 to vector<2x256xi32>
    %366 = arith.cmpi sge, %273, %365 : vector<2x256xi32>
    %c160_i32_100 = arith.constant 160 : i32
    %367 = vector.broadcast %c160_i32_100 : i32 to vector<2x256xi32>
    %368 = arith.cmpi slt, %273, %367 : vector<2x256xi32>
    %369 = arith.andi %366, %368 : vector<2x256xi1>
    %370 = arith.extui %369 : vector<2x256xi1> to vector<2x256xi32>
    %371 = arith.sitofp %370 : vector<2x256xi32> to vector<2x256xf32>
    %372 = vector.broadcast %364 : vector<2x1xf32> to vector<2x256xf32>
    %373 = arith.mulf %372, %371 : vector<2x256xf32>
    %374 = arith.addf %354, %373 : vector<2x256xf32>
    %375 = vector.extract_strided_slice %108 {offsets = [0, 160], sizes = [2, 32], strides = [1, 1]} : vector<2x256xf32> to vector<2x32xf32>
    %cst_101 = arith.constant dense<0xFF800000> : vector<2xf32>
    %376 = vector.multi_reduction <maximumf>, %375, %cst_101 [1] : vector<2x32xf32> to vector<2xf32>
    %377 = vector.shape_cast %376 : vector<2xf32> to vector<2x1xf32>
    %378 = vector.broadcast %377 : vector<2x1xf32> to vector<2x32xf32>
    %379 = arith.subf %375, %378 : vector<2x32xf32>
    %380 = math.exp %379 : vector<2x32xf32>
    %cst_102 = arith.constant dense<0.000000e+00> : vector<2xf32>
    %381 = vector.multi_reduction <add>, %380, %cst_102 [1] : vector<2x32xf32> to vector<2xf32>
    %382 = vector.shape_cast %381 : vector<2xf32> to vector<2x1xf32>
    %383 = math.log %382 : vector<2x1xf32>
    %384 = arith.addf %377, %383 : vector<2x1xf32>
    %c160_i32_103 = arith.constant 160 : i32
    %385 = vector.broadcast %c160_i32_103 : i32 to vector<2x256xi32>
    %386 = arith.cmpi sge, %273, %385 : vector<2x256xi32>
    %c192_i32_104 = arith.constant 192 : i32
    %387 = vector.broadcast %c192_i32_104 : i32 to vector<2x256xi32>
    %388 = arith.cmpi slt, %273, %387 : vector<2x256xi32>
    %389 = arith.andi %386, %388 : vector<2x256xi1>
    %390 = arith.extui %389 : vector<2x256xi1> to vector<2x256xi32>
    %391 = arith.sitofp %390 : vector<2x256xi32> to vector<2x256xf32>
    %392 = vector.broadcast %384 : vector<2x1xf32> to vector<2x256xf32>
    %393 = arith.mulf %392, %391 : vector<2x256xf32>
    %394 = arith.addf %374, %393 : vector<2x256xf32>
    %395 = vector.extract_strided_slice %108 {offsets = [0, 192], sizes = [2, 32], strides = [1, 1]} : vector<2x256xf32> to vector<2x32xf32>
    %cst_105 = arith.constant dense<0xFF800000> : vector<2xf32>
    %396 = vector.multi_reduction <maximumf>, %395, %cst_105 [1] : vector<2x32xf32> to vector<2xf32>
    %397 = vector.shape_cast %396 : vector<2xf32> to vector<2x1xf32>
    %398 = vector.broadcast %397 : vector<2x1xf32> to vector<2x32xf32>
    %399 = arith.subf %395, %398 : vector<2x32xf32>
    %400 = math.exp %399 : vector<2x32xf32>
    %cst_106 = arith.constant dense<0.000000e+00> : vector<2xf32>
    %401 = vector.multi_reduction <add>, %400, %cst_106 [1] : vector<2x32xf32> to vector<2xf32>
    %402 = vector.shape_cast %401 : vector<2xf32> to vector<2x1xf32>
    %403 = math.log %402 : vector<2x1xf32>
    %404 = arith.addf %397, %403 : vector<2x1xf32>
    %c192_i32_107 = arith.constant 192 : i32
    %405 = vector.broadcast %c192_i32_107 : i32 to vector<2x256xi32>
    %406 = arith.cmpi sge, %273, %405 : vector<2x256xi32>
    %c224_i32_108 = arith.constant 224 : i32
    %407 = vector.broadcast %c224_i32_108 : i32 to vector<2x256xi32>
    %408 = arith.cmpi slt, %273, %407 : vector<2x256xi32>
    %409 = arith.andi %406, %408 : vector<2x256xi1>
    %410 = arith.extui %409 : vector<2x256xi1> to vector<2x256xi32>
    %411 = arith.sitofp %410 : vector<2x256xi32> to vector<2x256xf32>
    %412 = vector.broadcast %404 : vector<2x1xf32> to vector<2x256xf32>
    %413 = arith.mulf %412, %411 : vector<2x256xf32>
    %414 = arith.addf %394, %413 : vector<2x256xf32>
    %415 = vector.extract_strided_slice %108 {offsets = [0, 224], sizes = [2, 32], strides = [1, 1]} : vector<2x256xf32> to vector<2x32xf32>
    %cst_109 = arith.constant dense<0xFF800000> : vector<2xf32>
    %416 = vector.multi_reduction <maximumf>, %415, %cst_109 [1] : vector<2x32xf32> to vector<2xf32>
    %417 = vector.shape_cast %416 : vector<2xf32> to vector<2x1xf32>
    %418 = vector.broadcast %417 : vector<2x1xf32> to vector<2x32xf32>
    %419 = arith.subf %415, %418 : vector<2x32xf32>
    %420 = math.exp %419 : vector<2x32xf32>
    %cst_110 = arith.constant dense<0.000000e+00> : vector<2xf32>
    %421 = vector.multi_reduction <add>, %420, %cst_110 [1] : vector<2x32xf32> to vector<2xf32>
    %422 = vector.shape_cast %421 : vector<2xf32> to vector<2x1xf32>
    %423 = math.log %422 : vector<2x1xf32>
    %424 = arith.addf %417, %423 : vector<2x1xf32>
    %c224_i32_111 = arith.constant 224 : i32
    %425 = vector.broadcast %c224_i32_111 : i32 to vector<2x256xi32>
    %426 = arith.cmpi sge, %273, %425 : vector<2x256xi32>
    %c256_i32_112 = arith.constant 256 : i32
    %427 = vector.broadcast %c256_i32_112 : i32 to vector<2x256xi32>
    %428 = arith.cmpi slt, %273, %427 : vector<2x256xi32>
    %429 = arith.andi %426, %428 : vector<2x256xi1>
    %430 = arith.extui %429 : vector<2x256xi1> to vector<2x256xi32>
    %431 = arith.sitofp %430 : vector<2x256xi32> to vector<2x256xf32>
    %432 = vector.broadcast %424 : vector<2x1xf32> to vector<2x256xf32>
    %433 = arith.mulf %432, %431 : vector<2x256xf32>
    %434 = arith.addf %414, %433 : vector<2x256xf32>
    %435 = arith.subf %108, %434 : vector<2x256xf32>
    %c0_113 = arith.constant 0 : index
    %c0_114 = arith.constant 0 : index
    %436 = vector.load %arg17[%c0_113, %c0_114] : memref<2x256xf32, #tpu.memory_space<vmem>>, vector<2x256xf32>
    tpu.vector_store %arg17[%c0_113, %c0_114], %435 {strides = array<i32>} : memref<2x256xf32, #tpu.memory_space<vmem>>, vector<2x256xf32>,
    return
  }
}

module attributes {stable_mosaic.version = 11 : i64} {
  func.func @_decoder_kernel(%arg0: i32, %arg1: memref<1x16x8xf32, #tpu.memory_space<vmem>>, %arg2: memref<1x2x256xf32, #tpu.memory_space<vmem>>, %arg3: memref<256x256xbf16, #tpu.memory_space<vmem>>, %arg4: memref<256x256xbf16, #tpu.memory_space<vmem>>, %arg5: memref<256x256xbf16, #tpu.memory_space<vmem>>, %arg6: memref<256x256xbf16, #tpu.memory_space<vmem>>, %arg7: memref<256x256xbf16, #tpu.memory_space<vmem>>, %arg8: memref<1x256xf32, #tpu.memory_space<vmem>>, %arg9: memref<1x256xf32, #tpu.memory_space<vmem>>, %arg10: memref<1x256xf32, #tpu.memory_space<vmem>>, %arg11: memref<1x256xf32, #tpu.memory_space<vmem>>, %arg12: memref<1x256xf32, #tpu.memory_space<vmem>>, %arg13: memref<1x256xf32, #tpu.memory_space<vmem>>, %arg14: memref<1x256xf32, #tpu.memory_space<vmem>>, %arg15: memref<1x256xf32, #tpu.memory_space<vmem>>, %arg16: memref<1x16x256xf32, #tpu.memory_space<vmem>>, %arg17: memref<1x16x1xf32, #tpu.memory_space<vmem>>) attributes {dimension_semantics = [#tpu.dimension_semantics<parallel>], iteration_bounds = array<i64: 1>, scalar_prefetch = 0 : i64, scratch_operands = 0 : i64, tpu.core_type = #tpu.core_type<tc>, window_params = [{transform_indices = @transform_0, window_bounds = array<i64: 1, 16, 8>}, {transform_indices = @transform_1, window_bounds = array<i64: 1, 2, 256>}, {pipeline_mode = #tpu.pipeline_mode<synchronous>, transform_indices = @transform_2, window_bounds = array<i64: 256, 256>}, {pipeline_mode = #tpu.pipeline_mode<synchronous>, transform_indices = @transform_3, window_bounds = array<i64: 256, 256>}, {pipeline_mode = #tpu.pipeline_mode<synchronous>, transform_indices = @transform_4, window_bounds = array<i64: 256, 256>}, {pipeline_mode = #tpu.pipeline_mode<synchronous>, transform_indices = @transform_5, window_bounds = array<i64: 256, 256>}, {pipeline_mode = #tpu.pipeline_mode<synchronous>, transform_indices = @transform_6, window_bounds = array<i64: 256, 256>}, {pipeline_mode = #tpu.pipeline_mode<synchronous>, transform_indices = @transform_7, window_bounds = array<i64: 1, 256>}, {pipeline_mode = #tpu.pipeline_mode<synchronous>, transform_indices = @transform_8, window_bounds = array<i64: 1, 256>}, {pipeline_mode = #tpu.pipeline_mode<synchronous>, transform_indices = @transform_9, window_bounds = array<i64: 1, 256>}, {pipeline_mode = #tpu.pipeline_mode<synchronous>, transform_indices = @transform_10, window_bounds = array<i64: 1, 256>}, {pipeline_mode = #tpu.pipeline_mode<synchronous>, transform_indices = @transform_11, window_bounds = array<i64: 1, 256>}, {pipeline_mode = #tpu.pipeline_mode<synchronous>, transform_indices = @transform_12, window_bounds = array<i64: 1, 256>}, {pipeline_mode = #tpu.pipeline_mode<synchronous>, transform_indices = @transform_13, window_bounds = array<i64: 1, 256>}, {pipeline_mode = #tpu.pipeline_mode<synchronous>, transform_indices = @transform_14, window_bounds = array<i64: 1, 256>}, {transform_indices = @transform_15, window_bounds = array<i64: 1, 16, 256>}, {transform_indices = @transform_16, window_bounds = array<i64: 1, 16, 1>}]} {
    %c0 = arith.constant 0 : index
    %c0_0 = arith.constant 0 : index
    %c0_1 = arith.constant 0 : index
    %0 = vector.load %arg1[%c0, %c0_0, %c0_1] : memref<1x16x8xf32, #tpu.memory_space<vmem>>, vector<1x16x8xf32>
    %1 = vector.shape_cast %0 : vector<1x16x8xf32> to vector<16x8xf32>
    %c0_2 = arith.constant 0 : index
    %c0_3 = arith.constant 0 : index
    %c0_4 = arith.constant 0 : index
    %2 = vector.load %arg2[%c0_2, %c0_3, %c0_4] : memref<1x2x256xf32, #tpu.memory_space<vmem>>, vector<1x2x256xf32>
    %3 = vector.shape_cast %2 : vector<1x2x256xf32> to vector<2x256xf32>
    %4 = tpu.iota {dimensions = array<i32: 1>} : vector<8x256xi32>
    %5 = tpu.iota {dimensions = array<i32: 0>} : vector<8x256xi32>
    %c32_i32 = arith.constant 32 : i32
    %6 = vector.broadcast %c32_i32 : i32 to vector<8x256xi32>
    %7 = arith.muli %5, %6 : vector<8x256xi32>
    %8 = arith.cmpi sge, %4, %7 : vector<8x256xi32>
    %c1_i32 = arith.constant 1 : i32
    %9 = vector.broadcast %c1_i32 : i32 to vector<8x256xi32>
    %10 = arith.addi %5, %9 : vector<8x256xi32>
    %c32_i32_5 = arith.constant 32 : i32
    %11 = vector.broadcast %c32_i32_5 : i32 to vector<8x256xi32>
    %12 = arith.muli %10, %11 : vector<8x256xi32>
    %13 = arith.cmpi slt, %4, %12 : vector<8x256xi32>
    %14 = arith.andi %8, %13 : vector<8x256xi1>
    %15 = arith.extui %14 : vector<8x256xi1> to vector<8x256xi32>
    %16 = arith.sitofp %15 : vector<8x256xi32> to vector<8x256xf32>
    %17 = arith.truncf %16 : vector<8x256xf32> to vector<8x256xbf16>
    %18 = arith.truncf %1 : vector<16x8xf32> to vector<16x8xbf16>
    %cst = arith.constant dense<0.000000e+00> : vector<16x256xf32>
    %19 = tpu.matmul %18, %17, %cst {dimension_numbers = #tpu.dot_dimension_numbers<[1], [0], [0], [1], [0, 0, 1, 1], [], []>} : vector<16x8xbf16>, vector<8x256xbf16>, vector<16x256xf32> -> vector<16x256xf32>
    %20 = tpu.iota {dimensions = array<i32: 1>} : vector<16x256xi32>
    %21 = arith.fptosi %19 : vector<16x256xf32> to vector<16x256xi32>
    %c31_i32 = arith.constant 31 : i32
    %22 = vector.broadcast %c31_i32 : i32 to vector<16x256xi32>
    %23 = arith.andi %20, %22 : vector<16x256xi32>
    %24 = arith.cmpi eq, %21, %23 : vector<16x256xi32>
    %25 = arith.extui %24 : vector<16x256xi1> to vector<16x256xi32>
    %26 = arith.sitofp %25 : vector<16x256xi32> to vector<16x256xf32>
    %27 = arith.truncf %26 : vector<16x256xf32> to vector<16x256xbf16>
    %c0_6 = arith.constant 0 : index
    %c0_7 = arith.constant 0 : index
    %28 = vector.load %arg3[%c0_6, %c0_7] : memref<256x256xbf16, #tpu.memory_space<vmem>>, vector<256x256xbf16>
    %cst_8 = arith.constant dense<0.000000e+00> : vector<16x256xf32>
    %29 = tpu.matmul %27, %28, %cst_8 {dimension_numbers = #tpu.dot_dimension_numbers<[1], [0], [0], [1], [0, 0, 1, 1], [], []>} : vector<16x256xbf16>, vector<256x256xbf16>, vector<16x256xf32> -> vector<16x256xf32>
    %c0_9 = arith.constant 0 : index
    %c0_10 = arith.constant 0 : index
    %30 = vector.load %arg4[%c0_9, %c0_10] : memref<256x256xbf16, #tpu.memory_space<vmem>>, vector<256x256xbf16>
    %31 = arith.truncf %29 : vector<16x256xf32> to vector<16x256xbf16>
    %cst_11 = arith.constant dense<0.000000e+00> : vector<16x256xf32>
    %32 = tpu.matmul %31, %30, %cst_11 {dimension_numbers = #tpu.dot_dimension_numbers<[1], [0], [0], [1], [0, 0, 1, 1], [], []>} : vector<16x256xbf16>, vector<256x256xbf16>, vector<16x256xf32> -> vector<16x256xf32>
    %c0_12 = arith.constant 0 : index
    %c0_13 = arith.constant 0 : index
    %33 = vector.load %arg8[%c0_12, %c0_13] : memref<1x256xf32, #tpu.memory_space<vmem>>, vector<1x256xf32>
    %34 = vector.broadcast %33 : vector<1x256xf32> to vector<16x256xf32>
    %35 = arith.addf %32, %34 : vector<16x256xf32>
    %cst_14 = arith.constant 5.000000e-01 : f32
    %36 = vector.broadcast %cst_14 : f32 to vector<16x256xf32>
    %37 = arith.mulf %36, %35 : vector<16x256xf32>
    %cst_15 = arith.constant 1.41421354 : f32
    %38 = vector.broadcast %cst_15 : f32 to vector<16x256xf32>
    %39 = arith.divf %35, %38 : vector<16x256xf32>
    %40 = math.erf %39 : vector<16x256xf32>
    %cst_16 = arith.constant 1.000000e+00 : f32
    %41 = vector.broadcast %cst_16 : f32 to vector<16x256xf32>
    %42 = arith.addf %41, %40 : vector<16x256xf32>
    %43 = arith.mulf %37, %42 : vector<16x256xf32>
    %cst_17 = arith.constant dense<0.000000e+00> : vector<16xf32>
    %44 = vector.multi_reduction <add>, %43, %cst_17 [1] : vector<16x256xf32> to vector<16xf32>
    %45 = vector.shape_cast %44 : vector<16xf32> to vector<16x1xf32>
    %cst_18 = arith.constant 2.560000e+02 : f32
    %46 = vector.broadcast %cst_18 : f32 to vector<16x1xf32>
    %47 = arith.divf %45, %46 : vector<16x1xf32>
    %48 = vector.broadcast %47 : vector<16x1xf32> to vector<16x256xf32>
    %49 = arith.subf %43, %48 : vector<16x256xf32>
    %50 = arith.mulf %49, %49 : vector<16x256xf32>
    %cst_19 = arith.constant dense<0.000000e+00> : vector<16xf32>
    %51 = vector.multi_reduction <add>, %50, %cst_19 [1] : vector<16x256xf32> to vector<16xf32>
    %52 = vector.shape_cast %51 : vector<16xf32> to vector<16x1xf32>
    %cst_20 = arith.constant 2.560000e+02 : f32
    %53 = vector.broadcast %cst_20 : f32 to vector<16x1xf32>
    %54 = arith.divf %52, %53 : vector<16x1xf32>
    %55 = vector.broadcast %47 : vector<16x1xf32> to vector<16x256xf32>
    %56 = arith.subf %43, %55 : vector<16x256xf32>
    %cst_21 = arith.constant 9.99999974E-6 : f32
    %57 = vector.broadcast %cst_21 : f32 to vector<16x1xf32>
    %58 = arith.addf %54, %57 : vector<16x1xf32>
    %59 = math.rsqrt %58 : vector<16x1xf32>
    %60 = vector.broadcast %59 : vector<16x1xf32> to vector<16x256xf32>
    %61 = arith.mulf %56, %60 : vector<16x256xf32>
    %c0_22 = arith.constant 0 : index
    %c0_23 = arith.constant 0 : index
    %62 = vector.load %arg12[%c0_22, %c0_23] : memref<1x256xf32, #tpu.memory_space<vmem>>, vector<1x256xf32>
    %63 = vector.broadcast %62 : vector<1x256xf32> to vector<16x256xf32>
    %64 = arith.mulf %61, %63 : vector<16x256xf32>
    %c0_24 = arith.constant 0 : index
    %c0_25 = arith.constant 0 : index
    %65 = vector.load %arg14[%c0_24, %c0_25] : memref<1x256xf32, #tpu.memory_space<vmem>>, vector<1x256xf32>
    %66 = vector.broadcast %65 : vector<1x256xf32> to vector<16x256xf32>
    %67 = arith.addf %64, %66 : vector<16x256xf32>
    %c0_26 = arith.constant 0 : index
    %c0_27 = arith.constant 0 : index
    %68 = vector.load %arg5[%c0_26, %c0_27] : memref<256x256xbf16, #tpu.memory_space<vmem>>, vector<256x256xbf16>
    %69 = arith.truncf %67 : vector<16x256xf32> to vector<16x256xbf16>
    %cst_28 = arith.constant dense<0.000000e+00> : vector<16x256xf32>
    %70 = tpu.matmul %69, %68, %cst_28 {dimension_numbers = #tpu.dot_dimension_numbers<[1], [0], [0], [1], [0, 0, 1, 1], [], []>} : vector<16x256xbf16>, vector<256x256xbf16>, vector<16x256xf32> -> vector<16x256xf32>
    %c0_29 = arith.constant 0 : index
    %c0_30 = arith.constant 0 : index
    %71 = vector.load %arg9[%c0_29, %c0_30] : memref<1x256xf32, #tpu.memory_space<vmem>>, vector<1x256xf32>
    %72 = vector.broadcast %71 : vector<1x256xf32> to vector<16x256xf32>
    %73 = arith.addf %70, %72 : vector<16x256xf32>
    %cst_31 = arith.constant 5.000000e-01 : f32
    %74 = vector.broadcast %cst_31 : f32 to vector<16x256xf32>
    %75 = arith.mulf %74, %73 : vector<16x256xf32>
    %cst_32 = arith.constant 1.41421354 : f32
    %76 = vector.broadcast %cst_32 : f32 to vector<16x256xf32>
    %77 = arith.divf %73, %76 : vector<16x256xf32>
    %78 = math.erf %77 : vector<16x256xf32>
    %cst_33 = arith.constant 1.000000e+00 : f32
    %79 = vector.broadcast %cst_33 : f32 to vector<16x256xf32>
    %80 = arith.addf %79, %78 : vector<16x256xf32>
    %81 = arith.mulf %75, %80 : vector<16x256xf32>
    %cst_34 = arith.constant dense<0.000000e+00> : vector<16xf32>
    %82 = vector.multi_reduction <add>, %81, %cst_34 [1] : vector<16x256xf32> to vector<16xf32>
    %83 = vector.shape_cast %82 : vector<16xf32> to vector<16x1xf32>
    %cst_35 = arith.constant 2.560000e+02 : f32
    %84 = vector.broadcast %cst_35 : f32 to vector<16x1xf32>
    %85 = arith.divf %83, %84 : vector<16x1xf32>
    %86 = vector.broadcast %85 : vector<16x1xf32> to vector<16x256xf32>
    %87 = arith.subf %81, %86 : vector<16x256xf32>
    %88 = arith.mulf %87, %87 : vector<16x256xf32>
    %cst_36 = arith.constant dense<0.000000e+00> : vector<16xf32>
    %89 = vector.multi_reduction <add>, %88, %cst_36 [1] : vector<16x256xf32> to vector<16xf32>
    %90 = vector.shape_cast %89 : vector<16xf32> to vector<16x1xf32>
    %cst_37 = arith.constant 2.560000e+02 : f32
    %91 = vector.broadcast %cst_37 : f32 to vector<16x1xf32>
    %92 = arith.divf %90, %91 : vector<16x1xf32>
    %93 = vector.broadcast %85 : vector<16x1xf32> to vector<16x256xf32>
    %94 = arith.subf %81, %93 : vector<16x256xf32>
    %cst_38 = arith.constant 9.99999974E-6 : f32
    %95 = vector.broadcast %cst_38 : f32 to vector<16x1xf32>
    %96 = arith.addf %92, %95 : vector<16x1xf32>
    %97 = math.rsqrt %96 : vector<16x1xf32>
    %98 = vector.broadcast %97 : vector<16x1xf32> to vector<16x256xf32>
    %99 = arith.mulf %94, %98 : vector<16x256xf32>
    %c0_39 = arith.constant 0 : index
    %c0_40 = arith.constant 0 : index
    %100 = vector.load %arg13[%c0_39, %c0_40] : memref<1x256xf32, #tpu.memory_space<vmem>>, vector<1x256xf32>
    %101 = vector.broadcast %100 : vector<1x256xf32> to vector<16x256xf32>
    %102 = arith.mulf %99, %101 : vector<16x256xf32>
    %c0_41 = arith.constant 0 : index
    %c0_42 = arith.constant 0 : index
    %103 = vector.load %arg15[%c0_41, %c0_42] : memref<1x256xf32, #tpu.memory_space<vmem>>, vector<1x256xf32>
    %104 = vector.broadcast %103 : vector<1x256xf32> to vector<16x256xf32>
    %105 = arith.addf %102, %104 : vector<16x256xf32>
    %c0_43 = arith.constant 0 : index
    %c0_44 = arith.constant 0 : index
    %106 = vector.load %arg6[%c0_43, %c0_44] : memref<256x256xbf16, #tpu.memory_space<vmem>>, vector<256x256xbf16>
    %107 = arith.truncf %105 : vector<16x256xf32> to vector<16x256xbf16>
    %cst_45 = arith.constant dense<0.000000e+00> : vector<16x256xf32>
    %108 = tpu.matmul %107, %106, %cst_45 {dimension_numbers = #tpu.dot_dimension_numbers<[1], [0], [0], [1], [0, 0, 1, 1], [], []>} : vector<16x256xbf16>, vector<256x256xbf16>, vector<16x256xf32> -> vector<16x256xf32>
    %c0_46 = arith.constant 0 : index
    %c0_47 = arith.constant 0 : index
    %109 = vector.load %arg10[%c0_46, %c0_47] : memref<1x256xf32, #tpu.memory_space<vmem>>, vector<1x256xf32>
    %110 = vector.broadcast %109 : vector<1x256xf32> to vector<16x256xf32>
    %111 = arith.addf %108, %110 : vector<16x256xf32>
    %cst_48 = arith.constant 5.000000e-01 : f32
    %112 = vector.broadcast %cst_48 : f32 to vector<16x256xf32>
    %113 = arith.mulf %112, %111 : vector<16x256xf32>
    %cst_49 = arith.constant 1.41421354 : f32
    %114 = vector.broadcast %cst_49 : f32 to vector<16x256xf32>
    %115 = arith.divf %111, %114 : vector<16x256xf32>
    %116 = math.erf %115 : vector<16x256xf32>
    %cst_50 = arith.constant 1.000000e+00 : f32
    %117 = vector.broadcast %cst_50 : f32 to vector<16x256xf32>
    %118 = arith.addf %117, %116 : vector<16x256xf32>
    %119 = arith.mulf %113, %118 : vector<16x256xf32>
    %c0_51 = arith.constant 0 : index
    %c0_52 = arith.constant 0 : index
    %120 = vector.load %arg7[%c0_51, %c0_52] : memref<256x256xbf16, #tpu.memory_space<vmem>>, vector<256x256xbf16>
    %121 = arith.truncf %119 : vector<16x256xf32> to vector<16x256xbf16>
    %cst_53 = arith.constant dense<0.000000e+00> : vector<16x256xf32>
    %122 = tpu.matmul %121, %120, %cst_53 {dimension_numbers = #tpu.dot_dimension_numbers<[1], [0], [0], [1], [0, 0, 1, 1], [], []>} : vector<16x256xbf16>, vector<256x256xbf16>, vector<16x256xf32> -> vector<16x256xf32>
    %c0_54 = arith.constant 0 : index
    %c0_55 = arith.constant 0 : index
    %123 = vector.load %arg11[%c0_54, %c0_55] : memref<1x256xf32, #tpu.memory_space<vmem>>, vector<1x256xf32>
    %124 = vector.broadcast %123 : vector<1x256xf32> to vector<16x256xf32>
    %125 = arith.addf %122, %124 : vector<16x256xf32>
    %c0_56 = arith.constant 0 : index
    %c0_57 = arith.constant 0 : index
    %c0_58 = arith.constant 0 : index
    %126 = vector.load %arg16[%c0_56, %c0_57, %c0_58] : memref<1x16x256xf32, #tpu.memory_space<vmem>>, vector<1x16x256xf32>
    %127 = vector.shape_cast %126 : vector<1x16x256xf32> to vector<16x256xf32>
    %128 = vector.shape_cast %125 : vector<16x256xf32> to vector<1x16x256xf32>
    tpu.vector_store %arg16[%c0_56, %c0_57, %c0_58], %128 {strides = array<i32>} : memref<1x16x256xf32, #tpu.memory_space<vmem>>, vector<1x16x256xf32>,
    %cst_59 = arith.constant 0.000000e+00 : f32
    %129 = vector.broadcast %cst_59 : f32 to vector<16x256xf32>
    %130 = arith.maximumf %125, %129 : vector<16x256xf32>
    %131 = math.absf %125 : vector<16x256xf32>
    %cst_60 = arith.constant 0.000000e+00 : f32
    %132 = vector.broadcast %cst_60 : f32 to vector<16x256xf32>
    %133 = arith.subf %132, %131 : vector<16x256xf32>
    %134 = math.exp %133 : vector<16x256xf32>
    %135 = math.log1p %134 : vector<16x256xf32>
    %136 = arith.addf %130, %135 : vector<16x256xf32>
    %137 = tpu.iota {dimensions = array<i32: 0>} : vector<16x256xi32>
    %cst_61 = arith.constant 0.000000e+00 : f32
    %138 = vector.broadcast %cst_61 : f32 to vector<16x256xf32>
    %c0_i32 = arith.constant 0 : i32
    %139 = vector.broadcast %c0_i32 : i32 to vector<16x256xi32>
    %140 = arith.cmpi sge, %137, %139 : vector<16x256xi32>
    %c8_i32 = arith.constant 8 : i32
    %141 = vector.broadcast %c8_i32 : i32 to vector<16x256xi32>
    %142 = arith.cmpi slt, %137, %141 : vector<16x256xi32>
    %143 = arith.andi %140, %142 : vector<16x256xi1>
    %144 = arith.extui %143 : vector<16x256xi1> to vector<16x256xi32>
    %145 = arith.sitofp %144 : vector<16x256xi32> to vector<16x256xf32>
    %146 = vector.extract_strided_slice %3 {offsets = [0, 0], sizes = [1, 256], strides = [1, 1]} : vector<2x256xf32> to vector<1x256xf32>
    %147 = vector.broadcast %146 : vector<1x256xf32> to vector<16x256xf32>
    %148 = arith.mulf %145, %147 : vector<16x256xf32>
    %149 = arith.addf %138, %148 : vector<16x256xf32>
    %c8_i32_62 = arith.constant 8 : i32
    %150 = vector.broadcast %c8_i32_62 : i32 to vector<16x256xi32>
    %151 = arith.cmpi sge, %137, %150 : vector<16x256xi32>
    %c16_i32 = arith.constant 16 : i32
    %152 = vector.broadcast %c16_i32 : i32 to vector<16x256xi32>
    %153 = arith.cmpi slt, %137, %152 : vector<16x256xi32>
    %154 = arith.andi %151, %153 : vector<16x256xi1>
    %155 = arith.extui %154 : vector<16x256xi1> to vector<16x256xi32>
    %156 = arith.sitofp %155 : vector<16x256xi32> to vector<16x256xf32>
    %157 = vector.extract_strided_slice %3 {offsets = [1, 0], sizes = [1, 256], strides = [1, 1]} : vector<2x256xf32> to vector<1x256xf32>
    %158 = vector.broadcast %157 : vector<1x256xf32> to vector<16x256xf32>
    %159 = arith.mulf %156, %158 : vector<16x256xf32>
    %160 = arith.addf %149, %159 : vector<16x256xf32>
    %161 = arith.mulf %160, %125 : vector<16x256xf32>
    %162 = arith.subf %161, %136 : vector<16x256xf32>
    %cst_63 = arith.constant dense<0.000000e+00> : vector<16xf32>
    %163 = vector.multi_reduction <add>, %162, %cst_63 [1] : vector<16x256xf32> to vector<16xf32>
    %164 = vector.shape_cast %163 : vector<16xf32> to vector<16x1xf32>
    %c0_64 = arith.constant 0 : index
    %c0_65 = arith.constant 0 : index
    %c0_66 = arith.constant 0 : index
    %165 = vector.load %arg17[%c0_64, %c0_65, %c0_66] : memref<1x16x1xf32, #tpu.memory_space<vmem>>, vector<1x16x1xf32>
    %166 = vector.shape_cast %165 : vector<1x16x1xf32> to vector<16x1xf32>
    %167 = vector.shape_cast %164 : vector<16x1xf32> to vector<1x16x1xf32>
    tpu.vector_store %arg17[%c0_64, %c0_65, %c0_66], %167 {strides = array<i32>} : memref<1x16x1xf32, #tpu.memory_space<vmem>>, vector<1x16x1xf32>,
    return
  }
  func.func @transform_0(%arg0: i32) -> (i32, i32, i32) {
    %c0_i32 = arith.constant 0 : i32
    %c0_i32_0 = arith.constant 0 : i32
    %c0_i32_1 = arith.constant 0 : i32
    return %arg0, %c0_i32, %c0_i32_0 : i32, i32, i32
  }
  func.func @transform_1(%arg0: i32) -> (i32, i32, i32) {
    %c0_i32 = arith.constant 0 : i32
    %c0_i32_0 = arith.constant 0 : i32
    %c0_i32_1 = arith.constant 0 : i32
    return %arg0, %c0_i32, %c0_i32_0 : i32, i32, i32
  }
  func.func @transform_2(%arg0: i32) -> (i32, i32) {
    %c0_i32 = arith.constant 0 : i32
    %c0_i32_0 = arith.constant 0 : i32
    %c0_i32_1 = arith.constant 0 : i32
    return %c0_i32, %c0_i32_0 : i32, i32
  }
  func.func @transform_3(%arg0: i32) -> (i32, i32) {
    %c0_i32 = arith.constant 0 : i32
    %c0_i32_0 = arith.constant 0 : i32
    %c0_i32_1 = arith.constant 0 : i32
    return %c0_i32, %c0_i32_0 : i32, i32
  }
  func.func @transform_4(%arg0: i32) -> (i32, i32) {
    %c0_i32 = arith.constant 0 : i32
    %c0_i32_0 = arith.constant 0 : i32
    %c0_i32_1 = arith.constant 0 : i32
    return %c0_i32, %c0_i32_0 : i32, i32
  }
  func.func @transform_5(%arg0: i32) -> (i32, i32) {
    %c0_i32 = arith.constant 0 : i32
    %c0_i32_0 = arith.constant 0 : i32
    %c0_i32_1 = arith.constant 0 : i32
    return %c0_i32, %c0_i32_0 : i32, i32
  }
  func.func @transform_6(%arg0: i32) -> (i32, i32) {
    %c0_i32 = arith.constant 0 : i32
    %c0_i32_0 = arith.constant 0 : i32
    %c0_i32_1 = arith.constant 0 : i32
    return %c0_i32, %c0_i32_0 : i32, i32
  }
  func.func @transform_7(%arg0: i32) -> (i32, i32) {
    %c0_i32 = arith.constant 0 : i32
    %c0_i32_0 = arith.constant 0 : i32
    %c0_i32_1 = arith.constant 0 : i32
    return %c0_i32, %c0_i32_0 : i32, i32
  }
  func.func @transform_8(%arg0: i32) -> (i32, i32) {
    %c0_i32 = arith.constant 0 : i32
    %c0_i32_0 = arith.constant 0 : i32
    %c0_i32_1 = arith.constant 0 : i32
    return %c0_i32, %c0_i32_0 : i32, i32
  }
  func.func @transform_9(%arg0: i32) -> (i32, i32) {
    %c0_i32 = arith.constant 0 : i32
    %c0_i32_0 = arith.constant 0 : i32
    %c0_i32_1 = arith.constant 0 : i32
    return %c0_i32, %c0_i32_0 : i32, i32
  }
  func.func @transform_10(%arg0: i32) -> (i32, i32) {
    %c0_i32 = arith.constant 0 : i32
    %c0_i32_0 = arith.constant 0 : i32
    %c0_i32_1 = arith.constant 0 : i32
    return %c0_i32, %c0_i32_0 : i32, i32
  }
  func.func @transform_11(%arg0: i32) -> (i32, i32) {
    %c0_i32 = arith.constant 0 : i32
    %c0_i32_0 = arith.constant 0 : i32
    %c0_i32_1 = arith.constant 0 : i32
    return %c0_i32, %c0_i32_0 : i32, i32
  }
  func.func @transform_12(%arg0: i32) -> (i32, i32) {
    %c0_i32 = arith.constant 0 : i32
    %c0_i32_0 = arith.constant 0 : i32
    %c0_i32_1 = arith.constant 0 : i32
    return %c0_i32, %c0_i32_0 : i32, i32
  }
  func.func @transform_13(%arg0: i32) -> (i32, i32) {
    %c0_i32 = arith.constant 0 : i32
    %c0_i32_0 = arith.constant 0 : i32
    %c0_i32_1 = arith.constant 0 : i32
    return %c0_i32, %c0_i32_0 : i32, i32
  }
  func.func @transform_14(%arg0: i32) -> (i32, i32) {
    %c0_i32 = arith.constant 0 : i32
    %c0_i32_0 = arith.constant 0 : i32
    %c0_i32_1 = arith.constant 0 : i32
    return %c0_i32, %c0_i32_0 : i32, i32
  }
  func.func @transform_15(%arg0: i32) -> (i32, i32, i32) {
    %c0_i32 = arith.constant 0 : i32
    %c0_i32_0 = arith.constant 0 : i32
    %c0_i32_1 = arith.constant 0 : i32
    return %arg0, %c0_i32, %c0_i32_0 : i32, i32, i32
  }
  func.func @transform_16(%arg0: i32) -> (i32, i32, i32) {
    %c0_i32 = arith.constant 0 : i32
    %c0_i32_0 = arith.constant 0 : i32
    %c0_i32_1 = arith.constant 0 : i32
    return %arg0, %c0_i32, %c0_i32_0 : i32, i32, i32
  }
}

</mosaic_0001>

<bundles_post_ra>
// kernel: forward.2
= control target key start
LH: loop header
LB: loop body
LE: loop exit
PB: predicated region body
PF: predicated region fallthrough
CT: control target
= control target key end

     0   :  { %s3409_s0 = inlined_call_operand.vmem [shape: f32[2], index: 0, kind: input, shape index: {}]   ;;  %s3410_s1 = inlined_call_operand.vmem [shape: f32[2,256], index: 1, kind: input, shape index: {}]   ;;  %s3411_s2 = inlined_call_operand.vmem [shape: f32[2,256], index: 2, kind: input, shape index: {}]   ;;  %s3412_s3 = inlined_call_operand.vmem [shape: bf16[256,256], index: 3, kind: input, shape index: {}]   ;;  %s3413_s4 = inlined_call_operand.vmem [shape: bf16[256,256], index: 4, kind: input, shape index: {}]   ;;  %s3414_s5 = inlined_call_operand.vmem [shape: bf16[256,256], index: 5, kind: input, shape index: {}]   ;;  %s3415_s6 = inlined_call_operand.vmem [shape: bf16[256,256], index: 6, kind: input, shape index: {}]   ;;  %s3416_s7 = inlined_call_operand.vmem [shape: f32[1,256], index: 7, kind: input, shape index: {}]   ;;  %s3417_s8 = inlined_call_operand.vmem [shape: f32[1,256], index: 8, kind: input, shape index: {}]   ;;  %s3418_s9 = inlined_call_operand.vmem [shape: f32[1,256], index: 9, kind: input, shape index: {}]   ;;  %s3419_s10 = inlined_call_operand.vmem [shape: f32[1,256], index: 10, kind: input, shape index: {}]   ;;  %s3420_s11 = inlined_call_operand.vmem [shape: f32[1,256], index: 11, kind: input, shape index: {}]   ;;  %s3421_s12 = inlined_call_operand.vmem [shape: f32[1,256], index: 12, kind: input, shape index: {}]   ;;  %s3422_s13 = inlined_call_operand.vmem [shape: f32[1,256], index: 13, kind: input, shape index: {}]   ;;  %s3423_s14 = inlined_call_operand.vmem [shape: f32[1,256], index: 14, kind: input, shape index: {}]   ;;  %s3424_s15 = inlined_call_operand.vmem [shape: bf16[256,256], index: 15, kind: input, shape index: {}]   ;;  %s3425_s16 = inlined_call_operand.vmem [shape: f32[2,256], index: 16, kind: output, shape index: {0}]   ;;  %s3426_s17 = inlined_call_operand.vmem [shape: f32[2,256], index: 17, kind: output, shape index: {1}]  }
   0x1   :  { %3427 = sst [smem:[#allocation5_spill]] %s3409_s0 }
   0x2   :  { %3428 = sst [smem:[#allocation6_spill]] %s3410_s1 }
   0x3   :  { %23 = vsyncpa [#allocation3], 0  ;;  %s3429_s26 = sld [smem:[#allocation5_spill]] }
   0x9   :  { %s30_s27 = sshll.u32 %s3429_s26, 4  ;;  %s31_s27 = int_to_ptr.vmem [resolvable:$true] %s30_s27 }
   0xa   :  { %s2421_s28 = scalar_lea.vmem %s31_s27, 16  ;;  %p2426_p1 = scmp.lt.s32.totalorder %s31_s27, %s31_s27 }
   0xb   :  { %p2422_p0 = scmp.ne.s32.totalorder %s31_s27, %s2421_s28  ;;  %p2427_p2 = scmp.lt.s32.totalorder %s2421_s28, %s2421_s28 }
   0xd   :  { %p2428_p3 = por %p2427_p2, %p2426_p1 }
   0xf   :  { %p2429_p4 = pnand %p2428_p3, %p2422_p0 }
  0x11   :  { %2432 = shalt.err (!%p2429_p4)
}
  0x12   :  { %s2435_s29 = smov [#allocation2]  }
  0x13   :  { %33 = dma.vmem_to_smem %s31_s27, 16, %s2435_s29, [#allocation3]  }
  0x14   :  { %2433 = dma.done.wait [#allocation3], 16  }
  0x15   :  { %2434 = vsyncadd [#allocation3], 4294967280 }
  0x16   :  { %67 = sfence }
  0x17   :  { %v2101_v0 = vld [vmem:[%s3412_s3 + $0x4] ss:$8 sps:$4 sm:$0xff]   ;;  %v2103_v1 = vld [vmem:[%s3412_s3] ss:$8 sps:$4 sm:$0xff]   ;;  %v2104_v2 = vld [vmem:[%s3412_s3 + $0x14] ss:$8 sps:$4 sm:$0xff]  }
  0x18   :  { %537 = vmatprep.subr.bf16.mxu1 %v2101_v0  ;;  %v2106_v3 = vld [vmem:[%s3412_s3 + $0x10] ss:$8 sps:$4 sm:$0xff]   ;;  %v2107_v4 = vld [vmem:[%s3412_s3 + $0x24] ss:$8 sps:$4 sm:$0xff]   ;;  %v2109_v5 = vld [vmem:[%s3412_s3 + $0x20] ss:$8 sps:$4 sm:$0xff]  }
  0x19   :  { %538 = vmatpush1.bf16.msra.mxu1 %v2103_v1  ;;  %v2110_v6 = vld [vmem:[%s3412_s3 + $0x34] ss:$8 sps:$4 sm:$0xff]   ;;  %v2112_v7 = vld [vmem:[%s3412_s3 + $0x30] ss:$8 sps:$4 sm:$0xff]   ;;  %v2113_v8 = vld [vmem:[%s3412_s3 + $0x44] ss:$8 sps:$4 sm:$0xff]  }
  0x1a   :  { %539 = vmatprep.subr.bf16.mxu1 %v2104_v2  ;;  %v2115_v9 = vld [vmem:[%s3412_s3 + $0x40] ss:$8 sps:$4 sm:$0xff]   ;;  %v2116_v10 = vld [vmem:[%s3412_s3 + $0x54] ss:$8 sps:$4 sm:$0xff]   ;;  %v2118_v11 = vld [vmem:[%s3412_s3 + $0x50] ss:$8 sps:$4 sm:$0xff]  }
  0x1b   :  { %v2119_v12 = vld [vmem:[%s3412_s3 + $0x64] ss:$8 sps:$4 sm:$0xff]   ;;  %v2121_v13 = vld [vmem:[%s3412_s3 + $0x60] ss:$8 sps:$4 sm:$0xff]   ;;  %v2122_v15 = vld [vmem:[%s3412_s3 + $0x74] ss:$8 sps:$4 sm:$0xff]  }
  0x1c   :  { %v1956_v14 = vld.sshfl [vmem:[%s3411_s2] sm:$0x33 pattern:$0x76325410]  ;;  %v2124_v18 = vld [vmem:[%s3412_s3 + $0x70] ss:$8 sps:$4 sm:$0xff]  }
  0x1d   :  { %540 = vmatpush1.bf16.msra.mxu1 %v2106_v3  ;;  %v360_v16 = vcombine.high %v1956_v14, %v1956_v14  ;;  %v2125_v19 = vld [vmem:[%s3412_s3 + $0x84] ss:$8 sps:$4 sm:$0xff]   ;;  %v2127_v20 = vld [vmem:[%s3412_s3 + $0x80] ss:$8 sps:$4 sm:$0xff]   ;;  %v2128_v21 = vld [vmem:[%s3412_s3 + $0x94] ss:$8 sps:$4 sm:$0xff]   ;;  %v363_v35 = vpack.c.bf16 %v1956_v14, %v1956_v14 }
  0x1e   :  { %541 = vmatprep.subr.bf16.mxu1 %v2107_v4  ;;  %v2130_v22 = vld [vmem:[%s3412_s3 + $0x90] ss:$8 sps:$4 sm:$0xff]   ;;  %v2131_v23 = vld [vmem:[%s3412_s3 + $0xa4] ss:$8 sps:$4 sm:$0xff]   ;;  %v2133_v24 = vld [vmem:[%s3412_s3 + $0xa0] ss:$8 sps:$4 sm:$0xff]  }
  0x1f   :  { %v364_v17 = vpack.c.bf16 %v360_v16, %v360_v16  ;;  %v2134_v25 = vld [vmem:[%s3412_s3 + $0xb4] ss:$8 sps:$4 sm:$0xff]   ;;  %v2136_v26 = vld [vmem:[%s3412_s3 + $0xb0] ss:$8 sps:$4 sm:$0xff]   ;;  %v2137_v27 = vld [vmem:[%s3412_s3 + $0xc4] ss:$8 sps:$4 sm:$0xff]  }
  0x20   :  { %v2139_v28 = vld [vmem:[%s3412_s3 + $0xc0] ss:$8 sps:$4 sm:$0xff]   ;;  %v2140_v29 = vld [vmem:[%s3412_s3 + $0xd4] ss:$8 sps:$4 sm:$0xff]   ;;  %v2142_v30 = vld [vmem:[%s3412_s3 + $0xd0] ss:$8 sps:$4 sm:$0xff]  }
  0x21   :  { %542 = vmatpush1.bf16.msra.mxu1 %v2109_v5  ;;  %569 = vmatprep.mubr.bf16.mxu1 %v364_v17  ;;  %v2143_v31 = vld [vmem:[%s3412_s3 + $0xe4] ss:$8 sps:$4 sm:$0xff]   ;;  %v2145_v32 = vld [vmem:[%s3412_s3 + $0xe0] ss:$8 sps:$4 sm:$0xff]   ;;  %v2146_v33 = vld [vmem:[%s3412_s3 + $0xf4] ss:$8 sps:$4 sm:$0xff]  }
  0x22   :  { %543 = vmatprep.subr.bf16.mxu1 %v2110_v6  ;;  %v2148_v34 = vld [vmem:[%s3412_s3 + $0xf0] ss:$8 sps:$4 sm:$0xff]   ;;  %v2635_v36 = vld [vmem:[%s3424_s15 + $0x4] ss:$8 sps:$4 sm:$0xff]   ;;  %v2640_v37 = vld [vmem:[%s3424_s15] ss:$8 sps:$4 sm:$0xff]  }
  0x23   :  { %v2645_v38 = vld [vmem:[%s3424_s15 + $0x14] ss:$8 sps:$4 sm:$0xff]   ;;  %274 = vmatprep.subr.bf16.mxu0 %v2635_v36  ;;  %v2652_v39 = vld [vmem:[%s3424_s15 + $0x10] ss:$8 sps:$4 sm:$0xff]   ;;  %v2658_v40 = vld [vmem:[%s3424_s15 + $0x24] ss:$8 sps:$4 sm:$0xff]  }
  0x24   :  { %275 = vmatpush1.bf16.msra.mxu0 %v2640_v37  ;;  %v2664_v41 = vld [vmem:[%s3424_s15 + $0x20] ss:$8 sps:$4 sm:$0xff]   ;;  %v2670_v42 = vld [vmem:[%s3424_s15 + $0x34] ss:$8 sps:$4 sm:$0xff]   ;;  %v2676_v43 = vld [vmem:[%s3424_s15 + $0x30] ss:$8 sps:$4 sm:$0xff]  }
  0x25   :  { %544 = vmatpush1.bf16.msra.mxu1 %v2112_v7  ;;  %276 = vmatprep.subr.bf16.mxu0 %v2645_v38  ;;  %s3430_s20 = sld [smem:[#allocation6_spill]]  ;;  %v2685_v45 = vld [vmem:[%s3424_s15 + $0x44] ss:$8 sps:$4 sm:$0xff]   ;;  %v2691_v48 = vld [vmem:[%s3424_s15 + $0x40] ss:$8 sps:$4 sm:$0xff]   ;;  %vm589_vm0 = vcmask 1041408  }
  0x26   :  { %545 = vmatprep.subr.bf16.mxu1 %v2113_v8  ;;  %v2697_v49 = vld [vmem:[%s3424_s15 + $0x54] ss:$8 sps:$4 sm:$0xff]   ;;  %v2703_v50 = vld [vmem:[%s3424_s15 + $0x50] ss:$8 sps:$4 sm:$0xff]   ;;  %v2709_v51 = vld [vmem:[%s3424_s15 + $0x64] ss:$8 sps:$4 sm:$0xff]   ;;  %v367_v8 = vlaneseq }
  0x27   :  { %v2715_v52 = vld [vmem:[%s3424_s15 + $0x60] ss:$8 sps:$4 sm:$0xff]   ;;  %v2721_v53 = vld [vmem:[%s3424_s15 + $0x74] ss:$8 sps:$4 sm:$0xff]   ;;  %v2727_v54 = vld [vmem:[%s3424_s15 + $0x70] ss:$8 sps:$4 sm:$0xff]  }
  0x28   :  { %277 = vmatpush1.bf16.msra.mxu0 %v2652_v39  ;;  %v2733_v55 = vld [vmem:[%s3424_s15 + $0x84] ss:$8 sps:$4 sm:$0xff]   ;;  %v2739_v56 = vld [vmem:[%s3424_s15 + $0x80] ss:$8 sps:$4 sm:$0xff]   ;;  %v2745_v57 = vld [vmem:[%s3424_s15 + $0x94] ss:$8 sps:$4 sm:$0xff]  }
  0x29   :  { %546 = vmatpush1.bf16.msra.mxu1 %v2115_v9  ;;  %278 = vmatprep.subr.bf16.mxu0 %v2658_v40  ;;  %v2751_v58 = vld [vmem:[%s3424_s15 + $0x90] ss:$8 sps:$4 sm:$0xff]   ;;  %v2757_v59 = vld [vmem:[%s3424_s15 + $0xa4] ss:$8 sps:$4 sm:$0xff]   ;;  %v2763_v60 = vld [vmem:[%s3424_s15 + $0xa0] ss:$8 sps:$4 sm:$0xff]  }
  0x2a   :  { %547 = vmatprep.subr.bf16.mxu1 %v2116_v10  ;;  %v2769_v61 = vld [vmem:[%s3424_s15 + $0xb4] ss:$8 sps:$4 sm:$0xff]   ;;  %v2775_v62 = vld [vmem:[%s3424_s15 + $0xb0] ss:$8 sps:$4 sm:$0xff]   ;;  %v2781_v63 = vld [vmem:[%s3424_s15 + $0xc4] ss:$8 sps:$4 sm:$0xff]  }
  0x2b   :  { %v1923_v44 = vld.sshfl [vmem:[%s3430_s20] sm:$0x33 pattern:$0x76325410]  ;;  %v2793_v1 = vld [vmem:[%s3424_s15 + $0xd4] ss:$8 sps:$4 sm:$0xff]  }
  0x2c   :  { %279 = vmatpush1.bf16.msra.mxu0 %v2664_v41  ;;  %v109_v46 = vcombine.high %v1923_v44, %v1923_v44  ;;  %v2787_v0 = vld [vmem:[%s3424_s15 + $0xc0] ss:$8 sps:$4 sm:$0xff]   ;;  %v2799_v2 = vld [vmem:[%s3424_s15 + $0xd0] ss:$8 sps:$4 sm:$0xff]   ;;  %v2805_v3 = vld [vmem:[%s3424_s15 + $0xe4] ss:$8 sps:$4 sm:$0xff]   ;;  %v112_v7 = vpack.c.bf16 %v1923_v44, %v1923_v44 }
  0x2d   :  { %548 = vmatpush1.bf16.msra.mxu1 %v2118_v11  ;;  %280 = vmatprep.subr.bf16.mxu0 %v2670_v42  ;;  %v2811_v4 = vld [vmem:[%s3424_s15 + $0xe0] ss:$8 sps:$4 sm:$0xff]   ;;  %v2817_v5 = vld [vmem:[%s3424_s15 + $0xf4] ss:$8 sps:$4 sm:$0xff]   ;;  %v2823_v6 = vld [vmem:[%s3424_s15 + $0xf0] ss:$8 sps:$4 sm:$0xff]  }
  0x2e   :  { %549 = vmatprep.subr.bf16.mxu1 %v2119_v12  ;;  %v113_v47 = vpack.c.bf16 %v109_v46, %v109_v46  ;;  %v368_v9 = vshrl.u32 %v367_v8, 7  ;;  %v365_v11 = vld [vmem:[%s3416_s7] sm:$0x3]  ;;  %v2202_v44 = vld [vmem:[%s3413_s4 + $0x14] ss:$8 sps:$4 sm:$0xff]   ;;  %s315_s3 = sld [smem:[#allocation2]] }
  0x2f   :  { %v2200_v46 = vld [vmem:[%s3413_s4 + $0x10] ss:$8 sps:$4 sm:$0xff]   ;;  %vm1498_vm1 = vcmask 254976   ;;  %vm1525_vm2 = vcmask 517376   ;;  %s2436_s28 = smov 96   ;;  %vm1556_vm3 = vcmask 779776  }
  0x30   :  { %281 = vmatpush1.bf16.msra.mxu0 %v2676_v43  ;;  %306 = vmatprep.mubr.bf16.mxu0 %v113_v47  ;;  %v2828_v10 = vsub.s32 0, %v368_v9  ;;  %v2833_v12 = vsub.s32 1, %v368_v9  ;;  %v2205_v47 = vld [vmem:[%s3413_s4 + $0x24] ss:$8 sps:$4 sm:$0xff]   ;;  %v2208_v9 = vld [vmem:[%s3413_s4 + $0x34] ss:$8 sps:$4 sm:$0xff]  }
  0x31   :  { %550 = vmatpush1.bf16.msra.mxu1 %v2121_v13  ;;  %282 = vmatprep.subr.bf16.mxu0 %v2685_v45  ;;  %vm1587_vm8 = vcmask 1042176  }
  0x32   :  { %551 = vmatprep.subr.bf16.mxu1 %v2122_v15  ;;  %v370_v13 = vrot.slane %v365_v11, %v2828_v10  ;;  %v374_v14 = vrot.slane %v365_v11, %v2833_v12  ;;  %v2206_v11 = vld [vmem:[%s3413_s4 + $0x30] ss:$8 sps:$4 sm:$0xff]  }
  0x34   :  { %283 = vmatpush1.bf16.msra.mxu0 %v2691_v48 }
  0x35   :  { %552 = vmatpush1.bf16.msra.mxu1 %v2124_v18  ;;  %284 = vmatprep.subr.bf16.mxu0 %v2697_v49 }
  0x36   :  { %553 = vmatprep.subr.bf16.mxu1 %v2125_v19 }
  0x38   :  { %285 = vmatpush1.bf16.msra.mxu0 %v2703_v50 }
  0x39   :  { %554 = vmatpush1.bf16.msra.mxu1 %v2127_v20  ;;  %286 = vmatprep.subr.bf16.mxu0 %v2709_v51 }
  0x3a   :  { %555 = vmatprep.subr.bf16.mxu1 %v2128_v21 }
  0x3c   :  { %287 = vmatpush1.bf16.msra.mxu0 %v2715_v52 }
  0x3d   :  { %556 = vmatpush1.bf16.msra.mxu1 %v2130_v22  ;;  %288 = vmatprep.subr.bf16.mxu0 %v2721_v53 }
  0x3e   :  { %557 = vmatprep.subr.bf16.mxu1 %v2131_v23 }
  0x40   :  { %289 = vmatpush1.bf16.msra.mxu0 %v2727_v54 }
  0x41   :  { %558 = vmatpush1.bf16.msra.mxu1 %v2133_v24  ;;  %290 = vmatprep.subr.bf16.mxu0 %v2733_v55 }
  0x42   :  { %559 = vmatprep.subr.bf16.mxu1 %v2134_v25 }
  0x44   :  { %291 = vmatpush1.bf16.msra.mxu0 %v2739_v56 }
  0x45   :  { %560 = vmatpush1.bf16.msra.mxu1 %v2136_v26  ;;  %292 = vmatprep.subr.bf16.mxu0 %v2745_v57 }
  0x46   :  { %561 = vmatprep.subr.bf16.mxu1 %v2137_v27 }
  0x48   :  { %293 = vmatpush1.bf16.msra.mxu0 %v2751_v58 }
  0x49   :  { %562 = vmatpush1.bf16.msra.mxu1 %v2139_v28  ;;  %294 = vmatprep.subr.bf16.mxu0 %v2757_v59 }
  0x4a   :  { %563 = vmatprep.subr.bf16.mxu1 %v2140_v29 }
  0x4c   :  { %295 = vmatpush1.bf16.msra.mxu0 %v2763_v60 }
  0x4d   :  { %564 = vmatpush1.bf16.msra.mxu1 %v2142_v30  ;;  %296 = vmatprep.subr.bf16.mxu0 %v2769_v61 }
  0x4e   :  { %565 = vmatprep.subr.bf16.mxu1 %v2143_v31 }
  0x50   :  { %297 = vmatpush1.bf16.msra.mxu0 %v2775_v62 }
  0x51   :  { %566 = vmatpush1.bf16.msra.mxu1 %v2145_v32  ;;  %298 = vmatprep.subr.bf16.mxu0 %v2781_v63 }
  0x52   :  { %567 = vmatprep.subr.bf16.mxu1 %v2146_v33 }
  0x54   :  { %299 = vmatpush1.bf16.msra.mxu0 %v2787_v0 }
  0x55   :  { %568 = vmatpush1.bf16.msra.mxu1 %v2148_v34  ;;  %300 = vmatprep.subr.bf16.mxu0 %v2793_v1  ;;  %v2197_v34 = vld [vmem:[%s3413_s4] ss:$8 sps:$4 sm:$0xff]  }
  0x58   :  { %570 = vmatmul.mubr.bf16.vlgmr.msra.gmra.mrb[0].mxu1 %v363_v35  ;;  %301 = vmatpush1.bf16.msra.mxu0 %v2799_v2  ;;  %v2199_v35 = vld [vmem:[%s3413_s4 + $0x4] ss:$8 sps:$4 sm:$0xff]  }
  0x59   :  { %302 = vmatprep.subr.bf16.mxu0 %v2805_v3 }
  0x5c   :  { %303 = vmatpush1.bf16.msra.mxu0 %v2811_v4 }
  0x5d   :  { %304 = vmatprep.subr.bf16.mxu0 %v2817_v5 }
  0x60   :  { %305 = vmatpush1.bf16.msra.mxu0 %v2823_v6 }
  0x61   :  { %845 = vmatprep.subr.bf16.mxu0 %v2199_v35 }
  0x63   :  { %307 = vmatmul.mubr.bf16.vlgmr.msra.gmra.mrb[0].mxu0 %v112_v7  ;;  %v2203_v7 = vld [vmem:[%s3413_s4 + $0x20] ss:$8 sps:$4 sm:$0xff]  }
  0x64   :  { %846 = vmatpush1.bf16.msra.mxu0 %v2197_v34 }
  0x65   :  { %847 = vmatprep.subr.bf16.mxu0 %v2202_v44  ;;  %v2229_v44 = vld [vmem:[%s3413_s4 + $0xa4] ss:$8 sps:$4 sm:$0xff]  }
  0x68   :  { %848 = vmatpush1.bf16.msra.mxu0 %v2200_v46  ;;  %v2227_v46 = vld [vmem:[%s3413_s4 + $0xa0] ss:$8 sps:$4 sm:$0xff]  }
  0x69   :  { %849 = vmatprep.subr.bf16.mxu0 %v2205_v47  ;;  %v2235_v47 = vld [vmem:[%s3413_s4 + $0xc4] ss:$8 sps:$4 sm:$0xff]  }
  0x6c   :  { %850 = vmatpush1.bf16.msra.mxu0 %v2203_v7  ;;  %v2233_v7 = vld [vmem:[%s3413_s4 + $0xc0] ss:$8 sps:$4 sm:$0xff]  }
  0x6d   :  { %851 = vmatprep.subr.bf16.mxu0 %v2208_v9  ;;  %v2238_v9 = vld [vmem:[%s3413_s4 + $0xd4] ss:$8 sps:$4 sm:$0xff]  }
  0x70   :  { %852 = vmatpush1.bf16.msra.mxu0 %v2206_v11  ;;  %v2236_v11 = vld [vmem:[%s3413_s4 + $0xd0] ss:$8 sps:$4 sm:$0xff]  }
 0x12b   :  { %v571_v15 = vpop.f32.mrb[0].mxu1 }
 0x12c   :  { %v572_v16 = vadd.f32 %v571_v15, %v370_v13  ;;  %v573_v17 = vpop.f32.mrb[1].mxu1  ;;  %v2211_v13 = vld [vmem:[%s3413_s4 + $0x44] ss:$8 sps:$4 sm:$0xff]   ;;  %v2214_v15 = vld [vmem:[%s3413_s4 + $0x54] ss:$8 sps:$4 sm:$0xff]  }
 0x12d   :  { %v574_v18 = vadd.f32 %v573_v17, %v374_v14  ;;  %v575_v19 = vpop.f32.mrb[2].mxu1  ;;  %v2209_v14 = vld [vmem:[%s3413_s4 + $0x40] ss:$8 sps:$4 sm:$0xff]   ;;  %853 = vmatprep.subr.bf16.mxu0 %v2211_v13  ;;  %v2217_v17 = vld [vmem:[%s3413_s4 + $0x64] ss:$8 sps:$4 sm:$0xff]  }
 0x12e   :  { %v581_v20 = vmul.f32 0.70710677, %v572_v16  ;;  %v576_v21 = vpop.f32.mrb[3].mxu1  ;;  %v578_v25 = vmul.f32 0.5, %v572_v16  ;;  %854 = vmatpush1.bf16.msra.mxu0 %v2209_v14  ;;  %v2212_v16 = vld [vmem:[%s3413_s4 + $0x50] ss:$8 sps:$4 sm:$0xff]  }
 0x12f   :  { %v582_v22 = vmul.f32 0.70710677, %v574_v18  ;;  %v579_v27 = vmul.f32 0.5, %v574_v18  ;;  %855 = vmatprep.subr.bf16.mxu0 %v2214_v15  ;;  %v2215_v18 = vld [vmem:[%s3413_s4 + $0x60] ss:$8 sps:$4 sm:$0xff]  }
 0x130   :  { %2341 = verf.f32 %v581_v20  ;;  %v2220_v19 = vld [vmem:[%s3413_s4 + $0x74] ss:$8 sps:$4 sm:$0xff]   ;;  %v2218_v20 = vld [vmem:[%s3413_s4 + $0x70] ss:$8 sps:$4 sm:$0xff]   ;;  %v2223_v21 = vld [vmem:[%s3413_s4 + $0x84] ss:$8 sps:$4 sm:$0xff]  }
 0x131   :  { %2343 = verf.f32 %v582_v22  ;;  %v2221_v22 = vld [vmem:[%s3413_s4 + $0x80] ss:$8 sps:$4 sm:$0xff]   ;;  %v2241_v13 = vld [vmem:[%s3413_s4 + $0xe4] ss:$8 sps:$4 sm:$0xff]   ;;  %v2244_v15 = vld [vmem:[%s3413_s4 + $0xf4] ss:$8 sps:$4 sm:$0xff]  }
 0x132   :  { %856 = vmatpush1.bf16.msra.mxu0 %v2212_v16  ;;  %v2239_v14 = vld [vmem:[%s3413_s4 + $0xe0] ss:$8 sps:$4 sm:$0xff]   ;;  %v2242_v16 = vld [vmem:[%s3413_s4 + $0xf0] ss:$8 sps:$4 sm:$0xff]  }
 0x133   :  { %857 = vmatprep.subr.bf16.mxu0 %v2217_v17 }
 0x136   :  { %858 = vmatpush1.bf16.msra.mxu0 %v2215_v18  ;;  %v308_v17 = vpop.f32.mrb[0].mxu0  ;;  %v316_v18 = vstv %s315_s3 }
 0x137   :  { %859 = vmatprep.subr.bf16.mxu0 %v2220_v19  ;;  %v2937_v19 = vmul.f32 %v316_v18, %v308_v17  ;;  %v673_v17 = vld [vmem:[%s3417_s8] sm:$0x3] }
 0x13a   :  { %v2342_v23 = vpop.eup %2341  ;;  %860 = vmatpush1.bf16.msra.mxu0 %v2218_v20  ;;  %v1499_v20 = vsel %vm1498_vm1, %v2937_v19, -inf }
 0x13b   :  { %v2344_v24 = vpop.eup %2343  ;;  %v585_v26 = vadd.f32 1.0, %v2342_v23  ;;  %861 = vmatprep.subr.bf16.mxu0 %v2223_v21  ;;  %v2226_v23 = vld [vmem:[%s3413_s4 + $0x94] ss:$8 sps:$4 sm:$0xff]   ;;  %v1526_v21 = vsel %vm1525_vm2, %v2937_v19, -inf }
 0x13c   :  { %v586_v28 = vadd.f32 1.0, %v2344_v24  ;;  %v2224_v24 = vld [vmem:[%s3413_s4 + $0x90] ss:$8 sps:$4 sm:$0xff]  }
 0x13d   :  { %v587_v29 = vmul.f32 %v585_v26, %v578_v25 }
 0x13e   :  { %v588_v30 = vmul.f32 %v586_v28, %v579_v27  ;;  %862 = vmatpush1.bf16.msra.mxu0 %v2221_v22  ;;  %v310_v22 = vpop.f32.mrb[1].mxu0 }
 0x13f   :  { %v590_v31 = vsel %vm589_vm0, %v587_v29, 0.0  ;;  %863 = vmatprep.subr.bf16.mxu0 %v2226_v23  ;;  %v2943_v23 = vmul.f32 %v316_v18, %v310_v22  ;;  %v678_v18 = vrot.slane %v673_v17, %v2828_v10 }
 0x140   :  { %v591_v32 = vsel %vm589_vm0, %v588_v30, 0.0 }
 0x141   :  { %v592_v33 = vadd.f32 %v591_v32, %v590_v31 }
 0x142   :  { %864 = vmatpush1.bf16.msra.mxu0 %v2224_v24  ;;  %v312_v24 = vpop.f32.mrb[2].mxu0 }
 0x143   :  { %593 = vadd.xlane.f32.xlu0 %v592_v33  ;;  %865 = vmatprep.subr.bf16.mxu0 %v2229_v44 }
 0x146   :  { %866 = vmatpush1.bf16.msra.mxu0 %v2227_v46 }
 0x1d0   :  { %v594_v25 = vpop.xlane.xlu0 %593 }
 0x1d1   :  { %v596_v26 = vmul.f32 0.00390625, %v594_v25  ;;  %v313_v25 = vpop.f32.mrb[3].mxu0 }
 0x1d3   :  { %v597_v27 = vsub.f32 %v587_v29, %v596_v26  ;;  %v598_v28 = vsub.f32 %v588_v30, %v596_v26  ;;  %v2232_v29 = vld [vmem:[%s3413_s4 + $0xb4] ss:$8 sps:$4 sm:$0xff]   ;;  %v2230_v30 = vld [vmem:[%s3413_s4 + $0xb0] ss:$8 sps:$4 sm:$0xff]  }
 0x1d4   :  { %867 = vmatprep.subr.bf16.mxu0 %v2232_v29 }
 0x1d5   :  { %v599_v31 = vmul.f32 %v597_v27, %v597_v27  ;;  %v600_v32 = vmul.f32 %v598_v28, %v598_v28  ;;  %868 = vmatpush1.bf16.msra.mxu0 %v2230_v30 }
 0x1d6   :  { %869 = vmatprep.subr.bf16.mxu0 %v2235_v47 }
 0x1d7   :  { %v601_v33 = vsel %vm589_vm0, %v599_v31, 0.0  ;;  %v602_v34 = vsel %vm589_vm0, %v600_v32, 0.0 }
 0x1d8   :  { %v603_v35 = vadd.f32 %v602_v34, %v601_v33  ;;  %v611_v33 = vld [vmem:[%s3420_s11] sm:$0x3] }
 0x1d9   :  { %870 = vmatpush1.bf16.msra.mxu0 %v2233_v7  ;;  %v625_v34 = vld [vmem:[%s3422_s13] sm:$0x3]  ;;  %v620_v44 = vrot.slane %v611_v33, %v2833_v12 }
 0x1da   :  { %604 = vadd.xlane.f32.xlu0 %v603_v35  ;;  %871 = vmatprep.subr.bf16.mxu0 %v2238_v9  ;;  %v616_v35 = vrot.slane %v611_v33, %v2828_v10  ;;  %v630_v30 = vrot.slane %v625_v34, %v2828_v10  ;;  %v634_v47 = vrot.slane %v625_v34, %v2833_v12 }
 0x1dd   :  { %872 = vmatpush1.bf16.msra.mxu0 %v2236_v11 }
 0x1de   :  { %873 = vmatprep.subr.bf16.mxu0 %v2241_v13  ;;  %1500 = vmax.xlane.f32.xlu0 %v1499_v20 }
 0x1e1   :  { %874 = vmatpush1.bf16.msra.mxu0 %v2239_v14 }
 0x1e2   :  { %875 = vmatprep.subr.bf16.mxu0 %v2244_v15  ;;  %1527 = vmax.xlane.f32.xlu0 %v1526_v21 }
 0x1e5   :  { %876 = vmatpush1.bf16.msra.mxu0 %v2242_v16 }
 0x267   :  { %v605_v26 = vpop.xlane.xlu0 %604 }
 0x268   :  { %v606_v31 = vmul.f32 0.00390625, %v605_v26 }
 0x26a   :  { %v607_v32 = vadd.f32 1e-05, %v606_v31 }
 0x26c   :  { %2345 = vrsqrt.f32 %v607_v32 }
 0x276   :  { %v2346_v46 = vpop.eup %2345 }
 0x277   :  { %v610_v29 = vmul.f32 %v2346_v46, %v598_v28  ;;  %v609_v7 = vmul.f32 %v2346_v46, %v597_v27  ;;  %v682_v28 = vrot.slane %v673_v17, %v2833_v12  ;;  %v2251_v17 = vld [vmem:[%s3414_s5 + $0x20] ss:$8 sps:$4 sm:$0xff]  }
 0x279   :  { %v624_v9 = vmul.f32 %v620_v44, %v610_v29  ;;  %v623_v11 = vmul.f32 %v616_v35, %v609_v7 }
 0x27b   :  { %v638_v13 = vadd.f32 %v634_v47, %v624_v9  ;;  %v637_v14 = vadd.f32 %v630_v30, %v623_v11  ;;  %v2245_v11 = vld [vmem:[%s3414_s5] ss:$8 sps:$4 sm:$0xff]  }
 0x27d   :  { %v672_v15 = vpack.c.bf16 %v638_v13, %v638_v13  ;;  %v671_v16 = vpack.c.bf16 %v637_v14, %v637_v14  ;;  %v2247_v13 = vld [vmem:[%s3414_s5 + $0x4] ss:$8 sps:$4 sm:$0xff]   ;;  %v2250_v14 = vld [vmem:[%s3414_s5 + $0x14] ss:$8 sps:$4 sm:$0xff]  }
 0x27e   :  { %1150 = vmatprep.subr.bf16.mxu1 %v2247_v13 }
 0x27f   :  { %877 = vmatprep.mubr.bf16.mxu0 %v672_v15  ;;  %1151 = vmatpush1.bf16.msra.mxu1 %v2245_v11  ;;  %v2248_v15 = vld [vmem:[%s3414_s5 + $0x10] ss:$8 sps:$4 sm:$0xff]  }
 0x280   :  { %878 = vmatmul.mubr.bf16.vlgmr.msra.gmra.mrb[4].mxu0 %v671_v16  ;;  %1152 = vmatprep.subr.bf16.mxu1 %v2250_v14  ;;  %v2253_v16 = vld [vmem:[%s3414_s5 + $0x24] ss:$8 sps:$4 sm:$0xff]  }
 0x283   :  { %1153 = vmatpush1.bf16.msra.mxu1 %v2248_v15 }
 0x284   :  { %1154 = vmatprep.subr.bf16.mxu1 %v2253_v16 }
 0x287   :  { %1155 = vmatpush1.bf16.msra.mxu1 %v2251_v17 }
 0x353   :  { %v879_v20 = vpop.f32.mrb[4].mxu0 }
 0x354   :  { %v880_v21 = vadd.f32 %v879_v20, %v678_v18  ;;  %v881_v22 = vpop.f32.mrb[5].mxu0  ;;  %v2256_v18 = vld [vmem:[%s3414_s5 + $0x34] ss:$8 sps:$4 sm:$0xff]   ;;  %v2259_v20 = vld [vmem:[%s3414_s5 + $0x44] ss:$8 sps:$4 sm:$0xff]  }
 0x355   :  { %v882_v27 = vadd.f32 %v881_v22, %v682_v28  ;;  %v883_v24 = vpop.f32.mrb[6].mxu0  ;;  %v2254_v28 = vld [vmem:[%s3414_s5 + $0x30] ss:$8 sps:$4 sm:$0xff]   ;;  %1156 = vmatprep.subr.bf16.mxu1 %v2256_v18  ;;  %v2262_v22 = vld [vmem:[%s3414_s5 + $0x54] ss:$8 sps:$4 sm:$0xff]  }
 0x356   :  { %v888_v25 = vmul.f32 0.70710677, %v880_v21  ;;  %v884_v26 = vpop.f32.mrb[7].mxu0  ;;  %v886_v34 = vmul.f32 0.5, %v880_v21  ;;  %1157 = vmatpush1.bf16.msra.mxu1 %v2254_v28  ;;  %v2257_v21 = vld [vmem:[%s3414_s5 + $0x40] ss:$8 sps:$4 sm:$0xff]  }
 0x357   :  { %v889_v31 = vmul.f32 0.70710677, %v882_v27  ;;  %v887_v44 = vmul.f32 0.5, %v882_v27  ;;  %1158 = vmatprep.subr.bf16.mxu1 %v2259_v20  ;;  %v2260_v27 = vld [vmem:[%s3414_s5 + $0x50] ss:$8 sps:$4 sm:$0xff]  }
 0x358   :  { %2347 = verf.f32 %v888_v25  ;;  %v2265_v24 = vld [vmem:[%s3414_s5 + $0x64] ss:$8 sps:$4 sm:$0xff]   ;;  %v2263_v25 = vld [vmem:[%s3414_s5 + $0x60] ss:$8 sps:$4 sm:$0xff]   ;;  %v2268_v26 = vld [vmem:[%s3414_s5 + $0x74] ss:$8 sps:$4 sm:$0xff]  }
 0x359   :  { %2349 = verf.f32 %v889_v31  ;;  %v2266_v31 = vld [vmem:[%s3414_s5 + $0x70] ss:$8 sps:$4 sm:$0xff]  }
 0x35a   :  { %1159 = vmatpush1.bf16.msra.mxu1 %v2257_v21 }
 0x35b   :  { %1160 = vmatprep.subr.bf16.mxu1 %v2262_v22 }
 0x35e   :  { %1161 = vmatpush1.bf16.msra.mxu1 %v2260_v27 }
 0x35f   :  { %1162 = vmatprep.subr.bf16.mxu1 %v2265_v24  ;;  %v2280_v24 = vld [vmem:[%s3414_s5 + $0xb4] ss:$8 sps:$4 sm:$0xff]  }
 0x362   :  { %v2348_v32 = vpop.eup %2347  ;;  %1163 = vmatpush1.bf16.msra.mxu1 %v2263_v25  ;;  %v2278_v25 = vld [vmem:[%s3414_s5 + $0xb0] ss:$8 sps:$4 sm:$0xff]  }
 0x363   :  { %v2350_v33 = vpop.eup %2349  ;;  %v892_v35 = vadd.f32 1.0, %v2348_v32  ;;  %1164 = vmatprep.subr.bf16.mxu1 %v2268_v26  ;;  %v2271_v32 = vld [vmem:[%s3414_s5 + $0x84] ss:$8 sps:$4 sm:$0xff]  }
 0x364   :  { %v893_v46 = vadd.f32 1.0, %v2350_v33  ;;  %v2269_v33 = vld [vmem:[%s3414_s5 + $0x80] ss:$8 sps:$4 sm:$0xff]  }
 0x365   :  { %v894_v29 = vmul.f32 %v892_v35, %v886_v34  ;;  %v2274_v34 = vld [vmem:[%s3414_s5 + $0x94] ss:$8 sps:$4 sm:$0xff]   ;;  %v2272_v35 = vld [vmem:[%s3414_s5 + $0x90] ss:$8 sps:$4 sm:$0xff]  }
 0x366   :  { %v895_v30 = vmul.f32 %v893_v46, %v887_v44  ;;  %1165 = vmatpush1.bf16.msra.mxu1 %v2266_v31  ;;  %v3022_v44 = vpop.xlane.xlu0 %1500  ;;  %v2283_v31 = vld [vmem:[%s3414_s5 + $0xc4] ss:$8 sps:$4 sm:$0xff]  }
 0x367   :  { %v896_v47 = vsel %vm589_vm0, %v894_v29, 0.0  ;;  %1166 = vmatprep.subr.bf16.mxu1 %v2271_v32  ;;  %v1502_v46 = vsub.f32 %v2937_v19, %v3022_v44  ;;  %v2281_v32 = vld [vmem:[%s3414_s5 + $0xc0] ss:$8 sps:$4 sm:$0xff]  }
 0x368   :  { %v897_v7 = vsel %vm589_vm0, %v895_v30, 0.0 }
 0x369   :  { %v898_v9 = vadd.f32 %v897_v7, %v896_v47  ;;  %v1503_v47 = vmul.f32 1.442695, %v1502_v46  ;;  %v2287_v46 = vld [vmem:[%s3414_s5 + $0xe0] ss:$8 sps:$4 sm:$0xff]  }
 0x36a   :  { %1167 = vmatpush1.bf16.msra.mxu1 %v2269_v33  ;;  %v3028_v28 = vpop.xlane.xlu0 %1527  ;;  %v2286_v33 = vld [vmem:[%s3414_s5 + $0xd4] ss:$8 sps:$4 sm:$0xff]  }
 0x36b   :  { %899 = vadd.xlane.f32.xlu1 %v898_v9  ;;  %1168 = vmatprep.subr.bf16.mxu1 %v2274_v34  ;;  %2351 = vpow2.f32 %v1503_v47  ;;  %v1529_v21 = vsub.f32 %v2937_v19, %v3028_v28  ;;  %v2284_v34 = vld [vmem:[%s3414_s5 + $0xd0] ss:$8 sps:$4 sm:$0xff]   ;;  %v2292_v47 = vld [vmem:[%s3414_s5 + $0xf4] ss:$8 sps:$4 sm:$0xff]  }
 0x36d   :  { %v1530_v27 = vmul.f32 1.442695, %v1529_v21  ;;  %v1557_v21 = vsel %vm1556_vm3, %v2937_v19, -inf }
 0x36e   :  { %1169 = vmatpush1.bf16.msra.mxu1 %v2272_v35  ;;  %v2289_v35 = vld [vmem:[%s3414_s5 + $0xe4] ss:$8 sps:$4 sm:$0xff]  }
 0x36f   :  { %2353 = vpow2.f32 %v1530_v27 }
 0x375   :  { %v2352_v20 = vpop.eup %2351 }
 0x376   :  { %v1505_v22 = vsel %vm1498_vm1, %v2352_v20, 0.0  ;;  %v916_v20 = vld [vmem:[%s3421_s12] sm:$0x3] }
 0x377   :  { %v925_v27 = vrot.slane %v916_v20, %v2833_v12 }
 0x379   :  { %v2354_v26 = vpop.eup %2353 }
 0x3f8   :  { %v900_v7 = vpop.xlane.xlu1 %899 }
 0x3f9   :  { %v901_v9 = vmul.f32 0.00390625, %v900_v7  ;;  %v2290_v7 = vld [vmem:[%s3414_s5 + $0xf0] ss:$8 sps:$4 sm:$0xff]  }
 0x3fb   :  { %v902_v11 = vsub.f32 %v894_v29, %v901_v9  ;;  %v903_v13 = vsub.f32 %v895_v30, %v901_v9  ;;  %v2277_v29 = vld [vmem:[%s3414_s5 + $0xa4] ss:$8 sps:$4 sm:$0xff]   ;;  %v2275_v30 = vld [vmem:[%s3414_s5 + $0xa0] ss:$8 sps:$4 sm:$0xff]  }
 0x3fc   :  { %1170 = vmatprep.subr.bf16.mxu1 %v2277_v29 }
 0x3fd   :  { %v904_v14 = vmul.f32 %v902_v11, %v902_v11  ;;  %v905_v15 = vmul.f32 %v903_v13, %v903_v13  ;;  %1171 = vmatpush1.bf16.msra.mxu1 %v2275_v30 }
 0x3fe   :  { %1172 = vmatprep.subr.bf16.mxu1 %v2280_v24 }
 0x3ff   :  { %v906_v16 = vsel %vm589_vm0, %v904_v14, 0.0  ;;  %v907_v17 = vsel %vm589_vm0, %v905_v15, 0.0 }
 0x400   :  { %v908_v18 = vadd.f32 %v907_v17, %v906_v16 }
 0x401   :  { %1173 = vmatpush1.bf16.msra.mxu1 %v2278_v25 }
 0x402   :  { %909 = vadd.xlane.f32.xlu1 %v908_v18  ;;  %1174 = vmatprep.subr.bf16.mxu1 %v2283_v31 }
 0x405   :  { %1175 = vmatpush1.bf16.msra.mxu1 %v2281_v32 }
 0x406   :  { %1506 = vadd.xlane.f32.xlu1 %v1505_v22  ;;  %1176 = vmatprep.subr.bf16.mxu1 %v2286_v33  ;;  %v921_v22 = vrot.slane %v916_v20, %v2828_v10 }
 0x409   :  { %1177 = vmatpush1.bf16.msra.mxu1 %v2284_v34 }
 0x40a   :  { %1178 = vmatprep.subr.bf16.mxu1 %v2289_v35 }
 0x40d   :  { %1179 = vmatpush1.bf16.msra.mxu1 %v2287_v46 }
 0x40e   :  { %1180 = vmatprep.subr.bf16.mxu1 %v2292_v47 }
 0x411   :  { %1181 = vmatpush1.bf16.msra.mxu1 %v2290_v7 }
 0x412   :  { %1450 = vmatprep.subr.bf16.mxu1 %v2635_v36  ;;  %v930_v36 = vld [vmem:[%s3423_s14] sm:$0x3] }
 0x413   :  { %v935_v24 = vrot.slane %v930_v36, %v2828_v10  ;;  %v939_v25 = vrot.slane %v930_v36, %v2833_v12 }
 0x417   :  { %1533 = vrot.lane.b32.xlu1 %v2354_v26, %s2436_s28 }
 0x48f   :  { %v910_v9 = vpop.xlane.xlu1 %909 }
 0x490   :  { %v911_v14 = vmul.f32 0.00390625, %v910_v9  ;;  %v3217_v9 = vand.u32 127, %v367_v8 }
 0x492   :  { %v912_v15 = vadd.f32 1e-05, %v911_v14  ;;  %vm1542_vm4 = vcmp.ge.s32.totalorder %v3217_v9, 32  ;;  %vm1544_vm5 = vcmp.lt.s32.totalorder %v3217_v9, 64  ;;  %vm1513_vm6 = vcmp.lt.s32.totalorder %v3217_v9, 32 }
 0x493   :  { %v3071_v16 = vpop.xlane.xlu1 %1506  ;;  %vm1546_vm7 = vmand %vm1542_vm4, %vm1544_vm5  ;;  %vm1573_vm9 = vcmp.ge.s32.totalorder %v3217_v9, 64  ;;  %vm1575_vm10 = vcmp.lt.s32.totalorder %v3217_v9, 96  ;;  %vm1604_vm12 = vcmp.ge.s32.totalorder %v3217_v9, 96 }
 0x494   :  { %2355 = vrsqrt.f32 %v912_v15  ;;  %vm1577_vm11 = vmand %vm1573_vm9, %vm1575_vm10 }
 0x495   :  { %2357 = vlog2.f32 %v3071_v16 }
 0x497   :  { %v1534_v17 = vpop.permute.xlu1 %1533 }
 0x498   :  { %v1536_v18 = vsel %vm1498_vm1, %v1534_v17, 0.0 }
 0x499   :  { %1537 = vadd.xlane.f32.xlu0 %v1536_v18 }
 0x49d   :  { %1558 = vmax.xlane.f32.xlu0 %v1557_v21  ;;  %v2437_v21 = vmov 0.0  }
 0x49e   :  { %v2356_v29 = vpop.eup %2355  ;;  %v3226_v8 = vsel %vm1513_vm6, 1.0, %v2437_v21  ;;  %v3229_v36 = vsel %vm1546_vm7, 1.0, %v2437_v21 }
 0x49f   :  { %v915_v30 = vmul.f32 %v2356_v29, %v903_v13  ;;  %v914_v26 = vmul.f32 %v2356_v29, %v902_v11  ;;  %v2338_v11 = vld [vmem:[%s3415_s6 + $0xf0] ss:$8 sps:$4 sm:$0xff]   ;;  %v2358_v7 = vpop.eup %2357 }
 0x4a0   :  { %v1509_v17 = vmul.f32 0.6931472, %v2358_v7 }
 0x4a1   :  { %v929_v31 = vmul.f32 %v925_v27, %v915_v30  ;;  %v928_v32 = vmul.f32 %v921_v22, %v914_v26 }
 0x4a2   :  { %v1510_v18 = vadd.f32 %v1509_v17, %v3022_v44  ;;  %v1588_v44 = vsel %vm1587_vm8, %v2937_v19, -inf }
 0x4a3   :  { %v943_v33 = vadd.f32 %v939_v25, %v929_v31  ;;  %v942_v34 = vadd.f32 %v935_v24, %v928_v32 }
 0x4a4   :  { %v1521_v27 = vmul.f32 %v3226_v8, %v1510_v18  ;;  %v1522_v29 = vmul.f32 0.0, %v1510_v18 }
 0x4a5   :  { %v977_v35 = vpack.c.bf16 %v943_v33, %v943_v33  ;;  %v976_v46 = vpack.c.bf16 %v942_v34, %v942_v34 }
 0x4a7   :  { %1182 = vmatprep.mubr.bf16.mxu1 %v977_v35 }
 0x4a8   :  { %1183 = vmatmul.mubr.bf16.vlgmr.msra.gmra.mrb[4].mxu1 %v976_v46 }
 0x4a9   :  { %1451 = vmatpush1.bf16.msra.mxu1 %v2640_v37  ;;  %v2293_v37 = vld [vmem:[%s3415_s6] ss:$8 sps:$4 sm:$0xff]  }
 0x4aa   :  { %1452 = vmatprep.subr.bf16.mxu1 %v2645_v38  ;;  %v2295_v38 = vld [vmem:[%s3415_s6 + $0x4] ss:$8 sps:$4 sm:$0xff]  }
 0x4ab   :  { %1407 = vmatprep.subr.bf16.mxu0 %v2295_v38 }
 0x4ac   :  { %1408 = vmatpush1.bf16.msra.mxu0 %v2293_v37 }
 0x4ad   :  { %1453 = vmatpush1.bf16.msra.mxu1 %v2652_v39  ;;  %v2298_v39 = vld [vmem:[%s3415_s6 + $0x14] ss:$8 sps:$4 sm:$0xff]  }
 0x4ae   :  { %1454 = vmatprep.subr.bf16.mxu1 %v2658_v40  ;;  %v2296_v40 = vld [vmem:[%s3415_s6 + $0x10] ss:$8 sps:$4 sm:$0xff]   ;;  %1409 = vmatprep.subr.bf16.mxu0 %v2298_v39 }
 0x4b0   :  { %1410 = vmatpush1.bf16.msra.mxu0 %v2296_v40 }
 0x4b1   :  { %1455 = vmatpush1.bf16.msra.mxu1 %v2664_v41  ;;  %v2299_v41 = vld [vmem:[%s3415_s6 + $0x20] ss:$8 sps:$4 sm:$0xff]  }
 0x4b2   :  { %1456 = vmatprep.subr.bf16.mxu1 %v2670_v42  ;;  %v2301_v42 = vld [vmem:[%s3415_s6 + $0x24] ss:$8 sps:$4 sm:$0xff]  }
 0x4b3   :  { %1411 = vmatprep.subr.bf16.mxu0 %v2301_v42 }
 0x4b4   :  { %1412 = vmatpush1.bf16.msra.mxu0 %v2299_v41 }
 0x4b5   :  { %1457 = vmatpush1.bf16.msra.mxu1 %v2676_v43  ;;  %v2304_v43 = vld [vmem:[%s3415_s6 + $0x34] ss:$8 sps:$4 sm:$0xff]  }
 0x4b6   :  { %1458 = vmatprep.subr.bf16.mxu1 %v2685_v45  ;;  %v2302_v45 = vld [vmem:[%s3415_s6 + $0x30] ss:$8 sps:$4 sm:$0xff]   ;;  %1413 = vmatprep.subr.bf16.mxu0 %v2304_v43 }
 0x4b8   :  { %1414 = vmatpush1.bf16.msra.mxu0 %v2302_v45 }
 0x4b9   :  { %1459 = vmatpush1.bf16.msra.mxu1 %v2691_v48  ;;  %v2307_v48 = vld [vmem:[%s3415_s6 + $0x44] ss:$8 sps:$4 sm:$0xff]  }
 0x4ba   :  { %1460 = vmatprep.subr.bf16.mxu1 %v2697_v49  ;;  %v2305_v49 = vld [vmem:[%s3415_s6 + $0x40] ss:$8 sps:$4 sm:$0xff]   ;;  %1415 = vmatprep.subr.bf16.mxu0 %v2307_v48 }
 0x4bc   :  { %1416 = vmatpush1.bf16.msra.mxu0 %v2305_v49 }
 0x4bd   :  { %1461 = vmatpush1.bf16.msra.mxu1 %v2703_v50  ;;  %v2310_v50 = vld [vmem:[%s3415_s6 + $0x54] ss:$8 sps:$4 sm:$0xff]  }
 0x4be   :  { %1462 = vmatprep.subr.bf16.mxu1 %v2709_v51  ;;  %v2308_v51 = vld [vmem:[%s3415_s6 + $0x50] ss:$8 sps:$4 sm:$0xff]   ;;  %1417 = vmatprep.subr.bf16.mxu0 %v2310_v50 }
 0x4c0   :  { %1418 = vmatpush1.bf16.msra.mxu0 %v2308_v51 }
 0x4c1   :  { %1463 = vmatpush1.bf16.msra.mxu1 %v2715_v52  ;;  %v2313_v52 = vld [vmem:[%s3415_s6 + $0x64] ss:$8 sps:$4 sm:$0xff]  }
 0x4c2   :  { %1464 = vmatprep.subr.bf16.mxu1 %v2721_v53  ;;  %v2311_v53 = vld [vmem:[%s3415_s6 + $0x60] ss:$8 sps:$4 sm:$0xff]   ;;  %1419 = vmatprep.subr.bf16.mxu0 %v2313_v52 }
 0x4c4   :  { %1420 = vmatpush1.bf16.msra.mxu0 %v2311_v53 }
 0x4c5   :  { %1465 = vmatpush1.bf16.msra.mxu1 %v2727_v54  ;;  %v2316_v54 = vld [vmem:[%s3415_s6 + $0x74] ss:$8 sps:$4 sm:$0xff]  }
 0x4c6   :  { %1466 = vmatprep.subr.bf16.mxu1 %v2733_v55  ;;  %v2314_v55 = vld [vmem:[%s3415_s6 + $0x70] ss:$8 sps:$4 sm:$0xff]   ;;  %1421 = vmatprep.subr.bf16.mxu0 %v2316_v54 }
 0x4c8   :  { %1422 = vmatpush1.bf16.msra.mxu0 %v2314_v55 }
 0x4c9   :  { %1467 = vmatpush1.bf16.msra.mxu1 %v2739_v56  ;;  %v2319_v56 = vld [vmem:[%s3415_s6 + $0x84] ss:$8 sps:$4 sm:$0xff]  }
 0x4ca   :  { %1468 = vmatprep.subr.bf16.mxu1 %v2745_v57  ;;  %v2317_v57 = vld [vmem:[%s3415_s6 + $0x80] ss:$8 sps:$4 sm:$0xff]   ;;  %1423 = vmatprep.subr.bf16.mxu0 %v2319_v56 }
 0x4cc   :  { %1424 = vmatpush1.bf16.msra.mxu0 %v2317_v57 }
 0x4cd   :  { %1469 = vmatpush1.bf16.msra.mxu1 %v2751_v58  ;;  %v2322_v58 = vld [vmem:[%s3415_s6 + $0x94] ss:$8 sps:$4 sm:$0xff]  }
 0x4ce   :  { %1470 = vmatprep.subr.bf16.mxu1 %v2757_v59  ;;  %v2320_v59 = vld [vmem:[%s3415_s6 + $0x90] ss:$8 sps:$4 sm:$0xff]   ;;  %1425 = vmatprep.subr.bf16.mxu0 %v2322_v58 }
 0x4d0   :  { %1426 = vmatpush1.bf16.msra.mxu0 %v2320_v59 }
 0x4d1   :  { %1471 = vmatpush1.bf16.msra.mxu1 %v2763_v60  ;;  %v2325_v60 = vld [vmem:[%s3415_s6 + $0xa4] ss:$8 sps:$4 sm:$0xff]  }
 0x4d2   :  { %1472 = vmatprep.subr.bf16.mxu1 %v2769_v61  ;;  %v2323_v61 = vld [vmem:[%s3415_s6 + $0xa0] ss:$8 sps:$4 sm:$0xff]   ;;  %1427 = vmatprep.subr.bf16.mxu0 %v2325_v60 }
 0x4d4   :  { %1428 = vmatpush1.bf16.msra.mxu0 %v2323_v61 }
 0x4d5   :  { %1473 = vmatpush1.bf16.msra.mxu1 %v2775_v62  ;;  %v2328_v62 = vld [vmem:[%s3415_s6 + $0xb4] ss:$8 sps:$4 sm:$0xff]  }
 0x4d6   :  { %1474 = vmatprep.subr.bf16.mxu1 %v2781_v63  ;;  %v2326_v63 = vld [vmem:[%s3415_s6 + $0xb0] ss:$8 sps:$4 sm:$0xff]   ;;  %1429 = vmatprep.subr.bf16.mxu0 %v2328_v62 }
 0x4d8   :  { %1430 = vmatpush1.bf16.msra.mxu0 %v2326_v63 }
 0x4d9   :  { %1475 = vmatpush1.bf16.msra.mxu1 %v2787_v0  ;;  %v2331_v0 = vld [vmem:[%s3415_s6 + $0xc4] ss:$8 sps:$4 sm:$0xff]  }
 0x4da   :  { %1476 = vmatprep.subr.bf16.mxu1 %v2793_v1  ;;  %v2329_v1 = vld [vmem:[%s3415_s6 + $0xc0] ss:$8 sps:$4 sm:$0xff]   ;;  %1431 = vmatprep.subr.bf16.mxu0 %v2331_v0  ;;  %v3248_v0 = vsel %vm1577_vm11, 1.0, %v2437_v21 }
 0x4dc   :  { %1432 = vmatpush1.bf16.msra.mxu0 %v2329_v1 }
 0x4dd   :  { %1477 = vmatpush1.bf16.msra.mxu1 %v2799_v2  ;;  %v2334_v2 = vld [vmem:[%s3415_s6 + $0xd4] ss:$8 sps:$4 sm:$0xff]  }
 0x4de   :  { %1478 = vmatprep.subr.bf16.mxu1 %v2805_v3  ;;  %v2332_v3 = vld [vmem:[%s3415_s6 + $0xd0] ss:$8 sps:$4 sm:$0xff]   ;;  %1433 = vmatprep.subr.bf16.mxu0 %v2334_v2 }
 0x4e0   :  { %1434 = vmatpush1.bf16.msra.mxu0 %v2332_v3 }
 0x4e1   :  { %1479 = vmatpush1.bf16.msra.mxu1 %v2811_v4  ;;  %v2337_v4 = vld [vmem:[%s3415_s6 + $0xe4] ss:$8 sps:$4 sm:$0xff]  }
 0x4e2   :  { %1480 = vmatprep.subr.bf16.mxu1 %v2817_v5  ;;  %v2335_v5 = vld [vmem:[%s3415_s6 + $0xe0] ss:$8 sps:$4 sm:$0xff]   ;;  %1435 = vmatprep.subr.bf16.mxu0 %v2337_v4 }
 0x4e4   :  { %1436 = vmatpush1.bf16.msra.mxu0 %v2335_v5 }
 0x4e5   :  { %1481 = vmatpush1.bf16.msra.mxu1 %v2823_v6  ;;  %v2340_v6 = vld [vmem:[%s3415_s6 + $0xf4] ss:$8 sps:$4 sm:$0xff]   ;;  %s2438_s6 = smov 64  }
 0x4e6   :  { %1437 = vmatprep.subr.bf16.mxu0 %v2340_v6  ;;  %v1235_v6 = vld [vmem:[%s3419_s10] sm:$0x3]  ;;  %s2085_s10 = sld [smem:[#allocation2 + $0x1]] }
 0x4e8   :  { %1438 = vmatpush1.bf16.msra.mxu0 %v2338_v11  ;;  %v1240_v11 = vrot.slane %v1235_v6, %v2828_v10 }
 0x526   :  { %v1538_v13 = vpop.xlane.xlu0 %1537 }
 0x527   :  { %2359 = vlog2.f32 %v1538_v13  ;;  %v1244_v13 = vrot.slane %v1235_v6, %v2833_v12 }
 0x52a   :  { %v3214_v47 = vpop.xlane.xlu0 %1558 }
 0x52b   :  { %v1560_v14 = vsub.f32 %v2937_v19, %v3214_v47 }
 0x52d   :  { %v1561_v15 = vmul.f32 1.442695, %v1560_v14 }
 0x52f   :  { %2361 = vpow2.f32 %v1561_v15 }
 0x531   :  { %v2360_v16 = vpop.eup %2359 }
 0x532   :  { %v1540_v20 = vmul.f32 0.6931472, %v2360_v16 }
 0x534   :  { %v1541_v22 = vadd.f32 %v1540_v20, %v3028_v28  ;;  %v978_v28 = vld [vmem:[%s3418_s9] sm:$0x3]  ;;  %s2439_s9 = smov 32  }
 0x535   :  { %v983_v32 = vrot.slane %v978_v28, %v2828_v10  ;;  %v987_v33 = vrot.slane %v978_v28, %v2833_v12  ;;  %v1644_v10 = vsel %vm1525_vm2, %v2943_v23, -inf }
 0x536   :  { %v1552_v30 = vmul.f32 %v3229_v36, %v1541_v22  ;;  %v1553_v24 = vmul.f32 0.0, %v1541_v22 }
 0x538   :  { %v1554_v25 = vadd.f32 %v1552_v30, %v1521_v27  ;;  %v1555_v26 = vadd.f32 %v1553_v24, %v1522_v29  ;;  %v1618_v29 = vsel %vm1498_vm1, %v2943_v23, -inf }
 0x539   :  { %v2362_v31 = vpop.eup %2361 }
 0x53a   :  { %1564 = vrot.lane.b32.xlu0 %v2362_v31, %s2438_s6 }
 0x559   :  { %1589 = vmax.xlane.f32.xlu0 %v1588_v44 }
 0x57b   :  { %v1184_v34 = vpop.f32.mrb[4].mxu1 }
 0x57c   :  { %v1185_v35 = vadd.f32 %v1184_v34, %v983_v32  ;;  %v1186_v46 = vpop.f32.mrb[5].mxu1 }
 0x57d   :  { %v1187_v37 = vadd.f32 %v1186_v46, %v987_v33  ;;  %v1188_v38 = vpop.f32.mrb[6].mxu1  ;;  %v3266_v33 = vsel %vm1604_vm12, 1.0, %v2437_v21 }
 0x57e   :  { %v1193_v39 = vmul.f32 0.70710677, %v1185_v35  ;;  %v1189_v40 = vpop.f32.mrb[7].mxu1  ;;  %v1191_v45 = vmul.f32 0.5, %v1185_v35 }
 0x57f   :  { %v1194_v41 = vmul.f32 0.70710677, %v1187_v37  ;;  %v1192_v49 = vmul.f32 0.5, %v1187_v37 }
 0x580   :  { %2363 = verf.f32 %v1193_v39 }
 0x581   :  { %2365 = verf.f32 %v1194_v41 }
 0x58a   :  { %v2364_v42 = vpop.eup %2363 }
 0x58b   :  { %v2366_v43 = vpop.eup %2365  ;;  %v1197_v48 = vadd.f32 1.0, %v2364_v42  ;;  %v1674_v42 = vsel %vm1556_vm3, %v2943_v23, -inf }
 0x58c   :  { %v1198_v50 = vadd.f32 1.0, %v2366_v43 }
 0x58d   :  { %v1199_v51 = vmul.f32 %v1197_v48, %v1191_v45 }
 0x58e   :  { %v1200_v52 = vmul.f32 %v1198_v50, %v1192_v49 }
 0x58f   :  { %v1233_v54 = vpack.c.bf16 %v1199_v51, %v1199_v51 }
 0x590   :  { %v1234_v53 = vpack.c.bf16 %v1200_v52, %v1200_v52  ;;  %v1704_v52 = vsel %vm1587_vm8, %v2943_v23, -inf }
 0x592   :  { %1439 = vmatprep.mubr.bf16.mxu0 %v1234_v53 }
 0x593   :  { %1440 = vmatmul.mubr.bf16.vlgmr.msra.gmra.mrb[8].mxu0 %v1233_v54 }
 0x5ac   :  { %v1565_v55 = vpop.permute.xlu0 %1564 }
 0x5ad   :  { %v1567_v56 = vsel %vm1498_vm1, %v1565_v55, 0.0 }
 0x5ae   :  { %1568 = vadd.xlane.f32.xlu1 %v1567_v56  ;;  %v3281_v56 = vadd.s32 128, %v3217_v9 }
 0x5b0   :  { %vm1633_vm13 = vcmp.lt.s32.totalorder %v3281_v56, 160  ;;  %vm1661_vm14 = vcmp.ge.s32.totalorder %v3281_v56, 160  ;;  %vm1663_vm15 = vcmp.lt.s32.totalorder %v3281_v56, 192  ;;  %vm1721_vm5 = vcmp.ge.s32.totalorder %v3281_v56, 224 }
 0x5b1   :  { %vm1665_vm0 = vmand %vm1661_vm14, %vm1663_vm15 }
 0x5e6   :  { %v1590_v57 = vpop.xlane.xlu0 %1589 }
 0x5e7   :  { %v1591_v58 = vsub.f32 %v2937_v19, %v1590_v57 }
 0x5e9   :  { %v1592_v59 = vmul.f32 1.442695, %v1591_v58 }
 0x5eb   :  { %2367 = vpow2.f32 %v1592_v59 }
 0x5f5   :  { %v2368_v60 = vpop.eup %2367 }
 0x5f6   :  { %1595 = vrot.lane.b32.xlu1 %v2368_v60, %s2439_s9  ;;  %v3285_v60 = vsel %vm1633_vm13, 1.0, %v2437_v21 }
 0x63b   :  { %v1569_v61 = vpop.xlane.xlu1 %1568 }
 0x63c   :  { %2369 = vlog2.f32 %v1569_v61 }
 0x646   :  { %v2370_v62 = vpop.eup %2369 }
 0x647   :  { %v1571_v63 = vmul.f32 0.6931472, %v2370_v62 }
 0x649   :  { %v1572_v1 = vadd.f32 %v1571_v63, %v3214_v47 }
 0x64b   :  { %v1583_v2 = vmul.f32 %v3248_v0, %v1572_v1  ;;  %v1584_v3 = vmul.f32 0.0, %v1572_v1 }
 0x64d   :  { %v1585_v4 = vadd.f32 %v1583_v2, %v1554_v25  ;;  %v1586_v5 = vadd.f32 %v1584_v3, %v1555_v26 }
 0x666   :  { %v1441_v7 = vpop.f32.mrb[8].mxu0 }
 0x667   :  { %v1442_v14 = vadd.f32 %v1441_v7, %v1240_v11  ;;  %v1443_v15 = vpop.f32.mrb[9].mxu0  ;;  %v1492_v11 = vstv %s2085_s10 }
 0x668   :  { %v1444_v17 = vadd.f32 %v1443_v15, %v1244_v13  ;;  %v1445_v16 = vpop.f32.mrb[10].mxu0  ;;  %v1596_v18 = vpop.permute.xlu1 %1595  ;;  %v3294_v13 = vsel %vm1665_vm0, 1.0, %v2437_v21 }
 0x669   :  { %v1446_v47 = vpop.f32.mrb[11].mxu0  ;;  %v1598_v20 = vsel %vm1498_vm1, %v1596_v18, 0.0  ;;  %v1448_v27 = vpack.c.bf16 %v1442_v14, %v1442_v14 }
 0x66a   :  { %v1449_v22 = vpack.c.bf16 %v1444_v17, %v1444_v17  ;;  %1599 = vadd.xlane.f32.xlu0 %v1598_v20 }
 0x66c   :  { %1482 = vmatprep.mubr.bf16.mxu1 %v1449_v22 }
 0x66d   :  { %1483 = vmatmul.mubr.bf16.vlgmr.msra.gmra.mrb[8].mxu1 %v1448_v27 }
 0x66e   :  { %1619 = vmax.xlane.f32.xlu0 %v1618_v29 }
 0x672   :  { %1645 = vmax.xlane.f32.xlu0 %v1644_v10 }
 0x6f7   :  { %v1600_v12 = vpop.xlane.xlu0 %1599 }
 0x6f8   :  { %2371 = vlog2.f32 %v1600_v12 }
 0x6fb   :  { %v1620_v30 = vpop.xlane.xlu0 %1619 }
 0x6fc   :  { %v1621_v24 = vsub.f32 %v2943_v23, %v1620_v30 }
 0x6fe   :  { %v1622_v25 = vmul.f32 1.442695, %v1621_v24 }
 0x6ff   :  { %v1646_v26 = vpop.xlane.xlu0 %1645 }
 0x700   :  { %2373 = vpow2.f32 %v1622_v25  ;;  %v1647_v31 = vsub.f32 %v2943_v23, %v1646_v26 }
 0x702   :  { %v2372_v44 = vpop.eup %2371  ;;  %v1648_v28 = vmul.f32 1.442695, %v1647_v31 }
 0x703   :  { %v1602_v32 = vmul.f32 0.6931472, %v2372_v44 }
 0x704   :  { %2375 = vpow2.f32 %v1648_v28 }
 0x705   :  { %v1603_v34 = vadd.f32 %v1602_v32, %v1590_v57 }
 0x707   :  { %v1614_v35 = vmul.f32 %v3266_v33, %v1603_v34  ;;  %v1615_v46 = vmul.f32 0.0, %v1603_v34 }
 0x709   :  { %v1616_v37 = vadd.f32 %v1614_v35, %v1585_v4  ;;  %v1617_v38 = vadd.f32 %v1615_v46, %v1586_v5 }
 0x70a   :  { %v2374_v39 = vpop.eup %2373 }
 0x70b   :  { %v1624_v40 = vsel %vm1498_vm1, %v2374_v39, 0.0 }
 0x70c   :  { %1625 = vadd.xlane.f32.xlu1 %v1624_v40 }
 0x70e   :  { %v2376_v41 = vpop.eup %2375 }
 0x70f   :  { %1651 = vrot.lane.b32.xlu0 %v2376_v41, %s2436_s28 }
 0x710   :  { %1675 = vmax.xlane.f32.xlu1 %v1674_v42 }
 0x740   :  { %v1484_v43 = vpop.f32.mrb[8].mxu1 }
 0x741   :  { %v1486_v45 = vpop.f32.mrb[9].mxu1  ;;  %v3296_v15 = vmul.f32 %v1492_v11, %v1484_v43 }
 0x742   :  { %v1488_v48 = vpop.f32.mrb[10].mxu1  ;;  %v3304_v29 = vmul.f32 %v1492_v11, %v1486_v45 }
 0x743   :  { %v1489_v49 = vpop.f32.mrb[11].mxu1  ;;  %v1764_v22 = vsel %vm1525_vm2, %v3296_v15, -inf  ;;  %v1784_v27 = vsel %vm1556_vm3, %v3296_v15, -inf  ;;  %v1804_v10 = vsel %vm1587_vm8, %v3296_v15, -inf  ;;  %v1748_v44 = vsel %vm1498_vm1, %v3296_v15, -inf }
 0x744   :  { %v1840_v12 = vsel %vm1525_vm2, %v3304_v29, -inf  ;;  %v1880_v25 = vsel %vm1587_vm8, %v3304_v29, -inf  ;;  %vm1691_vm2 = vcmp.ge.s32.totalorder %v3281_v56, 192 }
 0x781   :  { %v1652_v50 = vpop.permute.xlu0 %1651 }
 0x782   :  { %v1654_v51 = vsel %vm1498_vm1, %v1652_v50, 0.0 }
 0x783   :  { %1655 = vadd.xlane.f32.xlu0 %v1654_v51 }
 0x787   :  { %1705 = vmax.xlane.f32.xlu0 %v1704_v52 }
 0x799   :  { %v1626_v53 = vpop.xlane.xlu1 %1625 }
 0x79a   :  { %2377 = vlog2.f32 %v1626_v53 }
 0x79d   :  { %v3276_v54 = vpop.xlane.xlu1 %1675 }
 0x79e   :  { %v1677_v55 = vsub.f32 %v2943_v23, %v3276_v54 }
 0x7a0   :  { %v1678_v57 = vmul.f32 1.442695, %v1677_v55 }
 0x7a2   :  { %2379 = vpow2.f32 %v1678_v57 }
 0x7a4   :  { %v2378_v58 = vpop.eup %2377 }
 0x7a5   :  { %v1628_v59 = vmul.f32 0.6931472, %v2378_v58 }
 0x7a7   :  { %v1629_v61 = vadd.f32 %v1628_v59, %v1620_v30  ;;  %v1860_v30 = vsel %vm1556_vm3, %v3304_v29, -inf  ;;  %vm1693_vm3 = vcmp.lt.s32.totalorder %v3281_v56, 224 }
 0x7a8   :  { %vm1695_vm4 = vmand %vm1691_vm2, %vm1693_vm3 }
 0x7a9   :  { %v1640_v62 = vmul.f32 0.0, %v1629_v61  ;;  %v1641_v63 = vmul.f32 %v3285_v60, %v1629_v61  ;;  %v3330_v40 = vsel %vm1695_vm4, 1.0, %v2437_v21 }
 0x7ab   :  { %v1642_v1 = vadd.f32 %v1640_v62, %v1616_v37  ;;  %v1643_v2 = vadd.f32 %v1641_v63, %v1617_v38 }
 0x7ac   :  { %v2380_v3 = vpop.eup %2379 }
 0x7ad   :  { %1681 = vrot.lane.b32.xlu0 %v2380_v3, %s2438_s6 }
 0x810   :  { %v1656_v9 = vpop.xlane.xlu0 %1655 }
 0x811   :  { %2381 = vlog2.f32 %v1656_v9 }
 0x814   :  { %v3291_v5 = vpop.xlane.xlu0 %1705 }
 0x815   :  { %v1707_v24 = vsub.f32 %v2943_v23, %v3291_v5 }
 0x81b   :  { %v2382_v4 = vpop.eup %2381 }
 0x81c   :  { %v1658_v6 = vmul.f32 0.6931472, %v2382_v4 }
 0x81e   :  { %v1659_v7 = vadd.f32 %v1658_v6, %v1646_v26  ;;  %v1708_v26 = vmul.f32 1.442695, %v1707_v24 }
 0x81f   :  { %v1682_v14 = vpop.permute.xlu0 %1681 }
 0x820   :  { %v1670_v17 = vmul.f32 0.0, %v1659_v7  ;;  %v1671_v16 = vmul.f32 %v3294_v13, %v1659_v7  ;;  %v1684_v18 = vsel %vm1498_vm1, %v1682_v14, 0.0  ;;  %2383 = vpow2.f32 %v1708_v26 }
 0x821   :  { %1685 = vadd.xlane.f32.xlu1 %v1684_v18 }
 0x822   :  { %v1672_v47 = vadd.f32 %v1670_v17, %v1642_v1  ;;  %v1673_v20 = vadd.f32 %v1671_v16, %v1643_v2  ;;  %v1824_v2 = vsel %vm1498_vm1, %v3304_v29, -inf }
 0x825   :  { %1765 = vmax.xlane.f32.xlu1 %v1764_v22 }
 0x829   :  { %1785 = vmax.xlane.f32.xlu1 %v1784_v27 }
 0x82a   :  { %v2384_v31 = vpop.eup %2383 }
 0x82d   :  { %1805 = vmax.xlane.f32.xlu1 %v1804_v10 }
 0x831   :  { %1841 = vmax.xlane.f32.xlu1 %v1840_v12 }
 0x835   :  { %1861 = vmax.xlane.f32.xlu1 %v1860_v30 }
 0x839   :  { %1881 = vmax.xlane.f32.xlu1 %v1880_v25 }
 0x84a   :  { %1711 = vrot.lane.b32.xlu1 %v2384_v31, %s2439_s9 }
 0x86e   :  { %1749 = vmax.xlane.f32.xlu1 %v1748_v44 }
 0x8ae   :  { %v1686_v28 = vpop.xlane.xlu1 %1685 }
 0x8af   :  { %2385 = vlog2.f32 %v1686_v28 }
 0x8b2   :  { %v3319_v32 = vpop.xlane.xlu1 %1765 }
 0x8b3   :  { %v1767_v3 = vsub.f32 %v3296_v15, %v3319_v32 }
 0x8b5   :  { %v1768_v4 = vmul.f32 1.442695, %v1767_v3 }
 0x8b6   :  { %v3323_v34 = vpop.xlane.xlu1 %1785 }
 0x8b7   :  { %v1787_v35 = vsub.f32 %v3296_v15, %v3323_v34 }
 0x8b9   :  { %v2386_v46 = vpop.eup %2385  ;;  %v1788_v37 = vmul.f32 1.442695, %v1787_v35 }
 0x8ba   :  { %v1688_v38 = vmul.f32 0.6931472, %v2386_v46  ;;  %v3327_v39 = vpop.xlane.xlu1 %1805 }
 0x8bb   :  { %2387 = vpow2.f32 %v1788_v37  ;;  %v1807_v41 = vsub.f32 %v3296_v15, %v3327_v39  ;;  %v3374_v37 = vsel %vm1721_vm5, 1.0, %v2437_v21 }
 0x8bc   :  { %v1689_v42 = vadd.f32 %v1688_v38, %v3276_v54 }
 0x8bd   :  { %v1808_v43 = vmul.f32 1.442695, %v1807_v41 }
 0x8be   :  { %v1700_v45 = vmul.f32 0.0, %v1689_v42  ;;  %v1701_v48 = vmul.f32 %v3330_v40, %v1689_v42  ;;  %v3336_v49 = vpop.xlane.xlu1 %1841 }
 0x8bf   :  { %2389 = vpow2.f32 %v1808_v43  ;;  %v1843_v50 = vsub.f32 %v3304_v29, %v3336_v49 }
 0x8c0   :  { %v3340_v51 = vadd.f32 %v1700_v45, %v1672_v47  ;;  %v3342_v52 = vadd.f32 %v1701_v48, %v1673_v20 }
 0x8c1   :  { %v1844_v53 = vmul.f32 1.442695, %v1843_v50 }
 0x8c2   :  { %v3344_v55 = vpop.xlane.xlu1 %1861 }
 0x8c3   :  { %2391 = vpow2.f32 %v1844_v53  ;;  %v1863_v6 = vsub.f32 %v3304_v29, %v3344_v55 }
 0x8c5   :  { %v2388_v57 = vpop.eup %2387  ;;  %v1864_v11 = vmul.f32 1.442695, %v1863_v6 }
 0x8c6   :  { %1791 = vrot.lane.b32.xlu1 %v2388_v57, %s2438_s6  ;;  %v3347_v54 = vpop.xlane.xlu1 %1881 }
 0x8c7   :  { %v1883_v58 = vsub.f32 %v3304_v29, %v3347_v54 }
 0x8c9   :  { %v2390_v59 = vpop.eup %2389  ;;  %v1884_v61 = vmul.f32 1.442695, %v1883_v58 }
 0x8ca   :  { %1811 = vrot.lane.b32.xlu1 %v2390_v59, %s2439_s9  ;;  %v1712_v62 = vpop.permute.xlu1 %1711 }
 0x8cb   :  { %2393 = vpow2.f32 %v1884_v61  ;;  %v1714_v63 = vsel %vm1498_vm1, %v1712_v62, 0.0 }
 0x8cc   :  { %1715 = vadd.xlane.f32.xlu0 %v1714_v63  ;;  %2395 = vpow2.f32 %v1768_v4 }
 0x8cd   :  { %v2392_v1 = vpop.eup %2391  ;;  %2397 = vpow2.f32 %v1864_v11 }
 0x8ce   :  { %1847 = vrot.lane.b32.xlu1 %v2392_v1, %s2436_s28 }
 0x8d0   :  { %1825 = vmax.xlane.f32.xlu0 %v1824_v2 }
 0x8d5   :  { %v2394_v9 = vpop.eup %2393 }
 0x8d6   :  { %1887 = vrot.lane.b32.xlu1 %v2394_v9, %s2439_s9  ;;  %v2396_v7 = vpop.eup %2395 }
 0x8d7   :  { %v2398_v14 = vpop.eup %2397 }
 0x8e6   :  { %1771 = vrot.lane.b32.xlu0 %v2396_v7, %s2436_s28 }
 0x8ea   :  { %1867 = vrot.lane.b32.xlu0 %v2398_v14, %s2438_s6 }
 0x8fb   :  { %v1750_v17 = vpop.xlane.xlu1 %1749 }
 0x8fc   :  { %v1751_v16 = vsub.f32 %v3296_v15, %v1750_v17 }
 0x8fe   :  { %v1752_v18 = vmul.f32 1.442695, %v1751_v16 }
 0x900   :  { %2399 = vpow2.f32 %v1752_v18 }
 0x90a   :  { %v2400_v47 = vpop.eup %2399 }
 0x90b   :  { %v1754_v20 = vsel %vm1498_vm1, %v2400_v47, 0.0 }
 0x90c   :  { %1755 = vadd.xlane.f32.xlu0 %v1754_v20 }
 0x938   :  { %v1792_v22 = vpop.permute.xlu1 %1791 }
 0x939   :  { %v1794_v27 = vsel %vm1498_vm1, %v1792_v22, 0.0 }
 0x93a   :  { %1795 = vadd.xlane.f32.xlu0 %v1794_v27 }
 0x93c   :  { %v1812_v10 = vpop.permute.xlu1 %1811 }
 0x93d   :  { %v1814_v12 = vsel %vm1498_vm1, %v1812_v10, 0.0 }
 0x93e   :  { %1815 = vadd.xlane.f32.xlu0 %v1814_v12 }
 0x940   :  { %v1848_v28 = vpop.permute.xlu1 %1847 }
 0x941   :  { %v1850_v38 = vsel %vm1498_vm1, %v1848_v28, 0.0 }
 0x948   :  { %v1888_v41 = vpop.permute.xlu1 %1887 }
 0x949   :  { %v1890_v48 = vsel %vm1498_vm1, %v1888_v41, 0.0 }
 0x959   :  { %v1716_v30 = vpop.xlane.xlu0 %1715 }
 0x95a   :  { %2401 = vlog2.f32 %v1716_v30 }
 0x95d   :  { %v3367_v24 = vpop.xlane.xlu0 %1825 }
 0x95e   :  { %v1827_v25 = vsub.f32 %v3304_v29, %v3367_v24 }
 0x960   :  { %v1828_v26 = vmul.f32 1.442695, %v1827_v25 }
 0x961   :  { %v1772_v31 = vpop.permute.xlu0 %1771 }
 0x962   :  { %2403 = vpow2.f32 %v1828_v26  ;;  %v1774_v44 = vsel %vm1498_vm1, %v1772_v31, 0.0 }
 0x963   :  { %1775 = vadd.xlane.f32.xlu1 %v1774_v44 }
 0x964   :  { %v2402_v35 = vpop.eup %2401 }
 0x965   :  { %v1718_v46 = vmul.f32 0.6931472, %v2402_v35  ;;  %v1868_v59 = vpop.permute.xlu0 %1867 }
 0x966   :  { %v1870_v61 = vsel %vm1498_vm1, %v1868_v59, 0.0 }
 0x967   :  { %v1719_v42 = vadd.f32 %v1718_v46, %v3291_v5  ;;  %1851 = vadd.xlane.f32.xlu1 %v1850_v38 }
 0x969   :  { %v1730_v43 = vmul.f32 0.0, %v1719_v42  ;;  %v1731_v45 = vmul.f32 %v3374_v37, %v1719_v42 }
 0x96b   :  { %v1732_v50 = vadd.f32 %v1730_v43, %v3340_v51  ;;  %v1733_v56 = vadd.f32 %v1731_v45, %v3342_v52  ;;  %1891 = vadd.xlane.f32.xlu1 %v1890_v48 }
 0x96c   :  { %v2404_v53 = vpop.eup %2403 }
 0x96d   :  { %v1734_v21 = vsub.f32 %v2937_v19, %v1732_v50  ;;  %v1735_v57 = vsub.f32 %v2943_v23, %v1733_v56  ;;  %v1830_v58 = vsel %vm1498_vm1, %v2404_v53, 0.0 }
 0x96e   :  { %1831 = vadd.xlane.f32.xlu0 %v1830_v58 }
 0x96f   :  { %v1738_v5 = vcombine.low %v1734_v21, %v1735_v57 }
 0x971   :  { %2094 = vst.sshfl [vmem:[%s3425_s16] sm:$0x33 pattern:$0x76325410] %v1738_v5 }
 0x972   :  { %1871 = vadd.xlane.f32.xlu0 %v1870_v61 }
 0x999   :  { %v1756_v51 = vpop.xlane.xlu0 %1755 }
 0x99a   :  { %2405 = vlog2.f32 %v1756_v51 }
 0x9a4   :  { %v2406_v23 = vpop.eup %2405 }
 0x9a5   :  { %v1758_v1 = vmul.f32 0.6931472, %v2406_v23 }
 0x9a7   :  { %v1759_v4 = vadd.f32 %v1758_v1, %v1750_v17 }
 0x9a9   :  { %v1760_v18 = vmul.f32 %v3226_v8, %v1759_v4  ;;  %v1761_v17 = vmul.f32 0.0, %v1759_v4 }
 0x9c7   :  { %v1796_v52 = vpop.xlane.xlu0 %1795 }
 0x9c8   :  { %2407 = vlog2.f32 %v1796_v52 }
 0x9cb   :  { %v1816_v62 = vpop.xlane.xlu0 %1815 }
 0x9d2   :  { %v2408_v2 = vpop.eup %2407 }
 0x9d3   :  { %v1798_v6 = vmul.f32 0.6931472, %v2408_v2 }
 0x9d5   :  { %v1799_v47 = vadd.f32 %v1798_v6, %v3323_v34 }
 0x9d7   :  { %v1800_v26 = vmul.f32 %v3248_v0, %v1799_v47  ;;  %v1801_v28 = vmul.f32 0.0, %v1799_v47 }
 0x9f0   :  { %v1776_v19 = vpop.xlane.xlu1 %1775 }
 0x9f1   :  { %2409 = vlog2.f32 %v1776_v19 }
 0x9f2   :  { %2411 = vlog2.f32 %v1816_v62 }
 0x9f4   :  { %v1852_v63 = vpop.xlane.xlu1 %1851 }
 0x9f5   :  { %2413 = vlog2.f32 %v1852_v63 }
 0x9f8   :  { %v1892_v3 = vpop.xlane.xlu1 %1891 }
 0x9f9   :  { %2415 = vlog2.f32 %v1892_v3 }
 0x9fb   :  { %v2410_v9 = vpop.eup %2409  ;;  %v1832_v11 = vpop.xlane.xlu0 %1831 }
 0x9fc   :  { %v1778_v7 = vmul.f32 0.6931472, %v2410_v9  ;;  %2417 = vlog2.f32 %v1832_v11  ;;  %v2412_v14 = vpop.eup %2411 }
 0x9fd   :  { %v1818_v22 = vmul.f32 0.6931472, %v2412_v14 }
 0x9fe   :  { %v1779_v16 = vadd.f32 %v1778_v7, %v3319_v32 }
 0x9ff   :  { %v1872_v20 = vpop.xlane.xlu0 %1871  ;;  %v2414_v12 = vpop.eup %2413  ;;  %v1819_v31 = vadd.f32 %v1818_v22, %v3327_v39 }
 0xa00   :  { %v1780_v27 = vmul.f32 %v3229_v36, %v1779_v16  ;;  %v1781_v10 = vmul.f32 0.0, %v1779_v16  ;;  %2419 = vlog2.f32 %v1872_v20  ;;  %v1854_v44 = vmul.f32 0.6931472, %v2414_v12 }
 0xa01   :  { %v1820_v38 = vmul.f32 %v3266_v33, %v1819_v31  ;;  %v1821_v41 = vmul.f32 0.0, %v1819_v31 }
 0xa02   :  { %v1782_v30 = vadd.f32 %v1780_v27, %v1760_v18  ;;  %v1783_v25 = vadd.f32 %v1781_v10, %v1761_v17  ;;  %v1855_v36 = vadd.f32 %v1854_v44, %v3336_v49 }
 0xa03   :  { %v2416_v32 = vpop.eup %2415 }
 0xa04   :  { %v1802_v35 = vadd.f32 %v1800_v26, %v1782_v30  ;;  %v1803_v34 = vadd.f32 %v1801_v28, %v1783_v25  ;;  %v1894_v42 = vmul.f32 0.6931472, %v2416_v32  ;;  %v1856_v53 = vmul.f32 0.0, %v1855_v36 }
 0xa05   :  { %v1857_v21 = vmul.f32 %v3294_v13, %v1855_v36 }
 0xa06   :  { %v2418_v8 = vpop.eup %2417  ;;  %v1822_v48 = vadd.f32 %v1820_v38, %v1802_v35  ;;  %v1823_v0 = vadd.f32 %v1821_v41, %v1803_v34  ;;  %v1895_v57 = vadd.f32 %v1894_v42, %v3347_v54 }
 0xa07   :  { %v1834_v46 = vmul.f32 0.6931472, %v2418_v8 }
 0xa08   :  { %v1896_v51 = vmul.f32 0.0, %v1895_v57  ;;  %v1897_v52 = vmul.f32 %v3374_v37, %v1895_v57 }
 0xa09   :  { %v1835_v43 = vadd.f32 %v1834_v46, %v3367_v24 }
 0xa0a   :  { %v2420_v45 = vpop.eup %2419 }
 0xa0b   :  { %v1836_v50 = vmul.f32 0.0, %v1835_v43  ;;  %v1837_v39 = vmul.f32 %v3285_v60, %v1835_v43  ;;  %v1874_v56 = vmul.f32 0.6931472, %v2420_v45 }
 0xa0d   :  { %v1838_v58 = vadd.f32 %v1836_v50, %v1822_v48  ;;  %v1839_v33 = vadd.f32 %v1837_v39, %v1823_v0  ;;  %v1875_v49 = vadd.f32 %v1874_v56, %v3344_v55 }
 0xa0f   :  { %v1858_v59 = vadd.f32 %v1856_v53, %v1838_v58  ;;  %v1859_v5 = vadd.f32 %v1857_v21, %v1839_v33  ;;  %v1876_v61 = vmul.f32 0.0, %v1875_v49  ;;  %v1877_v24 = vmul.f32 %v3330_v40, %v1875_v49 }
 0xa11   :  { %v1878_v62 = vadd.f32 %v1876_v61, %v1858_v59  ;;  %v1879_v60 = vadd.f32 %v1877_v24, %v1859_v5 }
 0xa13   :  { %v1898_v19 = vadd.f32 %v1896_v51, %v1878_v62  ;;  %v1899_v23 = vadd.f32 %v1897_v52, %v1879_v60 }
 0xa15   :  { %v1900_v13 = vsub.f32 %v3296_v15, %v1898_v19  ;;  %v1901_v54 = vsub.f32 %v3304_v29, %v1899_v23 }
 0xa17   :  { %v1904_v63 = vcombine.low %v1900_v13, %v1901_v54 }
 0xa19   :  { %2095 = vst.sshfl [vmem:[%s3426_s17] sm:$0x33 pattern:$0x76325410] %v1904_v63 }
 0xa1a   :  { %1922 = vsyncpa [#allocation3], 1 }

// kernel: forward.3
= control target key start
LH: loop header
LB: loop body
LE: loop exit
PB: predicated region body
PF: predicated region fallthrough
CT: control target
= control target key end

     0   :  { %s2957_s0 = inlined_call_operand.vmem [shape: f32[1,16,8], index: 0, kind: input, shape index: {}]   ;;  %s2958_s1 = inlined_call_operand.vmem [shape: f32[1,2,256], index: 1, kind: input, shape index: {}]   ;;  %s2959_s2 = inlined_call_operand.vmem [shape: bf16[256,256], index: 2, kind: input, shape index: {}]   ;;  %s2960_s3 = inlined_call_operand.vmem [shape: bf16[256,256], index: 3, kind: input, shape index: {}]   ;;  %s2961_s4 = inlined_call_operand.vmem [shape: bf16[256,256], index: 4, kind: input, shape index: {}]   ;;  %s2962_s5 = inlined_call_operand.vmem [shape: bf16[256,256], index: 5, kind: input, shape index: {}]   ;;  %s2963_s6 = inlined_call_operand.vmem [shape: bf16[256,256], index: 6, kind: input, shape index: {}]   ;;  %s2964_s7 = inlined_call_operand.vmem [shape: f32[1,256], index: 7, kind: input, shape index: {}]   ;;  %s2965_s8 = inlined_call_operand.vmem [shape: f32[1,256], index: 8, kind: input, shape index: {}]   ;;  %s2966_s9 = inlined_call_operand.vmem [shape: f32[1,256], index: 9, kind: input, shape index: {}]   ;;  %s2967_s10 = inlined_call_operand.vmem [shape: f32[1,256], index: 10, kind: input, shape index: {}]   ;;  %s2968_s11 = inlined_call_operand.vmem [shape: f32[1,256], index: 11, kind: input, shape index: {}]   ;;  %s2969_s12 = inlined_call_operand.vmem [shape: f32[1,256], index: 12, kind: input, shape index: {}]   ;;  %s2970_s13 = inlined_call_operand.vmem [shape: f32[1,256], index: 13, kind: input, shape index: {}]   ;;  %s2971_s14 = inlined_call_operand.vmem [shape: f32[1,256], index: 14, kind: input, shape index: {}]   ;;  %s2972_s15 = inlined_call_operand.hbm [shape: f32[1,16,256], index: 15, kind: output, shape index: {0}]   ;;  %s2973_s16 = inlined_call_operand.vmem [shape: f32[1,16,1], index: 16, kind: output, shape index: {1}]  }
   0x1   :  { %2975 = sst [smem:[#allocation5_spill]] %s2957_s0 }
   0x2   :  { %v57_v0 = vlaneseq  ;;  %v2246_v1 = vmov 0   ;;  %v1934_v2 = vld [vmem:[%s2959_s2 + $0x4] ss:$8 sps:$4 sm:$0xff]   ;;  %v1936_v3 = vld [vmem:[%s2959_s2] ss:$8 sps:$4 sm:$0xff]   ;;  %v2247_v15 = vmov 0.0  }
   0x3   :  { %121 = vmatprep.mubr.bf16.mxu0 %v2246_v1  ;;  %v1937_v6 = vld [vmem:[%s2959_s2 + $0x14] ss:$8 sps:$4 sm:$0xff]   ;;  %344 = vmatprep.subr.bf16.mxu1 %v1934_v2  ;;  %v1939_v10 = vld [vmem:[%s2959_s2 + $0x10] ss:$8 sps:$4 sm:$0xff]   ;;  %v1940_v11 = vld [vmem:[%s2959_s2 + $0x24] ss:$8 sps:$4 sm:$0xff]  }
   0x4   :  { %v2343_v4 = vand.u32 127, %v57_v0  ;;  %v2345_v5 = vshrl.u32 %v57_v0, 7  ;;  %345 = vmatpush1.bf16.msra.mxu1 %v1936_v3  ;;  %v1942_v13 = vld [vmem:[%s2959_s2 + $0x20] ss:$8 sps:$4 sm:$0xff]   ;;  %v1943_v14 = vld [vmem:[%s2959_s2 + $0x34] ss:$8 sps:$4 sm:$0xff]  }
   0x5   :  { %346 = vmatprep.subr.bf16.mxu1 %v1937_v6  ;;  %vm82_vm5 = vcmask 1043456   ;;  %s2976_s22 = sld [smem:[#allocation5_spill]]  ;;  %v1945_v22 = vld [vmem:[%s2959_s2 + $0x30] ss:$8 sps:$4 sm:$0xff]   ;;  %v1946_v23 = vld [vmem:[%s2959_s2 + $0x44] ss:$8 sps:$4 sm:$0xff]  }
   0x6   :  { %v2351_v7 = vadd.s32 128, %v2343_v4  ;;  %v62_v8 = vmul.u32 32, %v2345_v5  ;;  %v65_v9 = vadd.s32 1, %v2345_v5  ;;  %vm78_vm7 = vcmask 64512   ;;  %v1948_v26 = vld [vmem:[%s2959_s2 + $0x40] ss:$8 sps:$4 sm:$0xff]  }
   0x7   :  { %v1949_v27 = vld [vmem:[%s2959_s2 + $0x54] ss:$8 sps:$4 sm:$0xff]   ;;  %v1951_v28 = vld [vmem:[%s2959_s2 + $0x50] ss:$8 sps:$4 sm:$0xff]   ;;  %v1952_v29 = vld [vmem:[%s2959_s2 + $0x64] ss:$8 sps:$4 sm:$0xff]  }
   0x8   :  { %vm64_vm0 = vcmp.ge.s32.totalorder %v2351_v7, %v62_v8  ;;  %v66_v12 = vmul.u32 32, %v65_v9  ;;  %vm63_vm1 = vcmp.ge.s32.totalorder %v2343_v4, %v62_v8  ;;  %347 = vmatpush1.bf16.msra.mxu1 %v1939_v10  ;;  %v1954_v30 = vld [vmem:[%s2959_s2 + $0x60] ss:$8 sps:$4 sm:$0xff]   ;;  %v1955_v31 = vld [vmem:[%s2959_s2 + $0x74] ss:$8 sps:$4 sm:$0xff]  }
   0x9   :  { %348 = vmatprep.subr.bf16.mxu1 %v1940_v11  ;;  %v1957_v32 = vld [vmem:[%s2959_s2 + $0x70] ss:$8 sps:$4 sm:$0xff]   ;;  %v1958_v33 = vld [vmem:[%s2959_s2 + $0x84] ss:$8 sps:$4 sm:$0xff]   ;;  %v1960_v34 = vld [vmem:[%s2959_s2 + $0x80] ss:$8 sps:$4 sm:$0xff]  }
   0xa   :  { %vm68_vm2 = vcmp.lt.s32.totalorder %v2351_v7, %v66_v12  ;;  %vm67_vm3 = vcmp.lt.s32.totalorder %v2343_v4, %v66_v12  ;;  %v1961_v35 = vld [vmem:[%s2959_s2 + $0x94] ss:$8 sps:$4 sm:$0xff]   ;;  %v1963_v36 = vld [vmem:[%s2959_s2 + $0x90] ss:$8 sps:$4 sm:$0xff]   ;;  %v1964_v37 = vld [vmem:[%s2959_s2 + $0xa4] ss:$8 sps:$4 sm:$0xff]  }
   0xb   :  { %vm70_vm4 = vmand %vm64_vm0, %vm68_vm2  ;;  %v54_v17 = vld [vmem:[%s2976_s22] sm:$0xff]  ;;  %v55_v20 = vld [vmem:[%s2976_s22 + $0x8] sm:$0xff] }
   0xc   :  { %v1749_v16 = vsel %vm70_vm4, 1.0, %v2247_v15  ;;  %vm69_vm6 = vmand %vm63_vm1, %vm67_vm3  ;;  %349 = vmatpush1.bf16.msra.mxu1 %v1942_v13  ;;  %v77_v25 = vpack.c.bf16 %v55_v20, %v54_v17  ;;  %v1966_v38 = vld [vmem:[%s2959_s2 + $0xa0] ss:$8 sps:$4 sm:$0xff]   ;;  %v1967_v39 = vld [vmem:[%s2959_s2 + $0xb4] ss:$8 sps:$4 sm:$0xff]  }
   0xd   :  { %v76_v18 = vpack.c.bf16 %v1749_v16, %v1749_v16  ;;  %v1748_v19 = vsel %vm69_vm6, 1.0, %v2247_v15  ;;  %350 = vmatprep.subr.bf16.mxu1 %v1943_v14  ;;  %v1969_v40 = vld [vmem:[%s2959_s2 + $0xb0] ss:$8 sps:$4 sm:$0xff]   ;;  %v1970_v41 = vld [vmem:[%s2959_s2 + $0xc4] ss:$8 sps:$4 sm:$0xff]  }
   0xe   :  { %v75_v21 = vpack.c.bf16 %v1748_v19, %v1748_v19  ;;  %v1972_v42 = vld [vmem:[%s2959_s2 + $0xc0] ss:$8 sps:$4 sm:$0xff]   ;;  %v1973_v43 = vld [vmem:[%s2959_s2 + $0xd4] ss:$8 sps:$4 sm:$0xff]  }
   0xf   :  { %1750 = vmatprep.subr.msk.bf16.mxu0 %vm82_vm5, %v76_v18 }
  0x10   :  { %v84_v24 = vsel %vm82_vm5, %v75_v21, 0  ;;  %351 = vmatpush1.bf16.msra.mxu1 %v1945_v22 }
  0x11   :  { %90 = vmatpush1.bf16.msra.mxu0 %v84_v24  ;;  %352 = vmatprep.subr.bf16.mxu1 %v1946_v23 }
  0x14   :  { %1751 = vmatmul.mubr.msk.bf16.vlgmr.msra.gmra.mrb[0].mxu0 %vm78_vm7, %v77_v25  ;;  %353 = vmatpush1.bf16.msra.mxu1 %v1948_v26 }
  0x15   :  { %354 = vmatprep.subr.bf16.mxu1 %v1949_v27 }
  0x18   :  { %355 = vmatpush1.bf16.msra.mxu1 %v1951_v28 }
  0x19   :  { %356 = vmatprep.subr.bf16.mxu1 %v1952_v29 }
  0x1c   :  { %357 = vmatpush1.bf16.msra.mxu1 %v1954_v30 }
  0x1d   :  { %358 = vmatprep.subr.bf16.mxu1 %v1955_v31 }
  0x20   :  { %359 = vmatpush1.bf16.msra.mxu1 %v1957_v32 }
  0x21   :  { %360 = vmatprep.subr.bf16.mxu1 %v1958_v33 }
  0x24   :  { %361 = vmatpush1.bf16.msra.mxu1 %v1960_v34 }
  0x25   :  { %362 = vmatprep.subr.bf16.mxu1 %v1961_v35 }
  0x28   :  { %363 = vmatpush1.bf16.msra.mxu1 %v1963_v36 }
  0x29   :  { %364 = vmatprep.subr.bf16.mxu1 %v1964_v37 }
  0x2c   :  { %365 = vmatpush1.bf16.msra.mxu1 %v1966_v38 }
  0x2d   :  { %366 = vmatprep.subr.bf16.mxu1 %v1967_v39 }
  0x30   :  { %367 = vmatpush1.bf16.msra.mxu1 %v1969_v40 }
  0x31   :  { %368 = vmatprep.subr.bf16.mxu1 %v1970_v41 }
  0x34   :  { %369 = vmatpush1.bf16.msra.mxu1 %v1972_v42 }
  0x35   :  { %370 = vmatprep.subr.bf16.mxu1 %v1973_v43 }
  0x36   :  { %22 = vsyncpa [#allocation3], 0  ;;  %v1975_v44 = vld [vmem:[%s2959_s2 + $0xd0] ss:$8 sps:$4 sm:$0xff]   ;;  %v1976_v45 = vld [vmem:[%s2959_s2 + $0xe4] ss:$8 sps:$4 sm:$0xff]  }
  0x37   :  { %v1978_v46 = vld [vmem:[%s2959_s2 + $0xe0] ss:$8 sps:$4 sm:$0xff]   ;;  %v1979_v47 = vld [vmem:[%s2959_s2 + $0xf4] ss:$8 sps:$4 sm:$0xff]   ;;  %v1981_v48 = vld [vmem:[%s2959_s2 + $0xf0] ss:$8 sps:$4 sm:$0xff]  }
  0x38   :  { %371 = vmatpush1.bf16.msra.mxu1 %v1975_v44  ;;  %v1982_v49 = vld [vmem:[%s2960_s3] ss:$8 sps:$4 sm:$0xff]   ;;  %v1984_v50 = vld [vmem:[%s2960_s3 + $0x4] ss:$8 sps:$4 sm:$0xff]   ;;  %v1987_v51 = vld [vmem:[%s2960_s3 + $0x14] ss:$8 sps:$4 sm:$0xff]  }
  0x39   :  { %372 = vmatprep.subr.bf16.mxu1 %v1976_v45  ;;  %593 = vmatprep.subr.bf16.mxu0 %v1984_v50  ;;  %v1985_v52 = vld [vmem:[%s2960_s3 + $0x10] ss:$8 sps:$4 sm:$0xff]   ;;  %v1990_v53 = vld [vmem:[%s2960_s3 + $0x24] ss:$8 sps:$4 sm:$0xff]   ;;  %v1988_v54 = vld [vmem:[%s2960_s3 + $0x20] ss:$8 sps:$4 sm:$0xff]  }
  0x3a   :  { %594 = vmatpush1.bf16.msra.mxu0 %v1982_v49  ;;  %v1993_v55 = vld [vmem:[%s2960_s3 + $0x34] ss:$8 sps:$4 sm:$0xff]   ;;  %v1991_v56 = vld [vmem:[%s2960_s3 + $0x30] ss:$8 sps:$4 sm:$0xff]   ;;  %v1996_v57 = vld [vmem:[%s2960_s3 + $0x44] ss:$8 sps:$4 sm:$0xff]  }
  0x3b   :  { %595 = vmatprep.subr.bf16.mxu0 %v1987_v51  ;;  %v1994_v58 = vld [vmem:[%s2960_s3 + $0x40] ss:$8 sps:$4 sm:$0xff]   ;;  %v1999_v59 = vld [vmem:[%s2960_s3 + $0x54] ss:$8 sps:$4 sm:$0xff]   ;;  %v1997_v60 = vld [vmem:[%s2960_s3 + $0x50] ss:$8 sps:$4 sm:$0xff]  }
  0x3c   :  { %373 = vmatpush1.bf16.msra.mxu1 %v1978_v46  ;;  %v2002_v61 = vld [vmem:[%s2960_s3 + $0x64] ss:$8 sps:$4 sm:$0xff]   ;;  %v2000_v62 = vld [vmem:[%s2960_s3 + $0x60] ss:$8 sps:$4 sm:$0xff]   ;;  %v2005_v63 = vld [vmem:[%s2960_s3 + $0x74] ss:$8 sps:$4 sm:$0xff]  }
  0x3d   :  { %374 = vmatprep.subr.bf16.mxu1 %v1979_v47  ;;  %v2003_v0 = vld [vmem:[%s2960_s3 + $0x70] ss:$8 sps:$4 sm:$0xff]   ;;  %v2008_v1 = vld [vmem:[%s2960_s3 + $0x84] ss:$8 sps:$4 sm:$0xff]   ;;  %v2006_v2 = vld [vmem:[%s2960_s3 + $0x80] ss:$8 sps:$4 sm:$0xff]  }
  0x3e   :  { %596 = vmatpush1.bf16.msra.mxu0 %v1985_v52  ;;  %v2011_v3 = vld [vmem:[%s2960_s3 + $0x94] ss:$8 sps:$4 sm:$0xff]   ;;  %v2009_v6 = vld [vmem:[%s2960_s3 + $0x90] ss:$8 sps:$4 sm:$0xff]   ;;  %v2014_v8 = vld [vmem:[%s2960_s3 + $0xa4] ss:$8 sps:$4 sm:$0xff]  }
  0x3f   :  { %597 = vmatprep.subr.bf16.mxu0 %v1990_v53  ;;  %v2012_v9 = vld [vmem:[%s2960_s3 + $0xa0] ss:$8 sps:$4 sm:$0xff]   ;;  %v2017_v10 = vld [vmem:[%s2960_s3 + $0xb4] ss:$8 sps:$4 sm:$0xff]   ;;  %v2015_v11 = vld [vmem:[%s2960_s3 + $0xb0] ss:$8 sps:$4 sm:$0xff]  }
  0x40   :  { %375 = vmatpush1.bf16.msra.mxu1 %v1981_v48  ;;  %v2020_v12 = vld [vmem:[%s2960_s3 + $0xc4] ss:$8 sps:$4 sm:$0xff]   ;;  %v2018_v13 = vld [vmem:[%s2960_s3 + $0xc0] ss:$8 sps:$4 sm:$0xff]   ;;  %v2023_v14 = vld [vmem:[%s2960_s3 + $0xd4] ss:$8 sps:$4 sm:$0xff]  }
  0x41   :  { %v2021_v15 = vld [vmem:[%s2960_s3 + $0xd0] ss:$8 sps:$4 sm:$0xff]   ;;  %v2026_v16 = vld [vmem:[%s2960_s3 + $0xe4] ss:$8 sps:$4 sm:$0xff]   ;;  %v2024_v17 = vld [vmem:[%s2960_s3 + $0xe0] ss:$8 sps:$4 sm:$0xff]  }
  0x42   :  { %598 = vmatpush1.bf16.msra.mxu0 %v1988_v54  ;;  %v136_v24 = vand.u32 31, %v2343_v4  ;;  %v137_v29 = vand.u32 31, %v2351_v7  ;;  %v2248_v32 = vmov 1.0|1.0   ;;  %v2029_v4 = vld [vmem:[%s2960_s3 + $0xf4] ss:$8 sps:$4 sm:$0xff]  }
  0x43   :  { %599 = vmatprep.subr.bf16.mxu0 %v1993_v55  ;;  %v2027_v33 = vld [vmem:[%s2960_s3 + $0xf0] ss:$8 sps:$4 sm:$0xff]   ;;  %v2551_v39 = vsub.s32 0, %v2345_v5  ;;  %v2554_v40 = vsub.s32 1, %v2345_v5  ;;  %v421_v41 = vld [vmem:[%s2964_s7] sm:$0x3] }
  0x45   :  { %v426_v42 = vrot.slane %v421_v41, %v2551_v39  ;;  %v430_v43 = vrot.slane %v421_v41, %v2554_v40 }
  0x46   :  { %600 = vmatpush1.bf16.msra.mxu0 %v1991_v56 }
  0x47   :  { %601 = vmatprep.subr.bf16.mxu0 %v1996_v57 }
  0x4a   :  { %602 = vmatpush1.bf16.msra.mxu0 %v1994_v58 }
  0x4b   :  { %603 = vmatprep.subr.bf16.mxu0 %v1999_v59 }
  0x4e   :  { %604 = vmatpush1.bf16.msra.mxu0 %v1997_v60 }
  0x4f   :  { %605 = vmatprep.subr.bf16.mxu0 %v2002_v61 }
  0x52   :  { %606 = vmatpush1.bf16.msra.mxu0 %v2000_v62 }
  0x53   :  { %607 = vmatprep.subr.bf16.mxu0 %v2005_v63 }
  0x56   :  { %608 = vmatpush1.bf16.msra.mxu0 %v2003_v0 }
  0x57   :  { %609 = vmatprep.subr.bf16.mxu0 %v2008_v1 }
  0x5a   :  { %610 = vmatpush1.bf16.msra.mxu0 %v2006_v2 }
  0x5b   :  { %611 = vmatprep.subr.bf16.mxu0 %v2011_v3 }
  0x5e   :  { %612 = vmatpush1.bf16.msra.mxu0 %v2009_v6 }
  0x5f   :  { %613 = vmatprep.subr.bf16.mxu0 %v2014_v8 }
  0x62   :  { %614 = vmatpush1.bf16.msra.mxu0 %v2012_v9 }
  0x63   :  { %615 = vmatprep.subr.bf16.mxu0 %v2017_v10 }
  0x66   :  { %616 = vmatpush1.bf16.msra.mxu0 %v2015_v11 }
  0x67   :  { %617 = vmatprep.subr.bf16.mxu0 %v2020_v12 }
  0x6a   :  { %618 = vmatpush1.bf16.msra.mxu0 %v2018_v13  ;;  %v2030_v13 = vld [vmem:[%s2961_s4] ss:$8 sps:$4 sm:$0xff]  }
  0x6b   :  { %619 = vmatprep.subr.bf16.mxu0 %v2023_v14  ;;  %v2032_v14 = vld [vmem:[%s2961_s4 + $0x4] ss:$8 sps:$4 sm:$0xff]  }
  0x6c   :  { %928 = vmatprep.subr.bf16.mxu1 %v2032_v14 }
  0x6e   :  { %620 = vmatpush1.bf16.msra.mxu0 %v2021_v15  ;;  %v2035_v15 = vld [vmem:[%s2961_s4 + $0x14] ss:$8 sps:$4 sm:$0xff]  }
  0x6f   :  { %621 = vmatprep.subr.bf16.mxu0 %v2026_v16  ;;  %v2033_v16 = vld [vmem:[%s2961_s4 + $0x10] ss:$8 sps:$4 sm:$0xff]  }
  0x72   :  { %622 = vmatpush1.bf16.msra.mxu0 %v2024_v17  ;;  %v2038_v17 = vld [vmem:[%s2961_s4 + $0x24] ss:$8 sps:$4 sm:$0xff]  }
  0x73   :  { %623 = vmatprep.subr.bf16.mxu0 %v2029_v4 }
  0x76   :  { %624 = vmatpush1.bf16.msra.mxu0 %v2027_v33 }
  0xe7   :  { %v123_v18 = vpop.f32.mrb[0].mxu0 }
  0xe8   :  { %v1920_v19 = vtrunc.f32 %v123_v18  ;;  %v125_v20 = vpop.f32.mrb[1].mxu0  ;;  %v2036_v18 = vld [vmem:[%s2961_s4 + $0x20] ss:$8 sps:$4 sm:$0xff]  }
  0xe9   :  { %v1922_v21 = vtrunc.f32 %v125_v20  ;;  %v127_v22 = vpop.f32.mrb[2].mxu0  ;;  %v2039_v20 = vld [vmem:[%s2961_s4 + $0x30] ss:$8 sps:$4 sm:$0xff]  }
  0xea   :  { %v1921_v23 = vcvt.f32.s32 %v1920_v19  ;;  %v1924_v25 = vtrunc.f32 %v127_v22  ;;  %v129_v26 = vpop.f32.mrb[3].mxu0  ;;  %v2041_v19 = vld [vmem:[%s2961_s4 + $0x34] ss:$8 sps:$4 sm:$0xff]   ;;  %v2042_v22 = vld [vmem:[%s2961_s4 + $0x40] ss:$8 sps:$4 sm:$0xff]  }
  0xeb   :  { %v1923_v27 = vcvt.f32.s32 %v1922_v21  ;;  %v1926_v28 = vtrunc.f32 %v129_v26  ;;  %v2044_v21 = vld [vmem:[%s2961_s4 + $0x44] ss:$8 sps:$4 sm:$0xff]   ;;  %v2048_v26 = vld [vmem:[%s2961_s4 + $0x60] ss:$8 sps:$4 sm:$0xff]  }
  0xec   :  { %v1925_v30 = vcvt.f32.s32 %v1924_v25  ;;  %vm138_vm8 = vcmp.eq.s32.totalorder %v1921_v23, %v136_v24  ;;  %v2047_v23 = vld [vmem:[%s2961_s4 + $0x54] ss:$8 sps:$4 sm:$0xff]   ;;  %v2050_v25 = vld [vmem:[%s2961_s4 + $0x64] ss:$8 sps:$4 sm:$0xff]  }
  0xed   :  { %v1927_v31 = vcvt.f32.s32 %v1926_v28  ;;  %vm139_vm10 = vcmp.eq.s32.totalorder %v1923_v27, %v137_v29  ;;  %v2053_v27 = vld [vmem:[%s2961_s4 + $0x74] ss:$8 sps:$4 sm:$0xff]   ;;  %v2051_v28 = vld [vmem:[%s2961_s4 + $0x70] ss:$8 sps:$4 sm:$0xff]  }
  0xee   :  { %vm140_vm9 = vcmp.eq.s32.totalorder %v1925_v30, %v136_v24  ;;  %v2045_v24 = vld [vmem:[%s2961_s4 + $0x50] ss:$8 sps:$4 sm:$0xff]   ;;  %v2054_v30 = vld [vmem:[%s2961_s4 + $0x80] ss:$8 sps:$4 sm:$0xff]  }
  0xef   :  { %vm141_vm11 = vcmp.eq.s32.totalorder %v1927_v31, %v137_v29  ;;  %vm1790_vm12 = vmpackc.low %vm140_vm9, %vm138_vm8  ;;  %v2056_v29 = vld [vmem:[%s2961_s4 + $0x84] ss:$8 sps:$4 sm:$0xff]  }
  0xf0   :  { %vm1788_vm13 = vmpackc.low %vm141_vm11, %vm139_vm10 }
  0xf1   :  { %1789 = vmatprep.mubr.msk.bf16.mxu1 %vm1788_vm13, %v2248_v32 }
  0xf2   :  { %1791 = vmatmul.mubr.msk.bf16.vlgmr.msra.gmra.mrb[0].mxu1 %vm1790_vm12, %v2248_v32 }
  0xf3   :  { %929 = vmatpush1.bf16.msra.mxu1 %v2030_v13 }
  0xf4   :  { %930 = vmatprep.subr.bf16.mxu1 %v2035_v15 }
  0xf7   :  { %931 = vmatpush1.bf16.msra.mxu1 %v2033_v16 }
  0xf8   :  { %932 = vmatprep.subr.bf16.mxu1 %v2038_v17 }
  0xfb   :  { %933 = vmatpush1.bf16.msra.mxu1 %v2036_v18 }
  0xfc   :  { %934 = vmatprep.subr.bf16.mxu1 %v2041_v19 }
  0xff   :  { %935 = vmatpush1.bf16.msra.mxu1 %v2039_v20 }
 0x100   :  { %936 = vmatprep.subr.bf16.mxu1 %v2044_v21 }
 0x103   :  { %937 = vmatpush1.bf16.msra.mxu1 %v2042_v22 }
 0x104   :  { %938 = vmatprep.subr.bf16.mxu1 %v2047_v23 }
 0x107   :  { %939 = vmatpush1.bf16.msra.mxu1 %v2045_v24 }
 0x108   :  { %940 = vmatprep.subr.bf16.mxu1 %v2050_v25 }
 0x10b   :  { %941 = vmatpush1.bf16.msra.mxu1 %v2048_v26  ;;  %v756_v26 = vld [vmem:[%s2965_s8] sm:$0x3] }
 0x10c   :  { %942 = vmatprep.subr.bf16.mxu1 %v2053_v27  ;;  %v761_v27 = vrot.slane %v756_v26, %v2551_v39 }
 0x10f   :  { %943 = vmatpush1.bf16.msra.mxu1 %v2051_v28  ;;  %v765_v28 = vrot.slane %v756_v26, %v2554_v40 }
 0x110   :  { %944 = vmatprep.subr.bf16.mxu1 %v2056_v29 }
 0x113   :  { %945 = vmatpush1.bf16.msra.mxu1 %v2054_v30 }
 0x1c5   :  { %v378_v7 = vpop.f32.mrb[0].mxu1 }
 0x1c6   :  { %v380_v34 = vpop.f32.mrb[1].mxu1 }
 0x1c7   :  { %v382_v35 = vpop.f32.mrb[2].mxu1 }
 0x1c8   :  { %v419_v36 = vpack.c.bf16 %v382_v35, %v378_v7  ;;  %v384_v37 = vpop.f32.mrb[3].mxu1 }
 0x1c9   :  { %v420_v38 = vpack.c.bf16 %v384_v37, %v380_v34 }
 0x1cb   :  { %625 = vmatprep.mubr.bf16.mxu0 %v420_v38 }
 0x1cc   :  { %626 = vmatmul.mubr.bf16.vlgmr.msra.gmra.mrb[4].mxu0 %v419_v36 }
 0x29f   :  { %v627_v44 = vpop.f32.mrb[4].mxu0 }
 0x2a0   :  { %v628_v45 = vadd.f32 %v627_v44, %v426_v42  ;;  %v629_v46 = vpop.f32.mrb[5].mxu0 }
 0x2a1   :  { %v630_v47 = vadd.f32 %v629_v46, %v430_v43  ;;  %v631_v48 = vpop.f32.mrb[6].mxu0  ;;  %v2057_v46 = vld [vmem:[%s2961_s4 + $0x90] ss:$8 sps:$4 sm:$0xff]  }
 0x2a2   :  { %v641_v49 = vmul.f32 0.70710677, %v628_v45  ;;  %v632_v50 = vadd.f32 %v631_v48, %v426_v42  ;;  %v633_v51 = vpop.f32.mrb[7].mxu0  ;;  %v636_v58 = vmul.f32 0.5, %v628_v45  ;;  %v2059_v45 = vld [vmem:[%s2961_s4 + $0x94] ss:$8 sps:$4 sm:$0xff]  }
 0x2a3   :  { %v642_v52 = vmul.f32 0.70710677, %v630_v47  ;;  %v634_v53 = vadd.f32 %v633_v51, %v430_v43  ;;  %v637_v61 = vmul.f32 0.5, %v630_v47  ;;  %946 = vmatprep.subr.bf16.mxu1 %v2059_v45  ;;  %v2062_v47 = vld [vmem:[%s2961_s4 + $0xa4] ss:$8 sps:$4 sm:$0xff]  }
 0x2a4   :  { %2174 = verf.f32 %v641_v49  ;;  %v643_v54 = vmul.f32 0.70710677, %v632_v50  ;;  %v638_v2 = vmul.f32 0.5, %v632_v50  ;;  %947 = vmatpush1.bf16.msra.mxu1 %v2057_v46  ;;  %v2060_v48 = vld [vmem:[%s2961_s4 + $0xa0] ss:$8 sps:$4 sm:$0xff]  }
 0x2a5   :  { %2176 = verf.f32 %v642_v52  ;;  %v644_v55 = vmul.f32 0.70710677, %v634_v53  ;;  %v639_v3 = vmul.f32 0.5, %v634_v53  ;;  %948 = vmatprep.subr.bf16.mxu1 %v2062_v47  ;;  %v2065_v49 = vld [vmem:[%s2961_s4 + $0xb4] ss:$8 sps:$4 sm:$0xff]  }
 0x2a6   :  { %2178 = verf.f32 %v643_v54  ;;  %v2063_v50 = vld [vmem:[%s2961_s4 + $0xb0] ss:$8 sps:$4 sm:$0xff]   ;;  %v2068_v51 = vld [vmem:[%s2961_s4 + $0xc4] ss:$8 sps:$4 sm:$0xff]   ;;  %v2066_v52 = vld [vmem:[%s2961_s4 + $0xc0] ss:$8 sps:$4 sm:$0xff]  }
 0x2a7   :  { %2180 = verf.f32 %v644_v55  ;;  %v2071_v53 = vld [vmem:[%s2961_s4 + $0xd4] ss:$8 sps:$4 sm:$0xff]   ;;  %v2069_v54 = vld [vmem:[%s2961_s4 + $0xd0] ss:$8 sps:$4 sm:$0xff]   ;;  %v2074_v55 = vld [vmem:[%s2961_s4 + $0xe4] ss:$8 sps:$4 sm:$0xff]  }
 0x2a8   :  { %949 = vmatpush1.bf16.msra.mxu1 %v2060_v48 }
 0x2a9   :  { %950 = vmatprep.subr.bf16.mxu1 %v2065_v49 }
 0x2ac   :  { %951 = vmatpush1.bf16.msra.mxu1 %v2063_v50 }
 0x2ad   :  { %952 = vmatprep.subr.bf16.mxu1 %v2068_v51 }
 0x2ae   :  { %v2175_v56 = vpop.eup %2174 }
 0x2af   :  { %v2177_v57 = vpop.eup %2176  ;;  %v649_v59 = vadd.f32 1.0, %v2175_v56  ;;  %v2072_v56 = vld [vmem:[%s2961_s4 + $0xe0] ss:$8 sps:$4 sm:$0xff]  }
 0x2b0   :  { %v2179_v60 = vpop.eup %2178  ;;  %v650_v62 = vadd.f32 1.0, %v2177_v57  ;;  %953 = vmatpush1.bf16.msra.mxu1 %v2066_v52  ;;  %v2077_v57 = vld [vmem:[%s2961_s4 + $0xf4] ss:$8 sps:$4 sm:$0xff]  }
 0x2b1   :  { %v2181_v63 = vpop.eup %2180  ;;  %v653_v0 = vmul.f32 %v649_v59, %v636_v58  ;;  %v651_v1 = vadd.f32 1.0, %v2179_v60  ;;  %954 = vmatprep.subr.bf16.mxu1 %v2071_v53  ;;  %v2075_v58 = vld [vmem:[%s2961_s4 + $0xf0] ss:$8 sps:$4 sm:$0xff]  }
 0x2b2   :  { %v654_v6 = vmul.f32 %v650_v62, %v637_v61  ;;  %v652_v8 = vadd.f32 1.0, %v2181_v63 }
 0x2b3   :  { %v655_v10 = vmul.f32 %v651_v1, %v638_v2  ;;  %v690_v1 = vld [vmem:[%s2968_s11] sm:$0x3] }
 0x2b4   :  { %v657_v9 = vadd.f32 %v654_v6, %v653_v0  ;;  %v656_v11 = vmul.f32 %v652_v8, %v639_v3  ;;  %955 = vmatpush1.bf16.msra.mxu1 %v2069_v54  ;;  %v695_v8 = vrot.slane %v690_v1, %v2551_v39 }
 0x2b5   :  { %956 = vmatprep.subr.bf16.mxu1 %v2074_v55 }
 0x2b6   :  { %658 = vadd.xlane.f32.xlu0 %v657_v9  ;;  %v660_v12 = vadd.f32 %v656_v11, %v655_v10  ;;  %v699_v9 = vrot.slane %v690_v1, %v2554_v40  ;;  %v2089_v1 = vld [vmem:[%s2962_s5 + $0x34] ss:$8 sps:$4 sm:$0xff]  }
 0x2b8   :  { %957 = vmatpush1.bf16.msra.mxu1 %v2072_v56 }
 0x2b9   :  { %958 = vmatprep.subr.bf16.mxu1 %v2077_v57 }
 0x2ba   :  { %661 = vadd.xlane.f32.xlu0 %v660_v12 }
 0x2bc   :  { %959 = vmatpush1.bf16.msra.mxu1 %v2075_v58 }
 0x343   :  { %v659_v31 = vpop.xlane.xlu0 %658 }
 0x344   :  { %v664_v32 = vmul.f32 0.00390625, %v659_v31 }
 0x346   :  { %v666_v4 = vsub.f32 %v653_v0, %v664_v32  ;;  %v667_v33 = vsub.f32 %v654_v6, %v664_v32 }
 0x347   :  { %v662_v7 = vpop.xlane.xlu0 %661 }
 0x348   :  { %v665_v34 = vmul.f32 0.00390625, %v662_v7  ;;  %v670_v35 = vmul.f32 %v666_v4, %v666_v4  ;;  %v671_v36 = vmul.f32 %v667_v33, %v667_v33 }
 0x34a   :  { %v668_v37 = vsub.f32 %v655_v10, %v665_v34  ;;  %v669_v38 = vsub.f32 %v656_v11, %v665_v34  ;;  %v674_v41 = vadd.f32 %v671_v36, %v670_v35  ;;  %v706_v10 = vld [vmem:[%s2970_s13] sm:$0x3] }
 0x34b   :  { %v711_v12 = vrot.slane %v706_v10, %v2551_v39  ;;  %v715_v13 = vrot.slane %v706_v10, %v2554_v40  ;;  %v2098_v10 = vld [vmem:[%s2962_s5 + $0x64] ss:$8 sps:$4 sm:$0xff]  }
 0x34c   :  { %675 = vadd.xlane.f32.xlu1 %v674_v41  ;;  %v672_v42 = vmul.f32 %v668_v37, %v668_v37  ;;  %v673_v43 = vmul.f32 %v669_v38, %v669_v38 }
 0x34e   :  { %v677_v44 = vadd.f32 %v673_v43, %v672_v42 }
 0x350   :  { %678 = vadd.xlane.f32.xlu1 %v677_v44 }
 0x3d9   :  { %v676_v59 = vpop.xlane.xlu1 %675 }
 0x3da   :  { %v680_v60 = vmul.f32 0.00390625, %v676_v59  ;;  %v2078_v59 = vld [vmem:[%s2962_s5] ss:$8 sps:$4 sm:$0xff]  }
 0x3dc   :  { %v682_v61 = vadd.f32 1e-05, %v680_v60  ;;  %v2080_v60 = vld [vmem:[%s2962_s5 + $0x4] ss:$8 sps:$4 sm:$0xff]  }
 0x3dd   :  { %v679_v62 = vpop.xlane.xlu1 %678  ;;  %1261 = vmatprep.subr.bf16.mxu0 %v2080_v60  ;;  %v2152_v60 = vld [vmem:[%s2963_s6 + $0x84] ss:$8 sps:$4 sm:$0xff]  }
 0x3de   :  { %2182 = vrsqrt.f32 %v682_v61  ;;  %v681_v63 = vmul.f32 0.00390625, %v679_v62  ;;  %v2083_v61 = vld [vmem:[%s2962_s5 + $0x14] ss:$8 sps:$4 sm:$0xff]   ;;  %1262 = vmatpush1.bf16.msra.mxu0 %v2078_v59  ;;  %v2081_v62 = vld [vmem:[%s2962_s5 + $0x10] ss:$8 sps:$4 sm:$0xff]  }
 0x3df   :  { %1263 = vmatprep.subr.bf16.mxu0 %v2083_v61  ;;  %v2147_v59 = vld [vmem:[%s2963_s6 + $0x70] ss:$8 sps:$4 sm:$0xff]   ;;  %v2150_v61 = vld [vmem:[%s2963_s6 + $0x80] ss:$8 sps:$4 sm:$0xff]  }
 0x3e0   :  { %v683_v0 = vadd.f32 1e-05, %v681_v63  ;;  %v2086_v63 = vld [vmem:[%s2962_s5 + $0x24] ss:$8 sps:$4 sm:$0xff]  }
 0x3e2   :  { %2184 = vrsqrt.f32 %v683_v0  ;;  %1264 = vmatpush1.bf16.msra.mxu0 %v2081_v62  ;;  %v2084_v0 = vld [vmem:[%s2962_s5 + $0x20] ss:$8 sps:$4 sm:$0xff]   ;;  %v2155_v62 = vld [vmem:[%s2963_s6 + $0x94] ss:$8 sps:$4 sm:$0xff]  }
 0x3e3   :  { %1265 = vmatprep.subr.bf16.mxu0 %v2086_v63  ;;  %v2153_v63 = vld [vmem:[%s2963_s6 + $0x90] ss:$8 sps:$4 sm:$0xff]  }
 0x3e6   :  { %1266 = vmatpush1.bf16.msra.mxu0 %v2084_v0 }
 0x3e7   :  { %1267 = vmatprep.subr.bf16.mxu0 %v2089_v1 }
 0x3e8   :  { %v2183_v2 = vpop.eup %2182 }
 0x3e9   :  { %v686_v3 = vmul.f32 %v2183_v2, %v666_v4  ;;  %v687_v6 = vmul.f32 %v2183_v2, %v667_v33  ;;  %v2087_v2 = vld [vmem:[%s2962_s5 + $0x30] ss:$8 sps:$4 sm:$0xff]  }
 0x3ea   :  { %1268 = vmatpush1.bf16.msra.mxu0 %v2087_v2 }
 0x3eb   :  { %v703_v16 = vmul.f32 %v699_v9, %v687_v6  ;;  %v702_v17 = vmul.f32 %v695_v8, %v686_v3  ;;  %v2092_v3 = vld [vmem:[%s2962_s5 + $0x44] ss:$8 sps:$4 sm:$0xff]   ;;  %v2090_v6 = vld [vmem:[%s2962_s5 + $0x40] ss:$8 sps:$4 sm:$0xff]  }
 0x3ec   :  { %v2185_v11 = vpop.eup %2184  ;;  %1269 = vmatprep.subr.bf16.mxu0 %v2092_v3 }
 0x3ed   :  { %v688_v14 = vmul.f32 %v2185_v11, %v668_v37  ;;  %v689_v15 = vmul.f32 %v2185_v11, %v669_v38  ;;  %v719_v20 = vadd.f32 %v715_v13, %v703_v16  ;;  %v718_v22 = vadd.f32 %v711_v12, %v702_v17  ;;  %v2096_v11 = vld [vmem:[%s2962_s5 + $0x60] ss:$8 sps:$4 sm:$0xff]   ;;  %v2107_v16 = vld [vmem:[%s2962_s5 + $0x94] ss:$8 sps:$4 sm:$0xff]   ;;  %v2105_v17 = vld [vmem:[%s2962_s5 + $0x90] ss:$8 sps:$4 sm:$0xff]  }
 0x3ee   :  { %1270 = vmatpush1.bf16.msra.mxu0 %v2090_v6 }
 0x3ef   :  { %v705_v18 = vmul.f32 %v699_v9, %v689_v15  ;;  %v704_v19 = vmul.f32 %v695_v8, %v688_v14  ;;  %v2095_v8 = vld [vmem:[%s2962_s5 + $0x54] ss:$8 sps:$4 sm:$0xff]   ;;  %v2093_v9 = vld [vmem:[%s2962_s5 + $0x50] ss:$8 sps:$4 sm:$0xff]   ;;  %v2104_v14 = vld [vmem:[%s2962_s5 + $0x84] ss:$8 sps:$4 sm:$0xff]  }
 0x3f0   :  { %1271 = vmatprep.subr.bf16.mxu0 %v2095_v8  ;;  %v2102_v15 = vld [vmem:[%s2962_s5 + $0x80] ss:$8 sps:$4 sm:$0xff]  }
 0x3f1   :  { %v721_v21 = vadd.f32 %v715_v13, %v705_v18  ;;  %v720_v23 = vadd.f32 %v711_v12, %v704_v19  ;;  %v2101_v12 = vld [vmem:[%s2962_s5 + $0x74] ss:$8 sps:$4 sm:$0xff]   ;;  %v2099_v13 = vld [vmem:[%s2962_s5 + $0x70] ss:$8 sps:$4 sm:$0xff]  }
 0x3f2   :  { %1272 = vmatpush1.bf16.msra.mxu0 %v2093_v9  ;;  %v1023_v9 = vld [vmem:[%s2969_s12] sm:$0x3] }
 0x3f3   :  { %v755_v24 = vpack.c.bf16 %v721_v21, %v719_v20  ;;  %v754_v25 = vpack.c.bf16 %v720_v23, %v718_v22  ;;  %1273 = vmatprep.subr.bf16.mxu0 %v2098_v10  ;;  %v1028_v10 = vrot.slane %v1023_v9, %v2551_v39 }
 0x3f5   :  { %960 = vmatprep.mubr.bf16.mxu1 %v755_v24 }
 0x3f6   :  { %961 = vmatmul.mubr.bf16.vlgmr.msra.gmra.mrb[4].mxu1 %v754_v25  ;;  %1274 = vmatpush1.bf16.msra.mxu0 %v2096_v11  ;;  %v1032_v11 = vrot.slane %v1023_v9, %v2554_v40 }
 0x3f7   :  { %1275 = vmatprep.subr.bf16.mxu0 %v2101_v12  ;;  %v1039_v12 = vld [vmem:[%s2971_s14] sm:$0x3] }
 0x3fa   :  { %1276 = vmatpush1.bf16.msra.mxu0 %v2099_v13 }
 0x3fb   :  { %1277 = vmatprep.subr.bf16.mxu0 %v2104_v14 }
 0x3fe   :  { %1278 = vmatpush1.bf16.msra.mxu0 %v2102_v15 }
 0x3ff   :  { %1279 = vmatprep.subr.bf16.mxu0 %v2107_v16 }
 0x402   :  { %1280 = vmatpush1.bf16.msra.mxu0 %v2105_v17  ;;  %v1044_v17 = vrot.slane %v1039_v12, %v2551_v39 }
 0x4c9   :  { %v962_v29 = vpop.f32.mrb[4].mxu1 }
 0x4ca   :  { %v963_v30 = vadd.f32 %v962_v29, %v761_v27  ;;  %v964_v31 = vpop.f32.mrb[5].mxu1 }
 0x4cb   :  { %v965_v32 = vadd.f32 %v964_v31, %v765_v28  ;;  %v966_v4 = vpop.f32.mrb[6].mxu1 }
 0x4cc   :  { %v975_v33 = vmul.f32 0.70710677, %v963_v30  ;;  %v967_v7 = vadd.f32 %v966_v4, %v761_v27  ;;  %v968_v34 = vpop.f32.mrb[7].mxu1  ;;  %v971_v43 = vmul.f32 0.5, %v963_v30  ;;  %v2108_v4 = vld [vmem:[%s2962_s5 + $0xa0] ss:$8 sps:$4 sm:$0xff]  }
 0x4cd   :  { %v976_v35 = vmul.f32 0.70710677, %v965_v32  ;;  %v969_v36 = vadd.f32 %v968_v34, %v765_v28  ;;  %v972_v46 = vmul.f32 0.5, %v965_v32  ;;  %v2110_v32 = vld [vmem:[%s2962_s5 + $0xa4] ss:$8 sps:$4 sm:$0xff]  }
 0x4ce   :  { %2186 = verf.f32 %v975_v33  ;;  %v977_v37 = vmul.f32 0.70710677, %v967_v7  ;;  %v973_v49 = vmul.f32 0.5, %v967_v7  ;;  %1281 = vmatprep.subr.bf16.mxu0 %v2110_v32  ;;  %v2113_v33 = vld [vmem:[%s2962_s5 + $0xb4] ss:$8 sps:$4 sm:$0xff]  }
 0x4cf   :  { %2188 = verf.f32 %v976_v35  ;;  %v978_v38 = vmul.f32 0.70710677, %v969_v36  ;;  %v974_v52 = vmul.f32 0.5, %v969_v36  ;;  %1282 = vmatpush1.bf16.msra.mxu0 %v2108_v4  ;;  %v2111_v7 = vld [vmem:[%s2962_s5 + $0xb0] ss:$8 sps:$4 sm:$0xff]  }
 0x4d0   :  { %2190 = verf.f32 %v977_v37  ;;  %1283 = vmatprep.subr.bf16.mxu0 %v2113_v33  ;;  %v2116_v34 = vld [vmem:[%s2962_s5 + $0xc4] ss:$8 sps:$4 sm:$0xff]   ;;  %v2114_v35 = vld [vmem:[%s2962_s5 + $0xc0] ss:$8 sps:$4 sm:$0xff]   ;;  %v2119_v36 = vld [vmem:[%s2962_s5 + $0xd4] ss:$8 sps:$4 sm:$0xff]  }
 0x4d1   :  { %2192 = verf.f32 %v978_v38  ;;  %v2117_v37 = vld [vmem:[%s2962_s5 + $0xd0] ss:$8 sps:$4 sm:$0xff]   ;;  %v2122_v38 = vld [vmem:[%s2962_s5 + $0xe4] ss:$8 sps:$4 sm:$0xff]  }
 0x4d2   :  { %v2159_v33 = vld [vmem:[%s2963_s6 + $0xb0] ss:$8 sps:$4 sm:$0xff]  }
 0x4d3   :  { %1284 = vmatpush1.bf16.msra.mxu0 %v2111_v7  ;;  %v2164_v7 = vld [vmem:[%s2963_s6 + $0xc4] ss:$8 sps:$4 sm:$0xff]  }
 0x4d4   :  { %1285 = vmatprep.subr.bf16.mxu0 %v2116_v34  ;;  %v2162_v34 = vld [vmem:[%s2963_s6 + $0xc0] ss:$8 sps:$4 sm:$0xff]  }
 0x4d7   :  { %1286 = vmatpush1.bf16.msra.mxu0 %v2114_v35  ;;  %v2167_v35 = vld [vmem:[%s2963_s6 + $0xd4] ss:$8 sps:$4 sm:$0xff]  }
 0x4d8   :  { %v2187_v41 = vpop.eup %2186  ;;  %1287 = vmatprep.subr.bf16.mxu0 %v2119_v36  ;;  %v2165_v36 = vld [vmem:[%s2963_s6 + $0xd0] ss:$8 sps:$4 sm:$0xff]  }
 0x4d9   :  { %v2189_v42 = vpop.eup %2188  ;;  %v983_v44 = vadd.f32 1.0, %v2187_v41  ;;  %v2120_v41 = vld [vmem:[%s2962_s5 + $0xe0] ss:$8 sps:$4 sm:$0xff]  }
 0x4da   :  { %v2191_v45 = vpop.eup %2190  ;;  %v984_v47 = vadd.f32 1.0, %v2189_v42  ;;  %v2125_v42 = vld [vmem:[%s2962_s5 + $0xf4] ss:$8 sps:$4 sm:$0xff]  }
 0x4db   :  { %v2193_v48 = vpop.eup %2192  ;;  %v987_v50 = vmul.f32 %v983_v44, %v971_v43  ;;  %v985_v51 = vadd.f32 1.0, %v2191_v45  ;;  %1288 = vmatpush1.bf16.msra.mxu0 %v2117_v37  ;;  %v2123_v43 = vld [vmem:[%s2962_s5 + $0xf0] ss:$8 sps:$4 sm:$0xff]   ;;  %v2126_v44 = vld [vmem:[%s2963_s6] ss:$8 sps:$4 sm:$0xff]  }
 0x4dc   :  { %v988_v53 = vmul.f32 %v984_v47, %v972_v46  ;;  %v986_v54 = vadd.f32 1.0, %v2193_v48  ;;  %1289 = vmatprep.subr.bf16.mxu0 %v2122_v38  ;;  %v2128_v45 = vld [vmem:[%s2963_s6 + $0x4] ss:$8 sps:$4 sm:$0xff]   ;;  %v2131_v46 = vld [vmem:[%s2963_s6 + $0x14] ss:$8 sps:$4 sm:$0xff]  }
 0x4dd   :  { %v989_v55 = vmul.f32 %v985_v51, %v973_v49  ;;  %1530 = vmatprep.subr.bf16.mxu1 %v2128_v45  ;;  %v2129_v47 = vld [vmem:[%s2963_s6 + $0x10] ss:$8 sps:$4 sm:$0xff]   ;;  %v2134_v48 = vld [vmem:[%s2963_s6 + $0x24] ss:$8 sps:$4 sm:$0xff]   ;;  %v2132_v49 = vld [vmem:[%s2963_s6 + $0x20] ss:$8 sps:$4 sm:$0xff]  }
 0x4de   :  { %v991_v56 = vadd.f32 %v988_v53, %v987_v50  ;;  %v990_v57 = vmul.f32 %v986_v54, %v974_v52  ;;  %1531 = vmatpush1.bf16.msra.mxu1 %v2126_v44  ;;  %v2135_v51 = vld [vmem:[%s2963_s6 + $0x30] ss:$8 sps:$4 sm:$0xff]   ;;  %v2140_v52 = vld [vmem:[%s2963_s6 + $0x44] ss:$8 sps:$4 sm:$0xff]   ;;  %v2143_v54 = vld [vmem:[%s2963_s6 + $0x54] ss:$8 sps:$4 sm:$0xff]  }
 0x4df   :  { %1290 = vmatpush1.bf16.msra.mxu0 %v2120_v41  ;;  %1532 = vmatprep.subr.bf16.mxu1 %v2131_v46  ;;  %v2170_v37 = vld [vmem:[%s2963_s6 + $0xe4] ss:$8 sps:$4 sm:$0xff]   ;;  %v2168_v38 = vld [vmem:[%s2963_s6 + $0xe0] ss:$8 sps:$4 sm:$0xff]   ;;  %v2173_v41 = vld [vmem:[%s2963_s6 + $0xf4] ss:$8 sps:$4 sm:$0xff]  }
 0x4e0   :  { %992 = vadd.xlane.f32.xlu0 %v991_v56  ;;  %v994_v58 = vadd.f32 %v990_v57, %v989_v55  ;;  %1291 = vmatprep.subr.bf16.mxu0 %v2125_v42  ;;  %v2146_v56 = vld [vmem:[%s2963_s6 + $0x64] ss:$8 sps:$4 sm:$0xff]   ;;  %v2171_v42 = vld [vmem:[%s2963_s6 + $0xf0] ss:$8 sps:$4 sm:$0xff]  }
 0x4e2   :  { %995 = vadd.xlane.f32.xlu1 %v994_v58  ;;  %1533 = vmatpush1.bf16.msra.mxu1 %v2129_v47  ;;  %v2149_v58 = vld [vmem:[%s2963_s6 + $0x74] ss:$8 sps:$4 sm:$0xff]  }
 0x4e3   :  { %1292 = vmatpush1.bf16.msra.mxu0 %v2123_v43  ;;  %1534 = vmatprep.subr.bf16.mxu1 %v2134_v48  ;;  %v1089_v43 = vld [vmem:[%s2966_s9] sm:$0x3] }
 0x4e4   :  { %v1094_v44 = vrot.slane %v1089_v43, %v2551_v39  ;;  %v1098_v45 = vrot.slane %v1089_v43, %v2554_v40 }
 0x4e6   :  { %1535 = vmatpush1.bf16.msra.mxu1 %v2132_v49 }
 0x56d   :  { %v993_v18 = vpop.xlane.xlu0 %992 }
 0x56e   :  { %v997_v19 = vmul.f32 0.00390625, %v993_v18  ;;  %v1048_v18 = vrot.slane %v1039_v12, %v2554_v40 }
 0x56f   :  { %v996_v20 = vpop.xlane.xlu1 %995 }
 0x570   :  { %v2732_v21 = vsub.f32 %v987_v50, %v997_v19  ;;  %v2734_v22 = vsub.f32 %v988_v53, %v997_v19  ;;  %v998_v23 = vmul.f32 0.00390625, %v996_v20  ;;  %v2137_v50 = vld [vmem:[%s2963_s6 + $0x34] ss:$8 sps:$4 sm:$0xff]   ;;  %v2138_v53 = vld [vmem:[%s2963_s6 + $0x40] ss:$8 sps:$4 sm:$0xff]  }
 0x571   :  { %1536 = vmatprep.subr.bf16.mxu1 %v2137_v50 }
 0x572   :  { %v2736_v24 = vsub.f32 %v989_v55, %v998_v23  ;;  %v2738_v25 = vsub.f32 %v990_v57, %v998_v23  ;;  %v1003_v26 = vmul.f32 %v2732_v21, %v2732_v21  ;;  %v1004_v27 = vmul.f32 %v2734_v22, %v2734_v22  ;;  %1537 = vmatpush1.bf16.msra.mxu1 %v2135_v51  ;;  %v2141_v55 = vld [vmem:[%s2963_s6 + $0x50] ss:$8 sps:$4 sm:$0xff]   ;;  %v2144_v57 = vld [vmem:[%s2963_s6 + $0x60] ss:$8 sps:$4 sm:$0xff]  }
 0x573   :  { %1538 = vmatprep.subr.bf16.mxu1 %v2140_v52 }
 0x574   :  { %v1007_v28 = vadd.f32 %v1004_v27, %v1003_v26  ;;  %v1005_v29 = vmul.f32 %v2736_v24, %v2736_v24  ;;  %v1006_v30 = vmul.f32 %v2738_v25, %v2738_v25 }
 0x576   :  { %1008 = vadd.xlane.f32.xlu0 %v1007_v28  ;;  %v1010_v31 = vadd.f32 %v1006_v30, %v1005_v29  ;;  %1539 = vmatpush1.bf16.msra.mxu1 %v2138_v53 }
 0x577   :  { %1540 = vmatprep.subr.bf16.mxu1 %v2143_v54 }
 0x578   :  { %1011 = vadd.xlane.f32.xlu1 %v1010_v31 }
 0x57a   :  { %1541 = vmatpush1.bf16.msra.mxu1 %v2141_v55 }
 0x57b   :  { %1542 = vmatprep.subr.bf16.mxu1 %v2146_v56 }
 0x57e   :  { %1543 = vmatpush1.bf16.msra.mxu1 %v2144_v57 }
 0x57f   :  { %1544 = vmatprep.subr.bf16.mxu1 %v2149_v58 }
 0x582   :  { %1545 = vmatpush1.bf16.msra.mxu1 %v2147_v59 }
 0x583   :  { %1546 = vmatprep.subr.bf16.mxu1 %v2152_v60 }
 0x586   :  { %1547 = vmatpush1.bf16.msra.mxu1 %v2150_v61 }
 0x587   :  { %1548 = vmatprep.subr.bf16.mxu1 %v2155_v62 }
 0x58a   :  { %1549 = vmatpush1.bf16.msra.mxu1 %v2153_v63 }
 0x603   :  { %v1009_v0 = vpop.xlane.xlu0 %1008 }
 0x604   :  { %v1013_v1 = vmul.f32 0.00390625, %v1009_v0 }
 0x605   :  { %v1012_v2 = vpop.xlane.xlu1 %1011 }
 0x606   :  { %v1015_v3 = vadd.f32 1e-05, %v1013_v1  ;;  %v1014_v6 = vmul.f32 0.00390625, %v1012_v2 }
 0x608   :  { %2194 = vrsqrt.f32 %v1015_v3  ;;  %v1016_v8 = vadd.f32 1e-05, %v1014_v6 }
 0x60a   :  { %2196 = vrsqrt.f32 %v1016_v8 }
 0x612   :  { %v2195_v13 = vpop.eup %2194 }
 0x613   :  { %v1019_v14 = vmul.f32 %v2195_v13, %v2732_v21  ;;  %v1020_v15 = vmul.f32 %v2195_v13, %v2734_v22  ;;  %v2158_v22 = vld [vmem:[%s2963_s6 + $0xa4] ss:$8 sps:$4 sm:$0xff]  }
 0x614   :  { %v2197_v16 = vpop.eup %2196  ;;  %1550 = vmatprep.subr.bf16.mxu1 %v2158_v22 }
 0x615   :  { %v1021_v19 = vmul.f32 %v2197_v16, %v2736_v24  ;;  %v1022_v20 = vmul.f32 %v2197_v16, %v2738_v25  ;;  %v1036_v23 = vmul.f32 %v1032_v11, %v1020_v15  ;;  %v1035_v26 = vmul.f32 %v1028_v10, %v1019_v14  ;;  %v2156_v24 = vld [vmem:[%s2963_s6 + $0xa0] ss:$8 sps:$4 sm:$0xff]   ;;  %v2161_v25 = vld [vmem:[%s2963_s6 + $0xb4] ss:$8 sps:$4 sm:$0xff]  }
 0x616   :  { %1551 = vmatpush1.bf16.msra.mxu1 %v2156_v24  ;;  %v1358_v15 = vld [vmem:[%s2967_s10] sm:$0x3] }
 0x617   :  { %v1038_v27 = vmul.f32 %v1032_v11, %v1022_v20  ;;  %v1037_v28 = vmul.f32 %v1028_v10, %v1021_v19  ;;  %v1052_v29 = vadd.f32 %v1048_v18, %v1036_v23  ;;  %v1051_v31 = vadd.f32 %v1044_v17, %v1035_v26  ;;  %1552 = vmatprep.subr.bf16.mxu1 %v2161_v25 }
 0x618   :  { %v1363_v16 = vrot.slane %v1358_v15, %v2551_v39 }
 0x619   :  { %v1054_v30 = vadd.f32 %v1048_v18, %v1038_v27  ;;  %v1053_v32 = vadd.f32 %v1044_v17, %v1037_v28  ;;  %v1367_v17 = vrot.slane %v1358_v15, %v2554_v40 }
 0x61a   :  { %1553 = vmatpush1.bf16.msra.mxu1 %v2159_v33 }
 0x61b   :  { %v1088_v21 = vpack.c.bf16 %v1054_v30, %v1052_v29  ;;  %v1087_v4 = vpack.c.bf16 %v1053_v32, %v1051_v31  ;;  %1554 = vmatprep.subr.bf16.mxu1 %v2164_v7 }
 0x61d   :  { %1293 = vmatprep.mubr.bf16.mxu0 %v1088_v21 }
 0x61e   :  { %1294 = vmatmul.mubr.bf16.vlgmr.msra.gmra.mrb[8].mxu0 %v1087_v4  ;;  %1555 = vmatpush1.bf16.msra.mxu1 %v2162_v34 }
 0x61f   :  { %1556 = vmatprep.subr.bf16.mxu1 %v2167_v35 }
 0x622   :  { %1557 = vmatpush1.bf16.msra.mxu1 %v2165_v36  ;;  %v1691_v36 = vsub.s32 3, %v2345_v5 }
 0x623   :  { %1558 = vmatprep.subr.bf16.mxu1 %v2170_v37  ;;  %v56_v37 = vld [vmem:[%s2958_s1] sm:$0xf]  ;;  %s2249_s1 = smov [#allocation2]  }
 0x624   :  { %v1652_v43 = vrot.slane %v56_v37, %v2551_v39  ;;  %s1733_s4 = sshll.u32 %s2249_s1, 4  ;;  %s1734_s4 = int_to_ptr.vmem [resolvable:$true] %s1733_s4 }
 0x625   :  { %s2222_s26 = scalar_lea.vmem %s1734_s4, 512  ;;  %p2227_p1 = scmp.lt.s32.totalorder %s1734_s4, %s1734_s4 }
 0x626   :  { %1559 = vmatpush1.bf16.msra.mxu1 %v2168_v38  ;;  %v1655_v38 = vsub.s32 2, %v2345_v5  ;;  %p2223_p0 = scmp.ne.s32.totalorder %s1734_s4, %s2222_s26  ;;  %p2228_p2 = scmp.lt.s32.totalorder %s2222_s26, %s2222_s26 }
 0x627   :  { %1560 = vmatprep.subr.bf16.mxu1 %v2173_v41  ;;  %v1688_v41 = vrot.slane %v56_v37, %v2554_v40 }
 0x628   :  { %p2229_p3 = por %p2228_p2, %p2227_p1 }
 0x62a   :  { %1561 = vmatpush1.bf16.msra.mxu1 %v2171_v42  ;;  %v1692_v42 = vrot.slane %v56_v37, %v1691_v36  ;;  %p2230_p4 = pnand %p2229_p3, %p2223_p0 }
 0x6f1   :  { %v1295_v46 = vpop.f32.mrb[8].mxu0 }
 0x6f2   :  { %v1296_v47 = vadd.f32 %v1295_v46, %v1094_v44  ;;  %v1297_v48 = vpop.f32.mrb[9].mxu0 }
 0x6f3   :  { %v1298_v49 = vadd.f32 %v1297_v48, %v1098_v45  ;;  %v1299_v50 = vpop.f32.mrb[10].mxu0  ;;  %v1698_v48 = vrot.slane %v1688_v41, %v2554_v40 }
 0x6f4   :  { %v1308_v51 = vmul.f32 0.70710677, %v1296_v47  ;;  %v1300_v52 = vadd.f32 %v1299_v50, %v1094_v44  ;;  %v1301_v53 = vpop.f32.mrb[11].mxu0  ;;  %v1304_v0 = vmul.f32 0.5, %v1296_v47 }
 0x6f5   :  { %v1309_v54 = vmul.f32 0.70710677, %v1298_v49  ;;  %v1302_v55 = vadd.f32 %v1301_v53, %v1098_v45  ;;  %v1305_v3 = vmul.f32 0.5, %v1298_v49  ;;  %v1656_v45 = vrot.slane %v56_v37, %v1655_v38 }
 0x6f6   :  { %2198 = verf.f32 %v1308_v51  ;;  %v1310_v56 = vmul.f32 0.70710677, %v1300_v52  ;;  %v1306_v1 = vmul.f32 0.5, %v1300_v52  ;;  %v1702_v49 = vrot.slane %v1692_v42, %v2554_v40 }
 0x6f7   :  { %2200 = verf.f32 %v1309_v54  ;;  %v1311_v57 = vmul.f32 0.70710677, %v1302_v55  ;;  %v1307_v6 = vmul.f32 0.5, %v1302_v55  ;;  %v1662_v53 = vrot.slane %v1652_v43, %v2551_v39 }
 0x6f8   :  { %2202 = verf.f32 %v1310_v56  ;;  %v1666_v54 = vrot.slane %v1656_v45, %v2551_v39  ;;  %v1703_v55 = vmul.f32 0.0, %v1698_v48  ;;  %v1704_v56 = vmul.f32 0.0, %v1702_v49 }
 0x6f9   :  { %2204 = verf.f32 %v1311_v57 }
 0x6fa   :  { %v1670_v40 = vmul.f32 0.0, %v1666_v54 }
 0x700   :  { %v2199_v58 = vpop.eup %2198 }
 0x701   :  { %v2201_v59 = vpop.eup %2200  ;;  %v1316_v60 = vadd.f32 1.0, %v2199_v58 }
 0x702   :  { %v2203_v61 = vpop.eup %2202  ;;  %v1317_v62 = vadd.f32 1.0, %v2201_v59 }
 0x703   :  { %v2205_v63 = vpop.eup %2204  ;;  %v1318_v2 = vadd.f32 1.0, %v2203_v61  ;;  %v1320_v9 = vmul.f32 %v1316_v60, %v1304_v0  ;;  %v1669_v60 = vmul.f32 0.0, %v1662_v53 }
 0x704   :  { %v1319_v8 = vadd.f32 1.0, %v2205_v63  ;;  %v1321_v11 = vmul.f32 %v1317_v62, %v1305_v3  ;;  %v1707_v62 = vadd.f32 %v1703_v55, %v1662_v53  ;;  %v1708_v63 = vadd.f32 %v1704_v56, %v1666_v54 }
 0x705   :  { %v1322_v10 = vmul.f32 %v1318_v2, %v1306_v1 }
 0x706   :  { %v1323_v12 = vmul.f32 %v1319_v8, %v1307_v6  ;;  %v1709_v6 = vadd.f32 %v1698_v48, %v1669_v60 }
 0x707   :  { %v1356_v13 = vpack.c.bf16 %v1322_v10, %v1320_v9  ;;  %v1710_v10 = vadd.f32 %v1702_v49, %v1670_v40 }
 0x708   :  { %v1357_v14 = vpack.c.bf16 %v1323_v12, %v1321_v11 }
 0x70a   :  { %1562 = vmatprep.mubr.bf16.mxu1 %v1357_v14 }
 0x70b   :  { %1563 = vmatmul.mubr.bf16.vlgmr.msra.gmra.mrb[8].mxu1 %v1356_v13 }
 0x7de   :  { %v1564_v18 = vpop.f32.mrb[8].mxu1 }
 0x7df   :  { %v2904_v19 = vadd.f32 %v1564_v18, %v1363_v16  ;;  %v1566_v20 = vpop.f32.mrb[9].mxu1 }
 0x7e0   :  { %v2906_v23 = vadd.f32 %v1566_v20, %v1367_v17  ;;  %v1568_v26 = vpop.f32.mrb[10].mxu1 }
 0x7e1   :  { %1573 = vst [vmem:[#allocation2] sm:$0xff] %v2904_v19  ;;  %v1581_v27 = vand.u32 2147483647, %v2904_v19  ;;  %v2910_v28 = vadd.f32 %v1568_v26, %v1363_v16  ;;  %v1570_v29 = vpop.f32.mrb[11].mxu1  ;;  %v1577_v8 = vmax.f32 %v2904_v19, 0.0  ;;  %v1711_v13 = vmul.f32 %v1707_v62, %v2904_v19 }
 0x7e2   :  { %1574 = vst [vmem:[#allocation2 + $0x8] sm:$0xff] %v2906_v23  ;;  %v1582_v30 = vand.u32 2147483647, %v2906_v23  ;;  %v2914_v31 = vadd.f32 %v1570_v29, %v1367_v17  ;;  %v1578_v12 = vmax.f32 %v2906_v23, 0.0  ;;  %v1712_v14 = vmul.f32 %v1708_v63, %v2906_v23 }
 0x7e3   :  { %v1585_v32 = vsub.f32 0.0, %v1581_v27  ;;  %1575 = vst [vmem:[#allocation2 + $0x10] sm:$0xff] %v2910_v28  ;;  %v1583_v21 = vand.u32 2147483647, %v2910_v28  ;;  %v1579_v20 = vmax.f32 %v2910_v28, 0.0  ;;  %v1713_v23 = vmul.f32 %v1709_v6, %v2910_v28 }
 0x7e4   :  { %v1586_v4 = vsub.f32 0.0, %v1582_v30  ;;  %1576 = vst [vmem:[#allocation2 + $0x18] sm:$0xff] %v2914_v31  ;;  %v1584_v22 = vand.u32 2147483647, %v2914_v31  ;;  %v1580_v37 = vmax.f32 %v2914_v31, 0.0 }
 0x7e5   :  { %v1589_v24 = vmul.f32 1.442695, %v1585_v32  ;;  %v1587_v25 = vsub.f32 0.0, %v1583_v21 }
 0x7e6   :  { %v1591_v33 = vmul.f32 1.442695, %v1586_v4  ;;  %v1588_v7 = vsub.f32 0.0, %v1584_v22 }
 0x7e7   :  { %2206 = vpow2.f32 %v1589_v24  ;;  %v1593_v34 = vmul.f32 1.442695, %v1587_v25 }
 0x7e8   :  { %2208 = vpow2.f32 %v1591_v33  ;;  %v1595_v35 = vmul.f32 1.442695, %v1588_v7 }
 0x7e9   :  { %2210 = vpow2.f32 %v1593_v34 }
 0x7ea   :  { %2212 = vpow2.f32 %v1595_v35 }
 0x7f1   :  { %v2207_v44 = vpop.eup %2206 }
 0x7f2   :  { %v2209_v46 = vpop.eup %2208  ;;  %v1597_v47 = vadd.f32 1.0, %v2207_v44  ;;  %v1600_v58 = vmul.f32 -0.5, %v2207_v44  ;;  %v1603_v2 = vand.u32 2147483647, %v2207_v44 }
 0x7f3   :  { %v2211_v50 = vpop.eup %2210  ;;  %v1606_v51 = vadd.f32 1.0, %v2209_v46  ;;  %v1609_v59 = vmul.f32 -0.5, %v2209_v46  ;;  %v1612_v39 = vand.u32 2147483647, %v2209_v46 }
 0x7f4   :  { %v2213_v52 = vpop.eup %2212  ;;  %2214 = vlog2.f32 %v1597_v47  ;;  %v1615_v5 = vadd.f32 1.0, %v2211_v50  ;;  %v1618_v61 = vmul.f32 -0.5, %v2211_v50  ;;  %v1601_v0 = vadd.f32 1.0, %v1600_v58 }
 0x7f5   :  { %2216 = vlog2.f32 %v1606_v51  ;;  %v1624_v57 = vadd.f32 1.0, %v2213_v52  ;;  %v1627_v1 = vmul.f32 -0.5, %v2213_v52  ;;  %v1610_v3 = vadd.f32 1.0, %v1609_v59 }
 0x7f6   :  { %2218 = vlog2.f32 %v1615_v5  ;;  %v1619_v9 = vadd.f32 1.0, %v1618_v61  ;;  %v1621_v15 = vand.u32 2147483647, %v2211_v50  ;;  %v1602_v18 = vmul.f32 %v2207_v44, %v1601_v0 }
 0x7f7   :  { %2220 = vlog2.f32 %v1624_v57  ;;  %v1628_v26 = vadd.f32 1.0, %v1627_v1  ;;  %vm1604_vm14 = vcmp.lt.f32.partialorder %v1603_v2, 0.0004427343  ;;  %v1611_v30 = vmul.f32 %v2209_v46, %v1610_v3 }
 0x7f8   :  { %v1630_v32 = vand.u32 2147483647, %v2213_v52  ;;  %vm1613_vm15 = vcmp.lt.f32.partialorder %v1612_v39, 0.0004427343  ;;  %v1620_v22 = vmul.f32 %v2211_v50, %v1619_v9  ;;  %vm1622_vm0 = vcmp.lt.f32.partialorder %v1621_v15, 0.0004427343 }
 0x7f9   :  { %v1629_v35 = vmul.f32 %v2213_v52, %v1628_v26  ;;  %v1714_v44 = vmul.f32 %v1710_v10, %v2914_v31 }
 0x7fa   :  { %vm1631_vm1 = vcmp.lt.f32.partialorder %v1630_v32, 0.0004427343 }
 0x7fe   :  { %v2215_v11 = vpop.eup %2214 }
 0x7ff   :  { %v2217_v16 = vpop.eup %2216  ;;  %v1599_v17 = vmul.f32 0.6931472, %v2215_v11 }
 0x800   :  { %v2219_v27 = vpop.eup %2218  ;;  %v1608_v29 = vmul.f32 0.6931472, %v2217_v16 }
 0x801   :  { %v1605_v21 = vsel %vm1604_vm14, %v1602_v18, %v1599_v17  ;;  %v1617_v4 = vmul.f32 0.6931472, %v2219_v27  ;;  %v2221_v24 = vpop.eup %2220 }
 0x802   :  { %v1614_v19 = vsel %vm1613_vm15, %v1611_v30, %v1608_v29  ;;  %v1633_v25 = vadd.f32 %v1605_v21, %v1577_v8  ;;  %v1626_v34 = vmul.f32 0.6931472, %v2221_v24 }
 0x803   :  { %v1634_v33 = vadd.f32 %v1614_v19, %v1578_v12  ;;  %v1623_v7 = vsel %vm1622_vm0, %v1620_v22, %v1617_v4 }
 0x804   :  { %v1715_v36 = vsub.f32 %v1711_v13, %v1633_v25  ;;  %v1635_v38 = vadd.f32 %v1623_v7, %v1579_v20  ;;  %v1632_v42 = vsel %vm1631_vm1, %v1629_v35, %v1626_v34 }
 0x805   :  { %v1716_v41 = vsub.f32 %v1712_v14, %v1634_v33  ;;  %v1636_v43 = vadd.f32 %v1632_v42, %v1580_v37 }
 0x806   :  { %v1717_v45 = vsub.f32 %v1713_v23, %v1635_v38 }
 0x807   :  { %v1719_v46 = vadd.f32 %v1716_v41, %v1715_v36  ;;  %v1718_v47 = vsub.f32 %v1714_v44, %v1636_v43 }
 0x809   :  { %1720 = vadd.xlane.f32.xlu0 %v1719_v46  ;;  %v1722_v48 = vadd.f32 %v1718_v47, %v1717_v45 }
 0x80b   :  { %1723 = vadd.xlane.f32.xlu1 %v1722_v48 }
 0x80c   :  { %2233 = shalt.err (!%p2230_p4)
}
 0x80d   :  { %s2234_s8 = scalar_lea.hbm %s2972_s15, 512 }
 0x80e   :  { %p2235_p5 = scmp.ne.s32.totalorder %s2972_s15, %s2234_s8  ;;  %p2238_p6 = scmp.lt.u32.totalorder %s2234_s8, %s2972_s15 }
 0x810   :  { %p2240_p7 = pnand %p2238_p6, %p2235_p5 }
 0x812   :  { %2243 = shalt.err (!%p2240_p7)
}
 0x813   :  { %s2250_s0 = smov 256   ;;  %s2251_s5 = smov 16   ;;  %vm1725_vm2 = vcmask 7168  }
 0x814   :  { %1739 = dma.vmem_to_hbm [thread:$0]  %s1734_s4, 512, %s2972_s15, [#allocation3], %s2250_s0, %s2250_s0, %s2251_s5  }
 0x896   :  { %v1721_v28 = vpop.xlane.xlu0 %1720 }
 0x897   :  { %1726 = vst.msk [vmem:[%s2973_s16] sm:$0xff] %vm1725_vm2, %v1721_v28 }
 0x898   :  { %v1724_v31 = vpop.xlane.xlu1 %1723 }
 0x899   :  { %1727 = vst.msk [vmem:[%s2973_s16 + $0x8] sm:$0xff] %vm1725_vm2, %v1724_v31 }
 0x89a   :  { %2244 = dma.done.wait [#allocation3], 512  }
 0x89b   :  { %2245 = vsyncadd [#allocation3], 4294966784 }
 0x89c   :  { %1747 = vsyncpa [#allocation3], 1 }

</bundles_post_ra>
